<compile_context>
chip_gen: v7x
topology: tpu7x:2x2x1
jax: 0.10.0
libtpu: 0.0.40
codegen_flags: <defaults>
</compile_context>

<pallas_src>
import jax
import jax.numpy as jnp
from jax.experimental import pallas as pl
from jax.experimental.pallas import tpu as pltpu


def _round_up(x, m):
    return ((x + m - 1) // m) * m


# ----------------------------------------------------------------------------
# Pallas kernel 1: transposed conv matmul  relu(W(Cout,K) @ P^T(K,M) + b).
# Output is lane-dense over M = N*OH*OW; Cout split 2-way ("parallel") for v7x.
# ----------------------------------------------------------------------------
def _conv_mm_kernel(w_ref, p_ref, b_ref, o_ref):
    acc = jnp.dot(w_ref[...], p_ref[...], preferred_element_type=jnp.float32)
    acc = jnp.maximum(acc + b_ref[...], 0.0)           # (CO_BLK, M_BLK) + (CO_BLK, 1)
    o_ref[...] = acc.astype(o_ref.dtype)


def conv_matmul_pallas(w_mat, patches_t, b, *, co_split=2, m_blk_cap=2048):
    """w_mat: (Cout, K) bf16, patches_t: (K, M_pad) bf16, b: (Cout,) f32
       -> relu(w_mat @ patches_t + b) as (Cout, M_pad) bf16."""
    cout, k = w_mat.shape
    k2, m_pad = patches_t.shape
    assert k == k2
    co_blk = cout // co_split                          # 16 / 32 here, multiple of 8
    m_blk = min(m_pad, m_blk_cap)                      # full-M block at inference sizes
    assert cout % co_blk == 0 and co_blk % 8 == 0
    assert m_pad % m_blk == 0 and m_blk % 128 == 0

    return pl.pallas_call(
        _conv_mm_kernel,
        out_shape=jax.ShapeDtypeStruct((cout, m_pad), jnp.bfloat16),
        grid=(cout // co_blk, m_pad // m_blk),
        in_specs=[
            pl.BlockSpec((co_blk, k), lambda co, mi: (co, 0)),
            pl.BlockSpec((k, m_blk), lambda co, mi: (0, mi)),
            pl.BlockSpec((co_blk, 1), lambda co, mi: (co, 0)),
        ],
        out_specs=pl.BlockSpec((co_blk, m_blk), lambda co, mi: (co, mi)),
        compiler_params=pltpu.CompilerParams(
            dimension_semantics=("parallel", "parallel")),
    )(w_mat, patches_t, b.reshape(cout, 1).astype(jnp.float32))


# ----------------------------------------------------------------------------
# Pallas kernel 2: fused fc4(+ReLU) + head, fc4 columns split 2-way ("parallel").
# Hidden (tm, 256) per half never leaves VMEM; partial head outputs summed in XLA.
# ----------------------------------------------------------------------------
def _mlp_head_kernel(x_ref, w4_ref, b4_ref, w5_ref, o_ref):
    h = jnp.dot(x_ref[...], w4_ref[...], preferred_element_type=jnp.float32)
    h = jnp.maximum(h + b4_ref[...], 0.0)              # (TM, H_BLK) f32, stays on-chip
    y = jnp.dot(h.astype(jnp.bfloat16), w5_ref[...],
                preferred_element_type=jnp.float32)    # (TM, OUT) partial
    o_ref[0] = y


def mlp_head_pallas(x, w4, b4, w5, b5, *, h_split=2):
    """x: (B, 3136) bf16 -> (B, outputs) f32 ; relu(x@w4+b4) @ w5 + b5 in one call."""
    bsz, k = x.shape
    k2, hdim = w4.shape
    h2, n_out = w5.shape
    assert k == k2 and hdim == h2 and hdim % h_split == 0
    h_blk = hdim // h_split
    tm = min(128, _round_up(bsz, 16))                  # bf16 packs 16 rows per sublane group
    m_pad = _round_up(bsz, tm)
    if m_pad != bsz:
        x = jnp.pad(x, ((0, m_pad - bsz), (0, 0)))

    partial = pl.pallas_call(
        _mlp_head_kernel,
        out_shape=jax.ShapeDtypeStruct((h_split, m_pad, n_out), jnp.float32),
        grid=(h_split, m_pad // tm),
        in_specs=[
            pl.BlockSpec((tm, k), lambda hj, i: (i, 0)),
            pl.BlockSpec((k, h_blk), lambda hj, i: (0, hj)),
            pl.BlockSpec((1, h_blk), lambda hj, i: (0, hj)),
            pl.BlockSpec((h_blk, n_out), lambda hj, i: (hj, 0)),
        ],
        out_specs=pl.BlockSpec((1, tm, n_out), lambda hj, i: (hj, i, 0)),
        compiler_params=pltpu.CompilerParams(
            dimension_semantics=("parallel", "parallel")),
    )(x, w4.astype(jnp.bfloat16), b4.reshape(1, hdim).astype(jnp.float32),
      w5.astype(jnp.bfloat16))
    # Sum the two column-half contributions (tiny: h_split x B x outputs) and add b5.
    out = jnp.sum(partial, axis=0) + b5.reshape(1, n_out).astype(jnp.float32)
    return out[:bsz]


# ----------------------------------------------------------------------------
# im2col glue (plain JAX), transposed: CNHW input -> (kh*kw*Cin, N*OH*OW).
# Row order (kh, kw, cin) — matched by flattening the weight as OHWI (no activation
# transpose anywhere).
# ----------------------------------------------------------------------------
def im2col_t(x_cnhw, kh, kw, stride):
    c, n, h, w = x_cnhw.shape
    oh = (h - kh) // stride + 1
    ow = (w - kw) // stride + 1
    cols = []
    for i in range(kh):
        for j in range(kw):
            cols.append(jax.lax.slice(
                x_cnhw,
                (0, 0, i, j),
                (c, n, i + stride * (oh - 1) + 1, j + stride * (ow - 1) + 1),
                (1, 1, stride, stride)))               # (C, N, OH, OW)
    col = jnp.stack(cols, axis=0)                      # (kh*kw, C, N, OH, OW) — no transpose
    return col.reshape(kh * kw * c, n * oh * ow), oh, ow


def conv2d_pallas(x_cnhw, w_oihw, b, stride):
    """x: (Cin, N, H, W) bf16 -> relu(conv2d) as (Cout, N, OH, OW) bf16 (channel-major)."""
    cin, n = x_cnhw.shape[0], x_cnhw.shape[1]
    cout, cin2, kh, kw = w_oihw.shape
    assert cin == cin2
    pat_t, oh, ow = im2col_t(x_cnhw, kh, kw, stride)   # (K, M) bf16, rows (kh, kw, cin)
    m = n * oh * ow
    m_blk = min(_round_up(m, 128), 2048)               # full-M block at small batch,
    m_pad = _round_up(m, m_blk)                        # capped for v7x VMEM at train batch
    if m_pad != m:                                     # padded lanes hold relu(bias); sliced off
        pat_t = jnp.pad(pat_t, ((0, 0), (0, m_pad - m)))
    # OHWI weight flatten matches the (kh, kw, cin) patch-row order.
    w_mat = jnp.transpose(w_oihw, (0, 2, 3, 1)).reshape(cout, kh * kw * cin).astype(jnp.bfloat16)
    y = conv_matmul_pallas(w_mat, pat_t, b)            # (Cout, M_pad) bf16
    return y[:, :m].reshape(cout, n, oh, ow)


# ----------------------------------------------------------------------------
# DQN forward
# ----------------------------------------------------------------------------
def dqn_forward(x, params):
    """x: (N, 4, 84, 84) f32 -> (N, outputs) f32."""
    xc = jnp.transpose(x, (1, 0, 2, 3)).astype(jnp.bfloat16)        # CNHW bf16
    a = conv2d_pallas(xc, params["w1"], params["b1"], stride=4)     # (32, N, 20, 20)
    a = conv2d_pallas(a, params["w2"], params["b2"], stride=2)      # (64, N, 9, 9)
    a = conv2d_pallas(a, params["w3"], params["b3"], stride=1)      # (64, N, 7, 7)
    n = x.shape[0]
    # PyTorch x.view(N, -1) flattens NCHW in (C, H, W) order; this transpose is tiny.
    xf = jnp.transpose(a, (1, 0, 2, 3)).reshape(n, -1)              # (N, 3136) bf16
    return mlp_head_pallas(xf, params["w4"], params["b4"],
                           params["w5"], params["b5"])


def make_params(key, outputs):
    ks = jax.random.split(key, 10)
    def init(k, shape, fan_in):
        return (jax.random.normal(k, shape, jnp.float32) / jnp.sqrt(fan_in)).astype(jnp.float32)
    return {
        "w1": init(ks[0], (32, 4, 8, 8), 4 * 8 * 8),
        "b1": init(ks[1], (32,), 4 * 8 * 8),
        "w2": init(ks[2], (64, 32, 4, 4), 32 * 4 * 4),
        "b2": init(ks[3], (64,), 32 * 4 * 4),
        "w3": init(ks[4], (64, 64, 3, 3), 64 * 3 * 3),
        "b3": init(ks[5], (64,), 64 * 3 * 3),
        "w4": init(ks[6], (3136, 512), 3136),
        "b4": init(ks[7], (512,), 3136),
        "w5": init(ks[8], (512, outputs), 512),
        "b5": init(ks[9], (outputs,), 512),
    }


# Pure-JAX reference.  compute_dtype=bf16 quantizes matmul inputs exactly like the
# kernels do (f32 accumulation everywhere) for a tight check; f32 gives the exact
# PyTorch-equivalent math for a loose check.
def dqn_forward_ref(x, params, compute_dtype=jnp.float32):
    cd = compute_dtype
    def conv(v, w, b, s):
        y = jax.lax.conv_general_dilated(
            v.astype(cd), w.astype(cd), (s, s), "VALID",
            dimension_numbers=("NCHW", "OIHW", "NCHW"),
            preferred_element_type=jnp.float32)
        return jax.nn.relu(y + b.reshape(1, -1, 1, 1))
    v = conv(x, params["w1"], params["b1"], 4)
    v = conv(v, params["w2"], params["b2"], 2)
    v = conv(v, params["w3"], params["b3"], 1)
    v = v.reshape(v.shape[0], -1)
    h = jax.nn.relu(jnp.dot(v.astype(cd), params["w4"].astype(cd),
                            preferred_element_type=jnp.float32) + params["b4"])
    return jnp.dot(h.astype(cd), params["w5"].astype(cd),
                   preferred_element_type=jnp.float32) + params["b5"]


if __name__ == "__main__":
    key = jax.random.PRNGKey(0)
    k_x, k_p = jax.random.split(key)

    batch, outputs = 2, 6
    # fc4 expects 3136 = 64*7*7 features => input spatial size must be 84x84
    # (classic DQN Atari preprocessing); channels = 4 stacked frames.
    x = jax.random.normal(k_x, (batch, 4, 84, 84), jnp.float32)
    params = make_params(k_p, outputs)

    fwd = jax.jit(dqn_forward)
    out = jax.block_until_ready(fwd(x, params))
    assert out.shape == (batch, outputs), out.shape

    # Tight check: same bf16 operand quantization / f32 accumulation as the kernels.
    ref_bf16 = jax.block_until_ready(dqn_forward_ref(x, params, jnp.bfloat16))
    assert jnp.allclose(out, ref_bf16, atol=2e-3, rtol=2e-3), "mismatch vs bf16 reference"

    # Loose check: pure-f32 reference (bf16 matmul inputs => ~1% numerical drift,
    # tolerance loosened deliberately; fine for DQN inference).
    ref_f32 = jax.block_until_ready(dqn_forward_ref(x, params, jnp.float32))
    assert jnp.allclose(out, ref_f32, atol=5e-2, rtol=5e-2), "mismatch vs f32 reference"

    print("KERNEL_OK")
</pallas_src>

<mosaic_0001>
module attributes {stable_mosaic.version = 11 : i64} {
  func.func @_conv_mm_kernel(%arg0: i32, %arg1: i32, %arg2: memref<16x256xbf16, #tpu.memory_space<vmem>>, %arg3: memref<256x896xbf16, #tpu.memory_space<vmem>>, %arg4: memref<16x1xf32, #tpu.memory_space<vmem>>, %arg5: memref<16x896xbf16, #tpu.memory_space<vmem>>) attributes {dimension_semantics = [#tpu.dimension_semantics<parallel>, #tpu.dimension_semantics<parallel>], iteration_bounds = array<i64: 2, 1>, scalar_prefetch = 0 : i64, scratch_operands = 0 : i64, tpu.core_type = #tpu.core_type<tc>, window_params = [{transform_indices = @transform_0, window_bounds = array<i64: 16, 256>}, {transform_indices = @transform_1, window_bounds = array<i64: 256, 896>}, {transform_indices = @transform_2, window_bounds = array<i64: 16, 1>}, {transform_indices = @transform_3, window_bounds = array<i64: 16, 896>}]} {
    %c0 = arith.constant 0 : index
    %c0_0 = arith.constant 0 : index
    %0 = vector.load %arg2[%c0, %c0_0] : memref<16x256xbf16, #tpu.memory_space<vmem>>, vector<16x256xbf16>
    %c0_1 = arith.constant 0 : index
    %c0_2 = arith.constant 0 : index
    %1 = vector.load %arg3[%c0_1, %c0_2] : memref<256x896xbf16, #tpu.memory_space<vmem>>, vector<256x896xbf16>
    %cst = arith.constant dense<0.000000e+00> : vector<16x896xf32>
    %2 = tpu.matmul %0, %1, %cst {dimension_numbers = #tpu.dot_dimension_numbers<[1], [0], [0], [1], [0, 0, 1, 1], [], []>} : vector<16x256xbf16>, vector<256x896xbf16>, vector<16x896xf32> -> vector<16x896xf32>
    %c0_3 = arith.constant 0 : index
    %c0_4 = arith.constant 0 : index
    %3 = vector.load %arg4[%c0_3, %c0_4] : memref<16x1xf32, #tpu.memory_space<vmem>>, vector<16x1xf32>
    %4 = vector.broadcast %3 : vector<16x1xf32> to vector<16x896xf32>
    %5 = arith.addf %2, %4 : vector<16x896xf32>
    %cst_5 = arith.constant 0.000000e+00 : f32
    %6 = vector.broadcast %cst_5 : f32 to vector<16x896xf32>
    %7 = arith.maximumf %5, %6 : vector<16x896xf32>
    %8 = arith.truncf %7 : vector<16x896xf32> to vector<16x896xbf16>
    %c0_6 = arith.constant 0 : index
    %c0_7 = arith.constant 0 : index
    %9 = vector.load %arg5[%c0_6, %c0_7] : memref<16x896xbf16, #tpu.memory_space<vmem>>, vector<16x896xbf16>
    tpu.vector_store %arg5[%c0_6, %c0_7], %8 {strides = array<i32>} : memref<16x896xbf16, #tpu.memory_space<vmem>>, vector<16x896xbf16>,
    return
  }
  func.func @transform_0(%arg0: i32, %arg1: i32) -> (i32, i32) {
    %c0_i32 = arith.constant 0 : i32
    %c0_i32_0 = arith.constant 0 : i32
    return %arg0, %c0_i32 : i32, i32
  }
  func.func @transform_1(%arg0: i32, %arg1: i32) -> (i32, i32) {
    %c0_i32 = arith.constant 0 : i32
    %c0_i32_0 = arith.constant 0 : i32
    return %c0_i32, %arg1 : i32, i32
  }
  func.func @transform_2(%arg0: i32, %arg1: i32) -> (i32, i32) {
    %c0_i32 = arith.constant 0 : i32
    %c0_i32_0 = arith.constant 0 : i32
    return %arg0, %c0_i32 : i32, i32
  }
  func.func @transform_3(%arg0: i32, %arg1: i32) -> (i32, i32) {
    %c0_i32 = arith.constant 0 : i32
    return %arg0, %arg1 : i32, i32
  }
}

module attributes {stable_mosaic.version = 11 : i64} {
  func.func @_conv_mm_kernel(%arg0: i32, %arg1: i32, %arg2: memref<32x512xbf16, #tpu.memory_space<vmem>>, %arg3: memref<512x256xbf16, #tpu.memory_space<vmem>>, %arg4: memref<32x1xf32, #tpu.memory_space<vmem>>, %arg5: memref<32x256xbf16, #tpu.memory_space<vmem>>) attributes {dimension_semantics = [#tpu.dimension_semantics<parallel>, #tpu.dimension_semantics<parallel>], iteration_bounds = array<i64: 2, 1>, scalar_prefetch = 0 : i64, scratch_operands = 0 : i64, tpu.core_type = #tpu.core_type<tc>, window_params = [{transform_indices = @transform_0, window_bounds = array<i64: 32, 512>}, {transform_indices = @transform_1, window_bounds = array<i64: 512, 256>}, {transform_indices = @transform_2, window_bounds = array<i64: 32, 1>}, {transform_indices = @transform_3, window_bounds = array<i64: 32, 256>}]} {
    %c0 = arith.constant 0 : index
    %c0_0 = arith.constant 0 : index
    %0 = vector.load %arg2[%c0, %c0_0] : memref<32x512xbf16, #tpu.memory_space<vmem>>, vector<32x512xbf16>
    %c0_1 = arith.constant 0 : index
    %c0_2 = arith.constant 0 : index
    %1 = vector.load %arg3[%c0_1, %c0_2] : memref<512x256xbf16, #tpu.memory_space<vmem>>, vector<512x256xbf16>
    %cst = arith.constant dense<0.000000e+00> : vector<32x256xf32>
    %2 = tpu.matmul %0, %1, %cst {dimension_numbers = #tpu.dot_dimension_numbers<[1], [0], [0], [1], [0, 0, 1, 1], [], []>} : vector<32x512xbf16>, vector<512x256xbf16>, vector<32x256xf32> -> vector<32x256xf32>
    %c0_3 = arith.constant 0 : index
    %c0_4 = arith.constant 0 : index
    %3 = vector.load %arg4[%c0_3, %c0_4] : memref<32x1xf32, #tpu.memory_space<vmem>>, vector<32x1xf32>
    %4 = vector.broadcast %3 : vector<32x1xf32> to vector<32x256xf32>
    %5 = arith.addf %2, %4 : vector<32x256xf32>
    %cst_5 = arith.constant 0.000000e+00 : f32
    %6 = vector.broadcast %cst_5 : f32 to vector<32x256xf32>
    %7 = arith.maximumf %5, %6 : vector<32x256xf32>
    %8 = arith.truncf %7 : vector<32x256xf32> to vector<32x256xbf16>
    %c0_6 = arith.constant 0 : index
    %c0_7 = arith.constant 0 : index
    %9 = vector.load %arg5[%c0_6, %c0_7] : memref<32x256xbf16, #tpu.memory_space<vmem>>, vector<32x256xbf16>
    tpu.vector_store %arg5[%c0_6, %c0_7], %8 {strides = array<i32>} : memref<32x256xbf16, #tpu.memory_space<vmem>>, vector<32x256xbf16>,
    return
  }
  func.func @transform_0(%arg0: i32, %arg1: i32) -> (i32, i32) {
    %c0_i32 = arith.constant 0 : i32
    %c0_i32_0 = arith.constant 0 : i32
    return %arg0, %c0_i32 : i32, i32
  }
  func.func @transform_1(%arg0: i32, %arg1: i32) -> (i32, i32) {
    %c0_i32 = arith.constant 0 : i32
    %c0_i32_0 = arith.constant 0 : i32
    return %c0_i32, %arg1 : i32, i32
  }
  func.func @transform_2(%arg0: i32, %arg1: i32) -> (i32, i32) {
    %c0_i32 = arith.constant 0 : i32
    %c0_i32_0 = arith.constant 0 : i32
    return %arg0, %c0_i32 : i32, i32
  }
  func.func @transform_3(%arg0: i32, %arg1: i32) -> (i32, i32) {
    %c0_i32 = arith.constant 0 : i32
    return %arg0, %arg1 : i32, i32
  }
}

module attributes {stable_mosaic.version = 11 : i64} {
  func.func @_conv_mm_kernel(%arg0: i32, %arg1: i32, %arg2: memref<32x576xbf16, #tpu.memory_space<vmem>>, %arg3: memref<576x128xbf16, #tpu.memory_space<vmem>>, %arg4: memref<32x1xf32, #tpu.memory_space<vmem>>, %arg5: memref<32x128xbf16, #tpu.memory_space<vmem>>) attributes {dimension_semantics = [#tpu.dimension_semantics<parallel>, #tpu.dimension_semantics<parallel>], iteration_bounds = array<i64: 2, 1>, scalar_prefetch = 0 : i64, scratch_operands = 0 : i64, tpu.core_type = #tpu.core_type<tc>, window_params = [{transform_indices = @transform_0, window_bounds = array<i64: 32, 576>}, {transform_indices = @transform_1, window_bounds = array<i64: 576, 128>}, {transform_indices = @transform_2, window_bounds = array<i64: 32, 1>}, {transform_indices = @transform_3, window_bounds = array<i64: 32, 128>}]} {
    %c0 = arith.constant 0 : index
    %c0_0 = arith.constant 0 : index
    %0 = vector.load %arg2[%c0, %c0_0] : memref<32x576xbf16, #tpu.memory_space<vmem>>, vector<32x576xbf16>
    %c0_1 = arith.constant 0 : index
    %c0_2 = arith.constant 0 : index
    %1 = vector.load %arg3[%c0_1, %c0_2] : memref<576x128xbf16, #tpu.memory_space<vmem>>, vector<576x128xbf16>
    %cst = arith.constant dense<0.000000e+00> : vector<32x128xf32>
    %2 = tpu.matmul %0, %1, %cst {dimension_numbers = #tpu.dot_dimension_numbers<[1], [0], [0], [1], [0, 0, 1, 1], [], []>} : vector<32x576xbf16>, vector<576x128xbf16>, vector<32x128xf32> -> vector<32x128xf32>
    %c0_3 = arith.constant 0 : index
    %c0_4 = arith.constant 0 : index
    %3 = vector.load %arg4[%c0_3, %c0_4] : memref<32x1xf32, #tpu.memory_space<vmem>>, vector<32x1xf32>
    %4 = vector.broadcast %3 : vector<32x1xf32> to vector<32x128xf32>
    %5 = arith.addf %2, %4 : vector<32x128xf32>
    %cst_5 = arith.constant 0.000000e+00 : f32
    %6 = vector.broadcast %cst_5 : f32 to vector<32x128xf32>
    %7 = arith.maximumf %5, %6 : vector<32x128xf32>
    %8 = arith.truncf %7 : vector<32x128xf32> to vector<32x128xbf16>
    %c0_6 = arith.constant 0 : index
    %c0_7 = arith.constant 0 : index
    %9 = vector.load %arg5[%c0_6, %c0_7] : memref<32x128xbf16, #tpu.memory_space<vmem>>, vector<32x128xbf16>
    tpu.vector_store %arg5[%c0_6, %c0_7], %8 {strides = array<i32>} : memref<32x128xbf16, #tpu.memory_space<vmem>>, vector<32x128xbf16>,
    return
  }
  func.func @transform_0(%arg0: i32, %arg1: i32) -> (i32, i32) {
    %c0_i32 = arith.constant 0 : i32
    %c0_i32_0 = arith.constant 0 : i32
    return %arg0, %c0_i32 : i32, i32
  }
  func.func @transform_1(%arg0: i32, %arg1: i32) -> (i32, i32) {
    %c0_i32 = arith.constant 0 : i32
    %c0_i32_0 = arith.constant 0 : i32
    return %c0_i32, %arg1 : i32, i32
  }
  func.func @transform_2(%arg0: i32, %arg1: i32) -> (i32, i32) {
    %c0_i32 = arith.constant 0 : i32
    %c0_i32_0 = arith.constant 0 : i32
    return %arg0, %c0_i32 : i32, i32
  }
  func.func @transform_3(%arg0: i32, %arg1: i32) -> (i32, i32) {
    %c0_i32 = arith.constant 0 : i32
    return %arg0, %arg1 : i32, i32
  }
}

module attributes {stable_mosaic.version = 11 : i64} {
  func.func @_mlp_head_kernel(%arg0: i32, %arg1: i32, %arg2: memref<16x3136xbf16, #tpu.memory_space<vmem>>, %arg3: memref<3136x256xbf16, #tpu.memory_space<vmem>>, %arg4: memref<1x256xf32, #tpu.memory_space<vmem>>, %arg5: memref<256x6xbf16, #tpu.memory_space<vmem>>, %arg6: memref<1x16x6xf32, #tpu.memory_space<vmem>>) attributes {dimension_semantics = [#tpu.dimension_semantics<parallel>, #tpu.dimension_semantics<parallel>], iteration_bounds = array<i64: 2, 1>, scalar_prefetch = 0 : i64, scratch_operands = 0 : i64, tpu.core_type = #tpu.core_type<tc>, window_params = [{transform_indices = @transform_0, window_bounds = array<i64: 16, 3136>}, {transform_indices = @transform_1, window_bounds = array<i64: 3136, 256>}, {transform_indices = @transform_2, window_bounds = array<i64: 1, 256>}, {transform_indices = @transform_3, window_bounds = array<i64: 256, 6>}, {transform_indices = @transform_4, window_bounds = array<i64: 1, 16, 6>}]} {
    %c0 = arith.constant 0 : index
    %c0_0 = arith.constant 0 : index
    %0 = vector.load %arg2[%c0, %c0_0] : memref<16x3136xbf16, #tpu.memory_space<vmem>>, vector<16x3136xbf16>
    %c0_1 = arith.constant 0 : index
    %c0_2 = arith.constant 0 : index
    %1 = vector.load %arg3[%c0_1, %c0_2] : memref<3136x256xbf16, #tpu.memory_space<vmem>>, vector<3136x256xbf16>
    %cst = arith.constant dense<0.000000e+00> : vector<16x256xf32>
    %2 = tpu.matmul %0, %1, %cst {dimension_numbers = #tpu.dot_dimension_numbers<[1], [0], [0], [1], [0, 0, 1, 1], [], []>} : vector<16x3136xbf16>, vector<3136x256xbf16>, vector<16x256xf32> -> vector<16x256xf32>
    %c0_3 = arith.constant 0 : index
    %c0_4 = arith.constant 0 : index
    %3 = vector.load %arg4[%c0_3, %c0_4] : memref<1x256xf32, #tpu.memory_space<vmem>>, vector<1x256xf32>
    %4 = vector.broadcast %3 : vector<1x256xf32> to vector<16x256xf32>
    %5 = arith.addf %2, %4 : vector<16x256xf32>
    %cst_5 = arith.constant 0.000000e+00 : f32
    %6 = vector.broadcast %cst_5 : f32 to vector<16x256xf32>
    %7 = arith.maximumf %5, %6 : vector<16x256xf32>
    %8 = arith.truncf %7 : vector<16x256xf32> to vector<16x256xbf16>
    %c0_6 = arith.constant 0 : index
    %c0_7 = arith.constant 0 : index
    %9 = vector.load %arg5[%c0_6, %c0_7] : memref<256x6xbf16, #tpu.memory_space<vmem>>, vector<256x6xbf16>
    %cst_8 = arith.constant dense<0.000000e+00> : vector<16x6xf32>
    %10 = tpu.matmul %8, %9, %cst_8 {dimension_numbers = #tpu.dot_dimension_numbers<[1], [0], [0], [1], [0, 0, 1, 1], [], []>} : vector<16x256xbf16>, vector<256x6xbf16>, vector<16x6xf32> -> vector<16x6xf32>
    %c0_9 = arith.constant 0 : index
    %c0_10 = arith.constant 0 : index
    %c0_11 = arith.constant 0 : index
    %11 = vector.load %arg6[%c0_9, %c0_10, %c0_11] : memref<1x16x6xf32, #tpu.memory_space<vmem>>, vector<1x16x6xf32>
    %12 = vector.shape_cast %11 : vector<1x16x6xf32> to vector<16x6xf32>
    %13 = vector.shape_cast %10 : vector<16x6xf32> to vector<1x16x6xf32>
    tpu.vector_store %arg6[%c0_9, %c0_10, %c0_11], %13 {strides = array<i32>} : memref<1x16x6xf32, #tpu.memory_space<vmem>>, vector<1x16x6xf32>,
    return
  }
  func.func @transform_0(%arg0: i32, %arg1: i32) -> (i32, i32) {
    %c0_i32 = arith.constant 0 : i32
    %c0_i32_0 = arith.constant 0 : i32
    return %arg1, %c0_i32 : i32, i32
  }
  func.func @transform_1(%arg0: i32, %arg1: i32) -> (i32, i32) {
    %c0_i32 = arith.constant 0 : i32
    %c0_i32_0 = arith.constant 0 : i32
    return %c0_i32, %arg0 : i32, i32
  }
  func.func @transform_2(%arg0: i32, %arg1: i32) -> (i32, i32) {
    %c0_i32 = arith.constant 0 : i32
    %c0_i32_0 = arith.constant 0 : i32
    return %c0_i32, %arg0 : i32, i32
  }
  func.func @transform_3(%arg0: i32, %arg1: i32) -> (i32, i32) {
    %c0_i32 = arith.constant 0 : i32
    %c0_i32_0 = arith.constant 0 : i32
    return %arg0, %c0_i32 : i32, i32
  }
  func.func @transform_4(%arg0: i32, %arg1: i32) -> (i32, i32, i32) {
    %c0_i32 = arith.constant 0 : i32
    %c0_i32_0 = arith.constant 0 : i32
    return %arg0, %arg1, %c0_i32 : i32, i32, i32
  }
}

</mosaic_0001>

<bundles_post_ra>
// kernel: dqn_forward.4
= control target key start
LH: loop header
LB: loop body
LE: loop exit
PB: predicated region body
PF: predicated region fallthrough
CT: control target
= control target key end

     0   :  { %s1725_s12 = smov 0   ;;  %s1727_s13 = smov 0   ;;  %s2134_s0 = inlined_call_operand.vmem [shape: bf16[32,256], index: 0, kind: input, shape index: {}]   ;;  %s2135_s1 = inlined_call_operand.vmem [shape: bf16[256,896], index: 1, kind: input, shape index: {}]   ;;  %s2136_s2 = inlined_call_operand.vmem [shape: f32[32,1], index: 2, kind: input, shape index: {}]   ;;  %s2137_s3 = inlined_call_operand.vmem [shape: bf16[32,896], index: 3, kind: output, shape index: {}]  }
   0x1   :  { %s1729_s14 = smov 0  }
   0x2 LB: > { %s25_s15 = sadd.s32 1, %s1698_s13  ;;  %p1327_p0 = scmp.ge.s32.totalorder %s1702_s14, 1  ;;  %s1702_s14 = sphi %s1729_s14, %s13_s14   ;;  %s1698_s13 = sphi %s1727_s13, %s2139_s13   ;;  %s1694_s12 = sphi %s1725_s12, %s2138_s12  }
   0x3   : > { %p27_p1 = scmp.ge.s32.totalorder %s25_s15, 2  ;;  %p175_p2 = scmp.lt.s32.totalorder %s1702_s14, 3 }
   0x5   : > { %s2141_s15 = smov (%p27_p1, %s25_s15), 0  ;;  %p176_p3 = pnand %p1327_p0, %p175_p2 }
   0x6   : > { %v1517_v0 = vld [vmem:[%s2135_s1 + $0x4] ss:$28 sps:$4 sm:$0xff] (!%p176_p3)   ;;  %v1520_v2 = vld [vmem:[%s2135_s1 + $0x3c] ss:$28 sps:$4 sm:$0xff] (!%p176_p3)   ;;  %v1704_v4 = vmov (!%p176_p3), 0   ;;  %s1328_s29 = sshll.u32 (!%p176_p3), %s1694_s12, 1 }
   0x7   : > { %179 = sbr.rel (%p176_p3) target bundleno = 357 (0x165), region = 32  ;;  %v1519_v1 = vld [vmem:[%s2135_s1] ss:$28 sps:$4 sm:$0xff] (!%p176_p3)   ;;  %975 = vmatprep.subr.bf16.mxu0 (!%p176_p3), %v1517_v0  ;;  %v1522_v3 = vld [vmem:[%s2135_s1 + $0x38] ss:$28 sps:$4 sm:$0xff] (!%p176_p3)   ;;  %1516 = vset.pattern.permute.xlu0 (!%p176_p3), %v1704_v4  ;;  %p216_p4 = scmp.lt.s32.totalorder (!%p176_p3), %s1328_s29, 3 }
   0x8   : > { %976 = vmatpush1.bf16.msra.mxu0 (!%p176_p3), %v1519_v1  ;;  %v1523_v5 = vld [vmem:[%s2135_s1 + $0x74] ss:$28 sps:$4 sm:$0xff] (!%p176_p3)   ;;  %v1526_v7 = vld [vmem:[%s2135_s1 + $0xac] ss:$28 sps:$4 sm:$0xff] (!%p176_p3)   ;;  %v1529_v11 = vld [vmem:[%s2135_s1 + $0xe4] ss:$28 sps:$4 sm:$0xff] (!%p176_p3)  }
   0x9   : > { %977 = vmatprep.subr.bf16.mxu0 (!%p176_p3), %v1520_v2  ;;  %v1525_v6 = vld [vmem:[%s2135_s1 + $0x70] ss:$28 sps:$4 sm:$0xff] (!%p176_p3)   ;;  %v1540_v9 = vld [vmem:[%s2135_s1 + $0x8] ss:$28 sps:$4 sm:$0xff] (!%p176_p3)   ;;  %v1546_v13 = vld [vmem:[%s2135_s1 + $0x40] ss:$28 sps:$4 sm:$0xff] (!%p176_p3)  }
   0xa   : > { %v1538_v8 = vld [vmem:[%s2135_s1 + $0xc] ss:$28 sps:$4 sm:$0xff] (!%p176_p3)   ;;  %v1544_v12 = vld [vmem:[%s2135_s1 + $0x44] ss:$28 sps:$4 sm:$0xff] (!%p176_p3)   ;;  %v1550_v15 = vld [vmem:[%s2135_s1 + $0x7c] ss:$28 sps:$4 sm:$0xff] (!%p176_p3)  }
   0xb   : > { %v1528_v10 = vld [vmem:[%s2135_s1 + $0xa8] ss:$28 sps:$4 sm:$0xff] (!%p176_p3)   ;;  %1018 = vmatprep.subr.bf16.mxu1 (!%p176_p3), %v1538_v8  ;;  %v1531_v14 = vld [vmem:[%s2135_s1 + $0xe0] ss:$28 sps:$4 sm:$0xff] (!%p176_p3)   ;;  %v1552_v17 = vld [vmem:[%s2135_s1 + $0x78] ss:$28 sps:$4 sm:$0xff] (!%p176_p3)  }
   0xc   : > { %978 = vmatpush1.bf16.msra.mxu0 (!%p176_p3), %v1522_v3  ;;  %1019 = vmatpush1.bf16.msra.mxu1 (!%p176_p3), %v1540_v9  ;;  %v1532_v16 = vld [vmem:[%s2135_s1 + $0x11c] ss:$28 sps:$4 sm:$0xff] (!%p176_p3)   ;;  %v1556_v18 = vld [vmem:[%s2135_s1 + $0xb4] ss:$28 sps:$4 sm:$0xff] (!%p176_p3)   ;;  %v1562_v22 = vld [vmem:[%s2135_s1 + $0xec] ss:$28 sps:$4 sm:$0xff] (!%p176_p3)  }
   0xd   : > { %979 = vmatprep.subr.bf16.mxu0 (!%p176_p3), %v1523_v5  ;;  %1020 = vmatprep.subr.bf16.mxu1 (!%p176_p3), %v1544_v12  ;;  %v1534_v19 = vld [vmem:[%s2135_s1 + $0x118] ss:$28 sps:$4 sm:$0xff] (!%p176_p3)   ;;  %v1558_v21 = vld [vmem:[%s2135_s1 + $0xb0] ss:$28 sps:$4 sm:$0xff] (!%p176_p3)   ;;  %v1564_v25 = vld [vmem:[%s2135_s1 + $0xe8] ss:$28 sps:$4 sm:$0xff] (!%p176_p3)  }
   0xe   : > { %v1535_v20 = vld [vmem:[%s2135_s1 + $0x154] ss:$28 sps:$4 sm:$0xff]   ;;  %v1541_v24 = vld [vmem:[%s2135_s1 + $0x18c] ss:$28 sps:$4 sm:$0xff]   ;;  %s2143_s29 = smov (!%p216_p4, %s1328_s29), 3 }
   0xf   : > { %v1537_v23 = vld [vmem:[%s2135_s1 + $0x150] ss:$28 sps:$4 sm:$0xff]   ;;  %v1568_v26 = vld [vmem:[%s2135_s1 + $0x124] ss:$28 sps:$4 sm:$0xff]   ;;  %s1459_s28 = sshll.u32 %s2143_s29, 3 }
  0x10   : > { %980 = vmatpush1.bf16.msra.mxu0 %v1525_v6  ;;  %1021 = vmatpush1.bf16.msra.mxu1 %v1546_v13  ;;  %v1543_v27 = vld [vmem:[%s2135_s1 + $0x188] ss:$28 sps:$4 sm:$0xff]   ;;  %v1570_v29 = vld [vmem:[%s2135_s1 + $0x120] ss:$28 sps:$4 sm:$0xff]   ;;  %s1850_s12 = scalar_lea.vmem %s2134_s0, %s1459_s28  ;;  %v1576_v33 = vld [vmem:[%s2135_s1 + $0x158] ss:$28 sps:$4 sm:$0xff]   ;;  %s232_s23 = scalar_lea.vmem %s2136_s2, %s1459_s28 }
  0x11   : > { %981 = vmatprep.subr.bf16.mxu0 %v1526_v7  ;;  %1022 = vmatprep.subr.bf16.mxu1 %v1550_v15  ;;  %v1547_v28 = vld [vmem:[%s2135_s1 + $0x1c4] ss:$28 sps:$4 sm:$0xff]   ;;  %v1574_v30 = vld [vmem:[%s2135_s1 + $0x15c] ss:$28 sps:$4 sm:$0xff]   ;;  %v1580_v34 = vld [vmem:[%s2135_s1 + $0x194] ss:$28 sps:$4 sm:$0xff]  }
  0x12   : > { %v1549_v31 = vld [vmem:[%s2135_s1 + $0x1c0] ss:$28 sps:$4 sm:$0xff]   ;;  %v1555_v35 = vld [vmem:[%s2135_s1 + $0x1f8] ss:$28 sps:$4 sm:$0xff]   ;;  %v1862_v36 = vld [vmem:[%s1850_s12 + $0x4] ss:$8 sps:$4 sm:$0xff]  }
  0x13   : > { %v1553_v32 = vld [vmem:[%s2135_s1 + $0x1fc] ss:$28 sps:$4 sm:$0xff]   ;;  %v1559_v37 = vld [vmem:[%s2135_s1 + $0x234] ss:$28 sps:$4 sm:$0xff]   ;;  %1007 = vmatprep.mubr.bf16.mxu0 %v1862_v36  ;;  %v1586_v39 = vld [vmem:[%s2135_s1 + $0x1cc] ss:$28 sps:$4 sm:$0xff]   ;;  %1050 = vmatprep.mubr.bf16.mxu1 %v1862_v36 }
  0x14   : > { %982 = vmatpush1.bf16.msra.mxu0 %v1528_v10  ;;  %1023 = vmatpush1.bf16.msra.mxu1 %v1552_v17  ;;  %v1582_v38 = vld [vmem:[%s2135_s1 + $0x190] ss:$28 sps:$4 sm:$0xff]   ;;  %v1588_v42 = vld [vmem:[%s2135_s1 + $0x1c8] ss:$28 sps:$4 sm:$0xff]   ;;  %v1596_v46 = vld [vmem:[%s2135_s1 + $0x200] ss:$28 sps:$4 sm:$0xff]  }
  0x15   : > { %983 = vmatprep.subr.bf16.mxu0 %v1529_v11  ;;  %1024 = vmatprep.subr.bf16.mxu1 %v1556_v18  ;;  %v1561_v40 = vld [vmem:[%s2135_s1 + $0x230] ss:$28 sps:$4 sm:$0xff]   ;;  %v1592_v43 = vld [vmem:[%s2135_s1 + $0x204] ss:$28 sps:$4 sm:$0xff]   ;;  %v1601_v47 = vld [vmem:[%s2135_s1 + $0x23c] ss:$28 sps:$4 sm:$0xff]  }
  0x16   : > { %v1565_v41 = vld [vmem:[%s2135_s1 + $0x26c] ss:$28 sps:$4 sm:$0xff]   ;;  %v1571_v45 = vld [vmem:[%s2135_s1 + $0x2a4] ss:$28 sps:$4 sm:$0xff]   ;;  %v1577_v49 = vld [vmem:[%s2135_s1 + $0x2dc] ss:$28 sps:$4 sm:$0xff]  }
  0x17   : > { %v1567_v44 = vld [vmem:[%s2135_s1 + $0x268] ss:$28 sps:$4 sm:$0xff]   ;;  %v1573_v48 = vld [vmem:[%s2135_s1 + $0x2a0] ss:$28 sps:$4 sm:$0xff]   ;;  %v1603_v50 = vld [vmem:[%s2135_s1 + $0x238] ss:$28 sps:$4 sm:$0xff]  }
  0x18   : > { %984 = vmatpush1.bf16.msra.mxu0 %v1531_v14  ;;  %1025 = vmatpush1.bf16.msra.mxu1 %v1558_v21  ;;  %v1607_v51 = vld [vmem:[%s2135_s1 + $0x274] ss:$28 sps:$4 sm:$0xff]   ;;  %v1613_v55 = vld [vmem:[%s2135_s1 + $0x2ac] ss:$28 sps:$4 sm:$0xff]   ;;  %v1619_v59 = vld [vmem:[%s2135_s1 + $0x2e4] ss:$28 sps:$4 sm:$0xff]  }
  0x19   : > { %985 = vmatprep.subr.bf16.mxu0 %v1532_v16  ;;  %1026 = vmatprep.subr.bf16.mxu1 %v1562_v22  ;;  %v1579_v52 = vld [vmem:[%s2135_s1 + $0x2d8] ss:$28 sps:$4 sm:$0xff]   ;;  %v1609_v54 = vld [vmem:[%s2135_s1 + $0x270] ss:$28 sps:$4 sm:$0xff]   ;;  %v1615_v58 = vld [vmem:[%s2135_s1 + $0x2a8] ss:$28 sps:$4 sm:$0xff]  }
  0x1a   : > { %v1583_v53 = vld [vmem:[%s2135_s1 + $0x314] ss:$28 sps:$4 sm:$0xff]   ;;  %v1589_v57 = vld [vmem:[%s2135_s1 + $0x34c] ss:$28 sps:$4 sm:$0xff]   ;;  %v1621_v63 = vld [vmem:[%s2135_s1 + $0x2e0] ss:$28 sps:$4 sm:$0xff]  }
  0x1b   : > { %v1585_v56 = vld [vmem:[%s2135_s1 + $0x310] ss:$28 sps:$4 sm:$0xff]   ;;  %v1591_v60 = vld [vmem:[%s2135_s1 + $0x348] ss:$28 sps:$4 sm:$0xff]   ;;  %v1625_v0 = vld [vmem:[%s2135_s1 + $0x31c] ss:$28 sps:$4 sm:$0xff]  }
  0x1c   : > { %986 = vmatpush1.bf16.msra.mxu0 %v1534_v19  ;;  %1027 = vmatpush1.bf16.msra.mxu1 %v1564_v25  ;;  %v1939_v61 = vld [vmem:[%s1850_s12] ss:$8 sps:$4 sm:$0xff]   ;;  %v1600_v62 = vld [vmem:[%s2135_s1 + $0x14] ss:$28 sps:$4 sm:$0xff]   ;;  %v1618_v10 = vld [vmem:[%s2135_s1 + $0xbc] ss:$28 sps:$4 sm:$0xff]  }
  0x1d   : > { %987 = vmatprep.subr.bf16.mxu0 %v1535_v20  ;;  %1028 = vmatprep.subr.bf16.mxu1 %v1568_v26  ;;  %v1598_v1 = vld [vmem:[%s2135_s1 + $0x10] ss:$28 sps:$4 sm:$0xff]   ;;  %v1627_v3 = vld [vmem:[%s2135_s1 + $0x318] ss:$28 sps:$4 sm:$0xff]   ;;  %v1604_v5 = vld [vmem:[%s2135_s1 + $0x48] ss:$28 sps:$4 sm:$0xff]  }
  0x1e   : > { %v1606_v2 = vld [vmem:[%s2135_s1 + $0x4c] ss:$28 sps:$4 sm:$0xff]   ;;  %v1631_v4 = vld [vmem:[%s2135_s1 + $0x354] ss:$28 sps:$4 sm:$0xff]   ;;  %v1612_v6 = vld [vmem:[%s2135_s1 + $0x84] ss:$28 sps:$4 sm:$0xff]  }
  0x1f   : > { %v1633_v7 = vld [vmem:[%s2135_s1 + $0x350] ss:$28 sps:$4 sm:$0xff]   ;;  %v1637_v8 = vld [vmem:[%s2135_s1 + $0x1d8] ss:$28 sps:$4 sm:$0xff]   ;;  %v1610_v9 = vld [vmem:[%s2135_s1 + $0x80] ss:$28 sps:$4 sm:$0xff]  }
  0x20   : > { %988 = vmatpush1.bf16.msra.mxu0 %v1537_v23  ;;  %1029 = vmatpush1.bf16.msra.mxu1 %v1570_v29  ;;  %v1638_v11 = vld [vmem:[%s2135_s1 + $0x18] ss:$28 sps:$4 sm:$0xff]   ;;  %v1642_v12 = vld [vmem:[%s2135_s1 + $0x210] ss:$28 sps:$4 sm:$0xff]   ;;  %v1647_v16 = vld [vmem:[%s2135_s1 + $0x248] ss:$28 sps:$4 sm:$0xff]  }
  0x21   : > { %989 = vmatprep.subr.bf16.mxu0 %v1541_v24  ;;  %1030 = vmatprep.subr.bf16.mxu1 %v1574_v30  ;;  %v1616_v13 = vld [vmem:[%s2135_s1 + $0xb8] ss:$28 sps:$4 sm:$0xff]   ;;  %v1643_v15 = vld [vmem:[%s2135_s1 + $0x50] ss:$28 sps:$4 sm:$0xff]   ;;  %v1648_v19 = vld [vmem:[%s2135_s1 + $0x88] ss:$28 sps:$4 sm:$0xff]  }
  0x22   : > { %v1624_v14 = vld [vmem:[%s2135_s1 + $0xf4] ss:$28 sps:$4 sm:$0xff]   ;;  %v1630_v18 = vld [vmem:[%s2135_s1 + $0x12c] ss:$28 sps:$4 sm:$0xff]   ;;  %v377_v20 = vld [vmem:[%s232_s23] sm:$0xff] }
  0x23   : > { %v1622_v17 = vld [vmem:[%s2135_s1 + $0xf0] ss:$28 sps:$4 sm:$0xff]   ;;  %v1652_v21 = vld [vmem:[%s2135_s1 + $0x280] ss:$28 sps:$4 sm:$0xff]   ;;  %381 = vperm.xlu0 %1516, %v377_v20   ;;  %v1628_v22 = vld [vmem:[%s2135_s1 + $0x128] ss:$28 sps:$4 sm:$0xff]  }
  0x24   : > { %990 = vmatpush1.bf16.msra.mxu0 %v1543_v27  ;;  %1031 = vmatpush1.bf16.msra.mxu1 %v1576_v33  ;;  %v378_v23 = vld [vmem:[%s232_s23 + $0x8] sm:$0xff]  ;;  %v1636_v24 = vld [vmem:[%s2135_s1 + $0x164] ss:$28 sps:$4 sm:$0xff]   ;;  %v1657_v26 = vld [vmem:[%s2135_s1 + $0x2b8] ss:$28 sps:$4 sm:$0xff]   ;;  %s1490_s23 = smul.u32 28, %s2143_s29 }
  0x25   : > { %991 = vmatprep.subr.bf16.mxu0 %v1547_v28  ;;  %1032 = vmatprep.subr.bf16.mxu1 %v1580_v34  ;;  %v1653_v25 = vld [vmem:[%s2135_s1 + $0xc0] ss:$28 sps:$4 sm:$0xff]   ;;  %v1658_v29 = vld [vmem:[%s2135_s1 + $0xf8] ss:$28 sps:$4 sm:$0xff]   ;;  %v1662_v30 = vld [vmem:[%s2135_s1 + $0x2f0] ss:$28 sps:$4 sm:$0xff]  }
  0x26   : > { %v1634_v27 = vld [vmem:[%s2135_s1 + $0x160] ss:$28 sps:$4 sm:$0xff]   ;;  %v1663_v33 = vld [vmem:[%s2135_s1 + $0x130] ss:$28 sps:$4 sm:$0xff]   ;;  %v1667_v34 = vld [vmem:[%s2135_s1 + $0x328] ss:$28 sps:$4 sm:$0xff]   ;;  %s2115_s26 = scalar_lea.vmem %s2137_s3, %s1490_s23 }
  0x27   : > { %386 = vperm.xlu0 %1516, %v378_v23   ;;  %v1641_v28 = vld [vmem:[%s2135_s1 + $0x19c] ss:$28 sps:$4 sm:$0xff]  }
  0x28   : > { %992 = vmatpush1.bf16.msra.mxu0 %v1549_v31  ;;  %1033 = vmatpush1.bf16.msra.mxu1 %v1582_v38  ;;  %v1639_v31 = vld [vmem:[%s2135_s1 + $0x198] ss:$28 sps:$4 sm:$0xff]   ;;  %v1672_v38 = vld [vmem:[%s2135_s1 + $0x360] ss:$28 sps:$4 sm:$0xff]  }
  0x29   : > { %993 = vmatprep.subr.bf16.mxu0 %v1553_v32  ;;  %1034 = vmatprep.subr.bf16.mxu1 %v1586_v39  ;;  %v1646_v32 = vld [vmem:[%s2135_s1 + $0x1d4] ss:$28 sps:$4 sm:$0xff]   ;;  %v1649_v39 = vld [vmem:[%s2135_s1 + $0x208] ss:$28 sps:$4 sm:$0xff]  }
  0x2c   : > { %994 = vmatpush1.bf16.msra.mxu0 %v1555_v35  ;;  %1035 = vmatpush1.bf16.msra.mxu1 %v1588_v42  ;;  %v1644_v35 = vld [vmem:[%s2135_s1 + $0x1d0] ss:$28 sps:$4 sm:$0xff]   ;;  %v1654_v42 = vld [vmem:[%s2135_s1 + $0x240] ss:$28 sps:$4 sm:$0xff]  }
  0x2d   : > { %995 = vmatprep.subr.bf16.mxu0 %v1559_v37  ;;  %1036 = vmatprep.subr.bf16.mxu1 %v1592_v43  ;;  %v1668_v37 = vld [vmem:[%s2135_s1 + $0x168] ss:$28 sps:$4 sm:$0xff]   ;;  %v1661_v43 = vld [vmem:[%s2135_s1 + $0x27c] ss:$28 sps:$4 sm:$0xff]  }
  0x30   : > { %996 = vmatpush1.bf16.msra.mxu0 %v1561_v40  ;;  %1037 = vmatpush1.bf16.msra.mxu1 %v1596_v46  ;;  %v1656_v40 = vld [vmem:[%s2135_s1 + $0x244] ss:$28 sps:$4 sm:$0xff]   ;;  %v1664_v46 = vld [vmem:[%s2135_s1 + $0x2b0] ss:$28 sps:$4 sm:$0xff]  }
  0x31   : > { %997 = vmatprep.subr.bf16.mxu0 %v1565_v41  ;;  %1038 = vmatprep.subr.bf16.mxu1 %v1601_v47  ;;  %v1673_v41 = vld [vmem:[%s2135_s1 + $0x1a0] ss:$28 sps:$4 sm:$0xff]   ;;  %v1671_v47 = vld [vmem:[%s2135_s1 + $0x2ec] ss:$28 sps:$4 sm:$0xff]  }
  0x34   : > { %998 = vmatpush1.bf16.msra.mxu0 %v1567_v44  ;;  %1039 = vmatpush1.bf16.msra.mxu1 %v1603_v50  ;;  %v1659_v44 = vld [vmem:[%s2135_s1 + $0x278] ss:$28 sps:$4 sm:$0xff]   ;;  %v1674_v50 = vld [vmem:[%s2135_s1 + $0x320] ss:$28 sps:$4 sm:$0xff]  }
  0x35   : > { %999 = vmatprep.subr.bf16.mxu0 %v1571_v45  ;;  %1040 = vmatprep.subr.bf16.mxu1 %v1607_v51  ;;  %v1666_v45 = vld [vmem:[%s2135_s1 + $0x2b4] ss:$28 sps:$4 sm:$0xff]   ;;  %v1679_v51 = vld [vmem:[%s2135_s1 + $0x35c] ss:$28 sps:$4 sm:$0xff]  }
  0x38   : > { %1000 = vmatpush1.bf16.msra.mxu0 %v1573_v48  ;;  %1041 = vmatpush1.bf16.msra.mxu1 %v1609_v54  ;;  %v1669_v48 = vld [vmem:[%s2135_s1 + $0x2e8] ss:$28 sps:$4 sm:$0xff]  }
  0x39   : > { %1001 = vmatprep.subr.bf16.mxu0 %v1577_v49  ;;  %1042 = vmatprep.subr.bf16.mxu1 %v1613_v55  ;;  %v1676_v49 = vld [vmem:[%s2135_s1 + $0x324] ss:$28 sps:$4 sm:$0xff]  }
  0x3c   : > { %1002 = vmatpush1.bf16.msra.mxu0 %v1579_v52  ;;  %1043 = vmatpush1.bf16.msra.mxu1 %v1615_v58  ;;  %v1677_v52 = vld [vmem:[%s2135_s1 + $0x358] ss:$28 sps:$4 sm:$0xff]  }
  0x3d   : > { %1003 = vmatprep.subr.bf16.mxu0 %v1583_v53  ;;  %1044 = vmatprep.subr.bf16.mxu1 %v1619_v59 }
  0x40   : > { %1004 = vmatpush1.bf16.msra.mxu0 %v1585_v56  ;;  %1045 = vmatpush1.bf16.msra.mxu1 %v1621_v63 }
  0x41   : > { %1005 = vmatprep.subr.bf16.mxu0 %v1589_v57  ;;  %1046 = vmatprep.subr.bf16.mxu1 %v1625_v0 }
  0x44   : > { %1006 = vmatpush1.bf16.msra.mxu0 %v1591_v60  ;;  %1047 = vmatpush1.bf16.msra.mxu1 %v1627_v3 }
  0x45   : > { %1061 = vmatprep.subr.bf16.mxu0 %v1600_v62  ;;  %1048 = vmatprep.subr.bf16.mxu1 %v1631_v4 }
  0x47   : > { %1008 = vmatmul.mubr.bf16.vlgmr.msra.gmra.mrb[0].mxu0 %v1939_v61 }
  0x48   : > { %1062 = vmatpush1.bf16.msra.mxu0 %v1598_v1  ;;  %1093 = vmatprep.mubr.bf16.mxu0 %v1862_v36 }
  0x49   : > { %1063 = vmatprep.subr.bf16.mxu0 %v1606_v2  ;;  %1049 = vmatpush1.bf16.msra.mxu1 %v1633_v7 }
  0x4a   : > { %1468 = vmatprep.subr.bf16.mxu1 %v1637_v8 }
  0x4c   : > { %1064 = vmatpush1.bf16.msra.mxu0 %v1604_v5  ;;  %1051 = vmatmul.mubr.bf16.vlgmr.msra.gmra.mrb[0].mxu1 %v1939_v61 }
  0x4d   : > { %1065 = vmatprep.subr.bf16.mxu0 %v1612_v6  ;;  %1469 = vmatpush3.bf16.msra.mxu1 %v1638_v11 }
  0x4e   : > { %1136 = vmatprep.mubr.bf16.mxu1 %v1862_v36  ;;  %1470 = vmatprep.subr.bf16.mxu1 %v1642_v12  ;;  %v1651_v36 = vld [vmem:[%s2135_s1 + $0x20c] ss:$28 sps:$4 sm:$0xff]  }
  0x50   : > { %1066 = vmatpush1.bf16.msra.mxu0 %v1610_v9 }
  0x51   : > { %1067 = vmatprep.subr.bf16.mxu0 %v1618_v10  ;;  %1471 = vmatpush3.bf16.msra.mxu1 %v1643_v15 }
  0x52   : > { %1472 = vmatprep.subr.bf16.mxu1 %v1647_v16 }
  0x54   : > { %1068 = vmatpush1.bf16.msra.mxu0 %v1616_v13 }
  0x55   : > { %1069 = vmatprep.subr.bf16.mxu0 %v1624_v14  ;;  %1473 = vmatpush3.bf16.msra.mxu1 %v1648_v19 }
  0x56   : > { %1474 = vmatprep.subr.bf16.mxu1 %v1652_v21 }
  0x58   : > { %1070 = vmatpush1.bf16.msra.mxu0 %v1622_v17 }
  0x59   : > { %1071 = vmatprep.subr.bf16.mxu0 %v1630_v18  ;;  %1475 = vmatpush3.bf16.msra.mxu1 %v1653_v25 }
  0x5a   : > { %1476 = vmatprep.subr.bf16.mxu1 %v1657_v26 }
  0x5c   : > { %1072 = vmatpush1.bf16.msra.mxu0 %v1628_v22 }
  0x5d   : > { %1073 = vmatprep.subr.bf16.mxu0 %v1636_v24  ;;  %1477 = vmatpush3.bf16.msra.mxu1 %v1658_v29 }
  0x5e   : > { %1478 = vmatprep.subr.bf16.mxu1 %v1662_v30 }
  0x60   : > { %1074 = vmatpush1.bf16.msra.mxu0 %v1634_v27 }
  0x61   : > { %1075 = vmatprep.subr.bf16.mxu0 %v1641_v28  ;;  %1479 = vmatpush3.bf16.msra.mxu1 %v1663_v33 }
  0x62   : > { %1480 = vmatprep.subr.bf16.mxu1 %v1667_v34 }
  0x64   : > { %1076 = vmatpush1.bf16.msra.mxu0 %v1639_v31 }
  0x65   : > { %1077 = vmatprep.subr.bf16.mxu0 %v1646_v32  ;;  %1481 = vmatpush3.bf16.msra.mxu1 %v1668_v37 }
  0x66   : > { %1482 = vmatprep.subr.bf16.mxu1 %v1672_v38 }
  0x68   : > { %1078 = vmatpush1.bf16.msra.mxu0 %v1644_v35 }
  0x69   : > { %1079 = vmatprep.subr.bf16.mxu0 %v1651_v36  ;;  %1483 = vmatpush3.bf16.msra.mxu1 %v1673_v41 }
  0x6c   : > { %1080 = vmatpush1.bf16.msra.mxu0 %v1649_v39  ;;  %1137 = vmatmul.mubr.bf16.vlgmr.msra.gmra.mrb[4].mxu1 %v1939_v61 }
  0x6d   : > { %1081 = vmatprep.subr.bf16.mxu0 %v1656_v40 }
  0x70   : > { %1082 = vmatpush1.bf16.msra.mxu0 %v1654_v42 }
  0x71   : > { %1083 = vmatprep.subr.bf16.mxu0 %v1661_v43 }
  0x74   : > { %1084 = vmatpush1.bf16.msra.mxu0 %v1659_v44 }
  0x75   : > { %1085 = vmatprep.subr.bf16.mxu0 %v1666_v45 }
  0x78   : > { %1086 = vmatpush1.bf16.msra.mxu0 %v1664_v46 }
  0x79   : > { %1087 = vmatprep.subr.bf16.mxu0 %v1671_v47 }
  0x7c   : > { %1088 = vmatpush1.bf16.msra.mxu0 %v1669_v48 }
  0x7d   : > { %1089 = vmatprep.subr.bf16.mxu0 %v1676_v49 }
  0x80   : > { %1090 = vmatpush1.bf16.msra.mxu0 %v1674_v50 }
  0x81   : > { %1091 = vmatprep.subr.bf16.mxu0 %v1679_v51 }
  0x84   : > { %1092 = vmatpush1.bf16.msra.mxu0 %v1677_v52 }
  0x87   : > { %1094 = vmatmul.mubr.bf16.vlgmr.msra.gmra.mrb[4].mxu0 %v1939_v61 }
  0xa2   : > { %v382_v53 = vpop.permute.xlu0 %381 }
  0xa6   : > { %v387_v55 = vpop.permute.xlu0 %386 }
 0x11a   : > { %v1009_v54 = vpop.f32.mrb[0].mxu0 }
 0x11b   : > { %v1010_v56 = vadd.f32 %v1009_v54, %v382_v53  ;;  %v1011_v57 = vpop.f32.mrb[1].mxu0 }
 0x11c   : > { %v1012_v58 = vadd.f32 %v1011_v57, %v382_v53  ;;  %v1013_v59 = vpop.f32.mrb[2].mxu0 }
 0x11d   : > { %v1145_v60 = vmax.f32 %v1010_v56, 0.0  ;;  %v1014_v62 = vadd.f32 %v1013_v59, %v387_v55  ;;  %v1015_v63 = vpop.f32.mrb[3].mxu0 }
 0x11e   : > { %v1146_v0 = vmax.f32 %v1012_v58, 0.0  ;;  %v1016_v1 = vadd.f32 %v1015_v63, %v387_v55 }
 0x11f   : > { %v1152_v61 = vmax.f32 %v1014_v62, 0.0  ;;  %v1052_v5 = vpop.f32.mrb[0].mxu1 }
 0x120   : > { %v1460_v2 = vpack.c.bf16 %v1146_v0, %v1145_v60  ;;  %v1153_v3 = vmax.f32 %v1016_v1, 0.0  ;;  %v1053_v6 = vadd.f32 %v1052_v5, %v382_v53  ;;  %v1054_v7 = vpop.f32.mrb[1].mxu1 }
 0x121   : > { %v1055_v8 = vadd.f32 %v1054_v7, %v382_v53  ;;  %v1056_v9 = vpop.f32.mrb[2].mxu1 }
 0x122   : > { %1203 = vst [vmem:[%s2115_s26] sm:$0xff] %v1460_v2  ;;  %v1464_v4 = vpack.c.bf16 %v1153_v3, %v1152_v61  ;;  %v1147_v10 = vmax.f32 %v1053_v6, 0.0  ;;  %v1057_v11 = vadd.f32 %v1056_v9, %v387_v55  ;;  %v1058_v12 = vpop.f32.mrb[3].mxu1 }
 0x123   : > { %v1148_v13 = vmax.f32 %v1055_v8, 0.0  ;;  %v1059_v14 = vadd.f32 %v1058_v12, %v387_v55 }
 0x124   : > { %1207 = vst [vmem:[%s2115_s26 + $0x1c] sm:$0xff] %v1464_v4  ;;  %v1154_v15 = vmax.f32 %v1057_v11, 0.0 }
 0x125   : > { %v1461_v16 = vpack.c.bf16 %v1148_v13, %v1147_v10  ;;  %v1155_v17 = vmax.f32 %v1059_v14, 0.0 }
 0x127   : > { %1204 = vst [vmem:[%s2115_s26 + $0x8] sm:$0xff] %v1461_v16  ;;  %v1465_v18 = vpack.c.bf16 %v1155_v17, %v1154_v15 }
 0x129   : > { %1208 = vst [vmem:[%s2115_s26 + $0x24] sm:$0xff] %v1465_v18 }
 0x13f   : > { %v1484_v19 = vpop.f32.mrb[4].mxu1 }
 0x140   : > { %v1485_v20 = vpop.f32.mrb[5].mxu1 }
 0x141   : > { %v1486_v21 = vadd.f32 %v1485_v20, %v1484_v19  ;;  %v1487_v22 = vpop.f32.mrb[6].mxu1 }
 0x142   : > { %v1488_v23 = vpop.f32.mrb[7].mxu1 }
 0x143   : > { %v1139_v24 = vadd.f32 %v1486_v21, %v382_v53  ;;  %v1489_v25 = vadd.f32 %v1488_v23, %v1487_v22 }
 0x145   : > { %v1151_v26 = vmax.f32 %v1139_v24, 0.0  ;;  %v1142_v27 = vadd.f32 %v1489_v25, %v387_v55 }
 0x147   : > { %v1463_v28 = vpack.c.bf16 %v1151_v26, %v1151_v26  ;;  %v1158_v29 = vmax.f32 %v1142_v27, 0.0 }
 0x149   : > { %1206 = vst [vmem:[%s2115_s26 + $0x18] sm:$0xf] %v1463_v28  ;;  %v1467_v30 = vpack.c.bf16 %v1158_v29, %v1158_v29 }
 0x14b   : > { %1210 = vst [vmem:[%s2115_s26 + $0x34] sm:$0xf] %v1467_v30 }
 0x15a   : > { %v1095_v31 = vpop.f32.mrb[4].mxu0 }
 0x15b   : > { %v1096_v32 = vadd.f32 %v1095_v31, %v382_v53  ;;  %v1097_v33 = vpop.f32.mrb[5].mxu0 }
 0x15c   : > { %v1098_v34 = vadd.f32 %v1097_v33, %v382_v53  ;;  %v1099_v35 = vpop.f32.mrb[6].mxu0 }
 0x15d   : > { %v1149_v36 = vmax.f32 %v1096_v32, 0.0  ;;  %v1100_v37 = vadd.f32 %v1099_v35, %v387_v55  ;;  %v1101_v38 = vpop.f32.mrb[7].mxu0 }
 0x15e   : > { %v1150_v39 = vmax.f32 %v1098_v34, 0.0  ;;  %v1102_v40 = vadd.f32 %v1101_v38, %v387_v55 }
 0x15f   : > { %v1156_v41 = vmax.f32 %v1100_v37, 0.0 }
 0x160   : > { %v1462_v42 = vpack.c.bf16 %v1150_v39, %v1149_v36  ;;  %v1157_v43 = vmax.f32 %v1102_v40, 0.0 }
 0x162   : > { %1205 = vst [vmem:[%s2115_s26 + $0x10] sm:$0xff] %v1462_v42  ;;  %v1466_v44 = vpack.c.bf16 %v1157_v43, %v1156_v41 }
 0x164   : > { %1209 = vst [vmem:[%s2115_s26 + $0x2c] sm:$0xff] %v1466_v44 }
 0x165 PF: > { %s13_s14 = sadd.s32 1, %s1702_s14   ;;  %s2138_s12 = smov %s1698_s13 }
 0x166   : > { %p10_p5 = scmp.ge.s32.totalorder %s13_s14, 4   ;;  %s2139_s13 = smov %s2141_s15 }
 0x168   :  { %12 = sbr.rel (!%p10_p5) target bundleno = 2 (0x2), region = 68 }

// kernel: dqn_forward.5
= control target key start
LH: loop header
LB: loop body
LE: loop exit
PB: predicated region body
PF: predicated region fallthrough
CT: control target
= control target key end

     0   :  { %s1249_s12 = smov 0   ;;  %s1251_s13 = smov 0   ;;  %s1504_s0 = inlined_call_operand.vmem [shape: bf16[64,512], index: 0, kind: input, shape index: {}]   ;;  %s1505_s1 = inlined_call_operand.vmem [shape: bf16[512,256], index: 1, kind: input, shape index: {}]   ;;  %s1506_s2 = inlined_call_operand.vmem [shape: f32[64,1], index: 2, kind: input, shape index: {}]   ;;  %s1507_s3 = inlined_call_operand.vmem [shape: bf16[64,256], index: 3, kind: output, shape index: {}]  }
   0x1   :  { %s1253_s14 = smov 0  }
   0x2 LB: > { %s25_s15 = sadd.s32 1, %s1222_s13  ;;  %p960_p0 = scmp.ge.s32.totalorder %s1226_s14, 1  ;;  %s1226_s14 = sphi %s1253_s14, %s13_s14   ;;  %s1222_s13 = sphi %s1251_s13, %s1509_s13   ;;  %s1218_s12 = sphi %s1249_s12, %s1508_s12  }
   0x3   : > { %p27_p1 = scmp.ge.s32.totalorder %s25_s15, 2  ;;  %p175_p2 = scmp.lt.s32.totalorder %s1226_s14, 3 }
   0x5   : > { %s1511_s15 = smov (%p27_p1, %s25_s15), 0  ;;  %p176_p3 = pnand %p960_p0, %p175_p2 }
   0x6   : > { %v1096_v0 = vld [vmem:[%s1505_s1 + $0x4] ss:$8 sps:$4 sm:$0xff] (!%p176_p3)   ;;  %v1228_v2 = vmov (!%p176_p3), 0   ;;  %v1100_v3 = vld [vmem:[%s1505_s1] ss:$8 sps:$4 sm:$0xff] (!%p176_p3)   ;;  %s961_s30 = sshll.u32 (!%p176_p3), %s1218_s12, 2 }
   0x7   : > { %179 = sbr.rel (%p176_p3) target bundleno = 304 (0x130), region = 32  ;;  %v1098_v1 = vld [vmem:[%s1505_s1 + $0x104] ss:$8 sps:$4 sm:$0xff] (!%p176_p3)   ;;  %1094 = vset.pattern.permute.xlu0 (!%p176_p3), %v1228_v2  ;;  %1095 = vset.pattern.permute.xlu1 (!%p176_p3), %v1228_v2  ;;  %v1101_v4 = vld [vmem:[%s1505_s1 + $0x100] ss:$8 sps:$4 sm:$0xff] (!%p176_p3)   ;;  %p216_p4 = scmp.lt.s32.totalorder (!%p176_p3), %s961_s30, 7 }
   0x8   : > { %702 = vmatprep.subr.bf16.mxu1 (!%p176_p3), %v1096_v0  ;;  %755 = vmatprep.subr.bf16.mxu0 (!%p176_p3), %v1098_v1  ;;  %v1102_v5 = vld [vmem:[%s1505_s1 + $0x14] ss:$8 sps:$4 sm:$0xff] (!%p176_p3)   ;;  %v1106_v7 = vld [vmem:[%s1505_s1 + $0x10] ss:$8 sps:$4 sm:$0xff] (!%p176_p3)   ;;  %v1108_v9 = vld [vmem:[%s1505_s1 + $0x24] ss:$8 sps:$4 sm:$0xff] (!%p176_p3)  }
   0x9   : > { %703 = vmatpush1.bf16.msra.mxu1 (!%p176_p3), %v1100_v3  ;;  %756 = vmatpush1.bf16.msra.mxu0 (!%p176_p3), %v1101_v4  ;;  %v1104_v6 = vld [vmem:[%s1505_s1 + $0x114] ss:$8 sps:$4 sm:$0xff] (!%p176_p3)   ;;  %v1107_v8 = vld [vmem:[%s1505_s1 + $0x110] ss:$8 sps:$4 sm:$0xff] (!%p176_p3)   ;;  %v1110_v10 = vld [vmem:[%s1505_s1 + $0x124] ss:$8 sps:$4 sm:$0xff] (!%p176_p3)  }
   0xa   : > { %704 = vmatprep.subr.bf16.mxu1 (!%p176_p3), %v1102_v5  ;;  %757 = vmatprep.subr.bf16.mxu0 (!%p176_p3), %v1104_v6  ;;  %v1112_v11 = vld [vmem:[%s1505_s1 + $0x20] ss:$8 sps:$4 sm:$0xff] (!%p176_p3)   ;;  %v1114_v13 = vld [vmem:[%s1505_s1 + $0x34] ss:$8 sps:$4 sm:$0xff] (!%p176_p3)   ;;  %v1118_v15 = vld [vmem:[%s1505_s1 + $0x30] ss:$8 sps:$4 sm:$0xff] (!%p176_p3)  }
   0xb   : > { %v1113_v12 = vld [vmem:[%s1505_s1 + $0x120] ss:$8 sps:$4 sm:$0xff] (!%p176_p3)   ;;  %v1116_v14 = vld [vmem:[%s1505_s1 + $0x134] ss:$8 sps:$4 sm:$0xff] (!%p176_p3)   ;;  %v1119_v16 = vld [vmem:[%s1505_s1 + $0x130] ss:$8 sps:$4 sm:$0xff] (!%p176_p3)  }
   0xc   : > { %v1120_v17 = vld [vmem:[%s1505_s1 + $0x44] ss:$8 sps:$4 sm:$0xff] (!%p176_p3)   ;;  %v1124_v19 = vld [vmem:[%s1505_s1 + $0x40] ss:$8 sps:$4 sm:$0xff] (!%p176_p3)   ;;  %v1126_v21 = vld [vmem:[%s1505_s1 + $0x54] ss:$8 sps:$4 sm:$0xff] (!%p176_p3)  }
   0xd   : > { %705 = vmatpush1.bf16.msra.mxu1 (!%p176_p3), %v1106_v7  ;;  %758 = vmatpush1.bf16.msra.mxu0 (!%p176_p3), %v1107_v8  ;;  %v1122_v18 = vld [vmem:[%s1505_s1 + $0x144] ss:$8 sps:$4 sm:$0xff] (!%p176_p3)   ;;  %v1125_v20 = vld [vmem:[%s1505_s1 + $0x140] ss:$8 sps:$4 sm:$0xff] (!%p176_p3)   ;;  %v1128_v22 = vld [vmem:[%s1505_s1 + $0x154] ss:$8 sps:$4 sm:$0xff] (!%p176_p3)  }
   0xe   : > { %706 = vmatprep.subr.bf16.mxu1 %v1108_v9  ;;  %759 = vmatprep.subr.bf16.mxu0 %v1110_v10  ;;  %v1130_v23 = vld [vmem:[%s1505_s1 + $0x50] ss:$8 sps:$4 sm:$0xff]   ;;  %v1132_v25 = vld [vmem:[%s1505_s1 + $0x64] ss:$8 sps:$4 sm:$0xff]   ;;  %v1136_v27 = vld [vmem:[%s1505_s1 + $0x60] ss:$8 sps:$4 sm:$0xff]  }
   0xf   : > { %v1131_v24 = vld [vmem:[%s1505_s1 + $0x150] ss:$8 sps:$4 sm:$0xff]   ;;  %v1134_v26 = vld [vmem:[%s1505_s1 + $0x164] ss:$8 sps:$4 sm:$0xff]   ;;  %v1137_v28 = vld [vmem:[%s1505_s1 + $0x160] ss:$8 sps:$4 sm:$0xff]  }
  0x10   : > { %v1138_v29 = vld [vmem:[%s1505_s1 + $0x74] ss:$8 sps:$4 sm:$0xff]   ;;  %v1142_v31 = vld [vmem:[%s1505_s1 + $0x70] ss:$8 sps:$4 sm:$0xff]   ;;  %v1144_v33 = vld [vmem:[%s1505_s1 + $0x84] ss:$8 sps:$4 sm:$0xff]  }
  0x11   : > { %707 = vmatpush1.bf16.msra.mxu1 %v1112_v11  ;;  %760 = vmatpush1.bf16.msra.mxu0 %v1113_v12  ;;  %v1140_v30 = vld [vmem:[%s1505_s1 + $0x174] ss:$8 sps:$4 sm:$0xff]   ;;  %v1143_v32 = vld [vmem:[%s1505_s1 + $0x170] ss:$8 sps:$4 sm:$0xff]   ;;  %v1146_v34 = vld [vmem:[%s1505_s1 + $0x184] ss:$8 sps:$4 sm:$0xff]  }
  0x12   : > { %708 = vmatprep.subr.bf16.mxu1 %v1114_v13  ;;  %761 = vmatprep.subr.bf16.mxu0 %v1116_v14  ;;  %v1148_v35 = vld [vmem:[%s1505_s1 + $0x80] ss:$8 sps:$4 sm:$0xff]   ;;  %v1150_v37 = vld [vmem:[%s1505_s1 + $0x94] ss:$8 sps:$4 sm:$0xff]   ;;  %s1513_s30 = smov (!%p216_p4, %s961_s30), 7 }
  0x13   : > { %v1149_v36 = vld [vmem:[%s1505_s1 + $0x180] ss:$8 sps:$4 sm:$0xff]   ;;  %v1152_v38 = vld [vmem:[%s1505_s1 + $0x194] ss:$8 sps:$4 sm:$0xff]   ;;  %v1154_v39 = vld [vmem:[%s1505_s1 + $0x90] ss:$8 sps:$4 sm:$0xff]  }
  0x14   : > { %v1155_v40 = vld [vmem:[%s1505_s1 + $0x190] ss:$8 sps:$4 sm:$0xff]   ;;  %v1156_v41 = vld [vmem:[%s1505_s1 + $0xa4] ss:$8 sps:$4 sm:$0xff]   ;;  %s1047_s5 = sshll.u32 %s1513_s30, 4  ;;  %s965_s24 = sshll.u32 %s1513_s30, 3 }
  0x15   : > { %709 = vmatpush1.bf16.msra.mxu1 %v1118_v15  ;;  %762 = vmatpush1.bf16.msra.mxu0 %v1119_v16  ;;  %v1158_v42 = vld [vmem:[%s1505_s1 + $0x1a4] ss:$8 sps:$4 sm:$0xff]   ;;  %v1160_v43 = vld [vmem:[%s1505_s1 + $0xa0] ss:$8 sps:$4 sm:$0xff]   ;;  %v1162_v45 = vld [vmem:[%s1505_s1 + $0xb4] ss:$8 sps:$4 sm:$0xff]   ;;  %s1411_s17 = scalar_lea.vmem %s1504_s0, %s1047_s5  ;;  %s232_s5 = scalar_lea.vmem %s1506_s2, %s965_s24 }
  0x16   : > { %710 = vmatprep.subr.bf16.mxu1 %v1120_v17  ;;  %763 = vmatprep.subr.bf16.mxu0 %v1122_v18  ;;  %v1161_v44 = vld [vmem:[%s1505_s1 + $0x1a0] ss:$8 sps:$4 sm:$0xff]   ;;  %v1164_v46 = vld [vmem:[%s1505_s1 + $0x1b4] ss:$8 sps:$4 sm:$0xff]   ;;  %v1166_v47 = vld [vmem:[%s1505_s1 + $0xb0] ss:$8 sps:$4 sm:$0xff]   ;;  %s1489_s18 = scalar_lea.vmem %s1507_s3, %s965_s24 }
  0x17   : > { %v1167_v48 = vld [vmem:[%s1505_s1 + $0x1b0] ss:$8 sps:$4 sm:$0xff]   ;;  %v1168_v49 = vld [vmem:[%s1505_s1 + $0xc4] ss:$8 sps:$4 sm:$0xff]   ;;  %v1172_v53 = vld [vmem:[%s1505_s1 + $0xc0] ss:$8 sps:$4 sm:$0xff]  }
  0x18   : > { %v1194_v50 = vld [vmem:[%s1411_s17 + $0x4] ss:$16 sps:$4 sm:$0xff]   ;;  %v1197_v52 = vld [vmem:[%s1411_s17 + $0xc] ss:$16 sps:$4 sm:$0xff]   ;;  %v1173_v54 = vld [vmem:[%s1505_s1 + $0x1c0] ss:$8 sps:$4 sm:$0xff]  }
  0x19   : > { %711 = vmatpush1.bf16.msra.mxu1 %v1124_v19  ;;  %764 = vmatpush1.bf16.msra.mxu0 %v1125_v20  ;;  %v1170_v51 = vld [vmem:[%s1505_s1 + $0x1c4] ss:$8 sps:$4 sm:$0xff]   ;;  %v320_v56 = vld [vmem:[%s232_s5 + $0x10] sm:$0xff]  ;;  %v321_v60 = vld [vmem:[%s232_s5 + $0x18] sm:$0xff] }
  0x1a   : > { %712 = vmatprep.subr.bf16.mxu1 %v1126_v21  ;;  %765 = vmatprep.subr.bf16.mxu0 %v1128_v22  ;;  %v318_v55 = vld [vmem:[%s232_s5] sm:$0xff]  ;;  %v1174_v57 = vld [vmem:[%s1505_s1 + $0xd4] ss:$8 sps:$4 sm:$0xff]   ;;  %v319_v59 = vld [vmem:[%s232_s5 + $0x8] sm:$0xff] }
  0x1b   : > { %734 = vmatprep.mubr.bf16.mxu1 %v1194_v50  ;;  %787 = vmatprep.mubr.bf16.mxu0 %v1197_v52  ;;  %v1176_v58 = vld [vmem:[%s1505_s1 + $0x1d4] ss:$8 sps:$4 sm:$0xff]   ;;  %v1178_v61 = vld [vmem:[%s1505_s1 + $0xd0] ss:$8 sps:$4 sm:$0xff]   ;;  %v1180_v63 = vld [vmem:[%s1505_s1 + $0xe4] ss:$8 sps:$4 sm:$0xff]  }
  0x1c   : > { %324 = vperm.xlu0 %1094, %v318_v55   ;;  %334 = vperm.xlu1 %1095, %v320_v56   ;;  %v1179_v62 = vld [vmem:[%s1505_s1 + $0x1d0] ss:$8 sps:$4 sm:$0xff]   ;;  %v1182_v0 = vld [vmem:[%s1505_s1 + $0x1e4] ss:$8 sps:$4 sm:$0xff]   ;;  %v1184_v1 = vld [vmem:[%s1505_s1 + $0xe0] ss:$8 sps:$4 sm:$0xff]  }
  0x1d   : > { %713 = vmatpush1.bf16.msra.mxu1 %v1130_v23  ;;  %766 = vmatpush1.bf16.msra.mxu0 %v1131_v24  ;;  %v1185_v2 = vld [vmem:[%s1505_s1 + $0x1e0] ss:$8 sps:$4 sm:$0xff]   ;;  %v1186_v3 = vld [vmem:[%s1505_s1 + $0xf4] ss:$8 sps:$4 sm:$0xff]   ;;  %v1190_v5 = vld [vmem:[%s1505_s1 + $0xf0] ss:$8 sps:$4 sm:$0xff]  }
  0x1e   : > { %714 = vmatprep.subr.bf16.mxu1 %v1132_v25  ;;  %767 = vmatprep.subr.bf16.mxu0 %v1134_v26  ;;  %v1188_v4 = vld [vmem:[%s1505_s1 + $0x1f4] ss:$8 sps:$4 sm:$0xff]   ;;  %v1191_v6 = vld [vmem:[%s1505_s1 + $0x1f0] ss:$8 sps:$4 sm:$0xff]  }
  0x1f   : > { %v1192_v7 = vld [vmem:[%s1411_s17] ss:$16 sps:$4 sm:$0xff]   ;;  %v1195_v8 = vld [vmem:[%s1411_s17 + $0x8] ss:$16 sps:$4 sm:$0xff]   ;;  %v1198_v9 = vld [vmem:[%s1411_s17 + $0x24] ss:$16 sps:$4 sm:$0xff]  }
  0x20   : > { %329 = vperm.xlu0 %1094, %v319_v59   ;;  %339 = vperm.xlu1 %1095, %v321_v60   ;;  %v1200_v10 = vld [vmem:[%s1411_s17 + $0x2c] ss:$16 sps:$4 sm:$0xff]   ;;  %v1202_v11 = vld [vmem:[%s1411_s17 + $0x20] ss:$16 sps:$4 sm:$0xff]   ;;  %v1203_v12 = vld [vmem:[%s1411_s17 + $0x28] ss:$16 sps:$4 sm:$0xff]  }
  0x21   : > { %715 = vmatpush1.bf16.msra.mxu1 %v1136_v27  ;;  %768 = vmatpush1.bf16.msra.mxu0 %v1137_v28 }
  0x22   : > { %716 = vmatprep.subr.bf16.mxu1 %v1138_v29  ;;  %769 = vmatprep.subr.bf16.mxu0 %v1140_v30 }
  0x25   : > { %717 = vmatpush1.bf16.msra.mxu1 %v1142_v31  ;;  %770 = vmatpush1.bf16.msra.mxu0 %v1143_v32 }
  0x26   : > { %718 = vmatprep.subr.bf16.mxu1 %v1144_v33  ;;  %771 = vmatprep.subr.bf16.mxu0 %v1146_v34 }
  0x29   : > { %719 = vmatpush1.bf16.msra.mxu1 %v1148_v35  ;;  %772 = vmatpush1.bf16.msra.mxu0 %v1149_v36 }
  0x2a   : > { %720 = vmatprep.subr.bf16.mxu1 %v1150_v37  ;;  %773 = vmatprep.subr.bf16.mxu0 %v1152_v38 }
  0x2d   : > { %721 = vmatpush1.bf16.msra.mxu1 %v1154_v39  ;;  %774 = vmatpush1.bf16.msra.mxu0 %v1155_v40 }
  0x2e   : > { %722 = vmatprep.subr.bf16.mxu1 %v1156_v41  ;;  %775 = vmatprep.subr.bf16.mxu0 %v1158_v42 }
  0x31   : > { %723 = vmatpush1.bf16.msra.mxu1 %v1160_v43  ;;  %776 = vmatpush1.bf16.msra.mxu0 %v1161_v44 }
  0x32   : > { %724 = vmatprep.subr.bf16.mxu1 %v1162_v45  ;;  %777 = vmatprep.subr.bf16.mxu0 %v1164_v46 }
  0x35   : > { %725 = vmatpush1.bf16.msra.mxu1 %v1166_v47  ;;  %778 = vmatpush1.bf16.msra.mxu0 %v1167_v48 }
  0x36   : > { %726 = vmatprep.subr.bf16.mxu1 %v1168_v49  ;;  %779 = vmatprep.subr.bf16.mxu0 %v1170_v51 }
  0x39   : > { %727 = vmatpush1.bf16.msra.mxu1 %v1172_v53  ;;  %780 = vmatpush1.bf16.msra.mxu0 %v1173_v54 }
  0x3a   : > { %728 = vmatprep.subr.bf16.mxu1 %v1174_v57  ;;  %781 = vmatprep.subr.bf16.mxu0 %v1176_v58 }
  0x3d   : > { %729 = vmatpush1.bf16.msra.mxu1 %v1178_v61  ;;  %782 = vmatpush1.bf16.msra.mxu0 %v1179_v62 }
  0x3e   : > { %730 = vmatprep.subr.bf16.mxu1 %v1180_v63  ;;  %783 = vmatprep.subr.bf16.mxu0 %v1182_v0 }
  0x41   : > { %731 = vmatpush1.bf16.msra.mxu1 %v1184_v1  ;;  %784 = vmatpush1.bf16.msra.mxu0 %v1185_v2 }
  0x42   : > { %732 = vmatprep.subr.bf16.mxu1 %v1186_v3  ;;  %785 = vmatprep.subr.bf16.mxu0 %v1188_v4 }
  0x45   : > { %733 = vmatpush1.bf16.msra.mxu1 %v1190_v5  ;;  %786 = vmatpush1.bf16.msra.mxu0 %v1191_v6 }
  0x48   : > { %735 = vmatmul.mubr.bf16.vlgmr.msra.gmra.mrb[0].mxu1 %v1192_v7  ;;  %788 = vmatmul.mubr.bf16.vlgmr.msra.gmra.mrb[0].mxu0 %v1195_v8 }
  0x49   : > { %744 = vmatprep.mubr.bf16.mxu1 %v1198_v9  ;;  %797 = vmatprep.mubr.bf16.mxu0 %v1200_v10 }
  0x50   : > { %745 = vmatmul.mubr.bf16.gmra.mrb[4].mxu1 %v1202_v11  ;;  %798 = vmatmul.mubr.bf16.gmra.mrb[4].mxu0 %v1203_v12 }
  0x9b   : > { %v325_v13 = vpop.permute.xlu0 %324  ;;  %v335_v15 = vpop.permute.xlu1 %334 }
  0x9f   : > { %v330_v14 = vpop.permute.xlu0 %329  ;;  %v340_v35 = vpop.permute.xlu1 %339 }
 0x11b   : > { %v736_v16 = vpop.f32.mrb[0].mxu1  ;;  %v789_v17 = vpop.f32.mrb[0].mxu0 }
 0x11c   : > { %v737_v18 = vadd.f32 %v736_v16, %v325_v13  ;;  %v738_v19 = vpop.f32.mrb[1].mxu1  ;;  %v791_v20 = vpop.f32.mrb[1].mxu0 }
 0x11d   : > { %v739_v21 = vadd.f32 %v738_v19, %v325_v13  ;;  %v740_v22 = vpop.f32.mrb[2].mxu1  ;;  %v793_v23 = vpop.f32.mrb[2].mxu0 }
 0x11e   : > { %v790_v24 = vadd.f32 %v789_v17, %v737_v18  ;;  %v741_v25 = vadd.f32 %v740_v22, %v330_v14  ;;  %v742_v26 = vpop.f32.mrb[3].mxu1  ;;  %v795_v27 = vpop.f32.mrb[3].mxu0 }
 0x11f   : > { %v792_v28 = vadd.f32 %v791_v20, %v739_v21  ;;  %v743_v29 = vadd.f32 %v742_v26, %v330_v14 }
 0x120   : > { %v808_v30 = vmax.f32 %v790_v24, 0.0  ;;  %v794_v31 = vadd.f32 %v793_v23, %v741_v25 }
 0x121   : > { %v809_v32 = vmax.f32 %v792_v28, 0.0  ;;  %v796_v33 = vadd.f32 %v795_v27, %v743_v29 }
 0x122   : > { %v810_v34 = vmax.f32 %v794_v31, 0.0 }
 0x123   : > { %v1049_v36 = vpack.c.bf16 %v809_v32, %v808_v30  ;;  %v811_v37 = vmax.f32 %v796_v33, 0.0  ;;  %v746_v38 = vpop.f32.mrb[4].mxu1  ;;  %v799_v39 = vpop.f32.mrb[4].mxu0 }
 0x124   : > { %v747_v40 = vadd.f32 %v746_v38, %v335_v15  ;;  %v748_v41 = vpop.f32.mrb[5].mxu1  ;;  %v801_v42 = vpop.f32.mrb[5].mxu0 }
 0x125   : > { %840 = vst [vmem:[%s1489_s18] sm:$0xff] %v1049_v36  ;;  %v1050_v43 = vpack.c.bf16 %v811_v37, %v810_v34  ;;  %v749_v44 = vadd.f32 %v748_v41, %v335_v15  ;;  %v750_v45 = vpop.f32.mrb[6].mxu1  ;;  %v803_v46 = vpop.f32.mrb[6].mxu0 }
 0x126   : > { %v800_v47 = vadd.f32 %v799_v39, %v747_v40  ;;  %v751_v48 = vadd.f32 %v750_v45, %v340_v35  ;;  %v752_v49 = vpop.f32.mrb[7].mxu1  ;;  %v805_v50 = vpop.f32.mrb[7].mxu0 }
 0x127   : > { %841 = vst [vmem:[%s1489_s18 + $0x8] sm:$0xff] %v1050_v43  ;;  %v802_v51 = vadd.f32 %v801_v42, %v749_v44  ;;  %v753_v52 = vadd.f32 %v752_v49, %v340_v35 }
 0x128   : > { %v812_v53 = vmax.f32 %v800_v47, 0.0  ;;  %v804_v54 = vadd.f32 %v803_v46, %v751_v48 }
 0x129   : > { %v813_v55 = vmax.f32 %v802_v51, 0.0  ;;  %v806_v56 = vadd.f32 %v805_v50, %v753_v52 }
 0x12a   : > { %v814_v57 = vmax.f32 %v804_v54, 0.0 }
 0x12b   : > { %v1051_v58 = vpack.c.bf16 %v813_v55, %v812_v53  ;;  %v815_v59 = vmax.f32 %v806_v56, 0.0 }
 0x12d   : > { %842 = vst [vmem:[%s1489_s18 + $0x10] sm:$0xff] %v1051_v58  ;;  %v1052_v60 = vpack.c.bf16 %v815_v59, %v814_v57 }
 0x12f   : > { %843 = vst [vmem:[%s1489_s18 + $0x18] sm:$0xff] %v1052_v60 }
 0x130 PF: > { %s13_s14 = sadd.s32 1, %s1226_s14   ;;  %s1508_s12 = smov %s1222_s13 }
 0x131   : > { %p10_p5 = scmp.ge.s32.totalorder %s13_s14, 4   ;;  %s1509_s13 = smov %s1511_s15 }
 0x133   :  { %12 = sbr.rel (!%p10_p5) target bundleno = 2 (0x2), region = 68 }

// kernel: dqn_forward.6
= control target key start
LH: loop header
LB: loop body
LE: loop exit
PB: predicated region body
PF: predicated region fallthrough
CT: control target
= control target key end

     0   :  { %s1169_s12 = smov 0   ;;  %s1171_s13 = smov 0   ;;  %s1335_s0 = inlined_call_operand.vmem [shape: bf16[64,576], index: 0, kind: input, shape index: {}]   ;;  %s1336_s1 = inlined_call_operand.vmem [shape: bf16[576,128], index: 1, kind: input, shape index: {}]   ;;  %s1337_s2 = inlined_call_operand.vmem [shape: f32[64,1], index: 2, kind: input, shape index: {}]   ;;  %s1338_s3 = inlined_call_operand.vmem [shape: bf16[64,128], index: 3, kind: output, shape index: {}]  }
   0x1   :  { %s1173_s14 = smov 0  }
   0x2 LB: > { %s25_s15 = sadd.s32 1, %s1142_s13  ;;  %p896_p0 = scmp.ge.s32.totalorder %s1146_s14, 1  ;;  %s1146_s14 = sphi %s1173_s14, %s13_s14   ;;  %s1142_s13 = sphi %s1171_s13, %s1340_s13   ;;  %s1138_s12 = sphi %s1169_s12, %s1339_s12  }
   0x3   : > { %p27_p1 = scmp.ge.s32.totalorder %s25_s15, 2  ;;  %p173_p2 = scmp.lt.s32.totalorder %s1146_s14, 3 }
   0x5   : > { %s1342_s15 = smov (%p27_p1, %s25_s15), 0  ;;  %p174_p3 = pnand %p896_p0, %p173_p2 }
   0x6   : > { %v1074_v0 = vld [vmem:[%s1336_s1 + $0x40] sm:$0xff] (!%p174_p3)   ;;  %v1078_v4 = vld [vmem:[%s1336_s1 + $0x48] sm:$0xff] (!%p174_p3)   ;;  %v1148_v6 = vmov (!%p174_p3), 0   ;;  %v1082_v9 = vld [vmem:[%s1336_s1 + $0x50] sm:$0xff] (!%p174_p3)   ;;  %s897_s21 = sshll.u32 (!%p174_p3), %s1138_s12, 2  ;;  %vm611_vm0 = vcmask (!%p174_p3), 523264  }
   0x7   : > { %177 = sbr.rel (%p174_p3) target bundleno = 277 (0x115), region = 32  ;;  %v1075_v1 = vld [vmem:[%s1336_s1] sm:$0xff] (!%p174_p3)   ;;  %972 = vmatprep.subr.bf16.mxu0 (!%p174_p3), %v1074_v0  ;;  %v1079_v5 = vld [vmem:[%s1336_s1 + $0x8] sm:$0xff] (!%p174_p3)   ;;  %1072 = vset.pattern.permute.xlu0 (!%p174_p3), %v1148_v6  ;;  %v1083_v10 = vld [vmem:[%s1336_s1 + $0x10] sm:$0xff] (!%p174_p3)   ;;  %p211_p4 = scmp.lt.s32.totalorder (!%p174_p3), %s897_s21, 7 }
   0x8   : > { %v1076_v2 = vld [vmem:[%s1336_s1 + $0xc0] sm:$0xff] (!%p174_p3)   ;;  %973 = vmatpush3.bf16.msra.mxu0 (!%p174_p3), %v1075_v1  ;;  %v1080_v7 = vld [vmem:[%s1336_s1 + $0xc8] sm:$0xff] (!%p174_p3)   ;;  %1073 = vset.pattern.permute.xlu1 (!%p174_p3), %v1148_v6  ;;  %v1084_v11 = vld [vmem:[%s1336_s1 + $0xd0] sm:$0xff] (!%p174_p3)  }
   0x9   : > { %v1077_v3 = vld [vmem:[%s1336_s1 + $0x80] sm:$0xff] (!%p174_p3)   ;;  %1000 = vmatprep.subr.bf16.mxu1 (!%p174_p3), %v1076_v2  ;;  %974 = vmatprep.subr.bf16.mxu0 (!%p174_p3), %v1078_v4  ;;  %v1081_v8 = vld [vmem:[%s1336_s1 + $0x88] sm:$0xff] (!%p174_p3)   ;;  %v1085_v12 = vld [vmem:[%s1336_s1 + $0x90] sm:$0xff] (!%p174_p3)  }
   0xa   : > { %1001 = vmatpush3.bf16.msra.mxu1 (!%p174_p3), %v1077_v3  ;;  %v1086_v13 = vld [vmem:[%s1336_s1 + $0x58] sm:$0xff] (!%p174_p3)   ;;  %v1090_v17 = vld [vmem:[%s1336_s1 + $0x60] sm:$0xff] (!%p174_p3)   ;;  %v1094_v21 = vld [vmem:[%s1336_s1 + $0x68] sm:$0xff] (!%p174_p3)  }
   0xb   : > { %1002 = vmatprep.subr.bf16.mxu1 (!%p174_p3), %v1080_v7  ;;  %v1087_v14 = vld [vmem:[%s1336_s1 + $0x18] sm:$0xff] (!%p174_p3)   ;;  %v1091_v18 = vld [vmem:[%s1336_s1 + $0x20] sm:$0xff] (!%p174_p3)   ;;  %v1095_v22 = vld [vmem:[%s1336_s1 + $0x28] sm:$0xff] (!%p174_p3)  }
   0xc   : > { %975 = vmatpush3.bf16.msra.mxu0 (!%p174_p3), %v1079_v5  ;;  %v1088_v15 = vld [vmem:[%s1336_s1 + $0xd8] sm:$0xff] (!%p174_p3)   ;;  %v1092_v19 = vld [vmem:[%s1336_s1 + $0xe0] sm:$0xff] (!%p174_p3)   ;;  %v1096_v23 = vld [vmem:[%s1336_s1 + $0xe8] sm:$0xff] (!%p174_p3)  }
   0xd   : > { %976 = vmatprep.subr.bf16.mxu0 (!%p174_p3), %v1082_v9  ;;  %v1089_v16 = vld [vmem:[%s1336_s1 + $0x98] sm:$0xff] (!%p174_p3)   ;;  %v1093_v20 = vld [vmem:[%s1336_s1 + $0xa0] sm:$0xff] (!%p174_p3)   ;;  %v1097_v24 = vld [vmem:[%s1336_s1 + $0xa8] sm:$0xff] (!%p174_p3)  }
   0xe   : > { %1003 = vmatpush3.bf16.msra.mxu1 %v1081_v8  ;;  %s1344_s21 = smov (!%p211_p4, %s897_s21), 7  ;;  %v1098_v25 = vld [vmem:[%s1336_s1 + $0x70] sm:$0xff]   ;;  %v1102_v29 = vld [vmem:[%s1336_s1 + $0x78] sm:$0xff]   ;;  %v1109_v35 = vld [vmem:[%s1336_s1 + $0x100] sm:$0xff]  }
   0xf   : > { %1004 = vmatprep.subr.bf16.mxu1 %v1084_v11  ;;  %s1046_s20 = smul.u32 20, %s1344_s21  ;;  %v1099_v26 = vld [vmem:[%s1336_s1 + $0x30] sm:$0xff]   ;;  %v1103_v30 = vld [vmem:[%s1336_s1 + $0x38] sm:$0xff]   ;;  %v1113_v38 = vld [vmem:[%s1336_s1 + $0x108] sm:$0xff]   ;;  %s900_s19 = sshll.u32 %s1344_s21, 3 }
  0x10   : > { %977 = vmatpush3.bf16.msra.mxu0 %v1083_v10  ;;  %v1100_v27 = vld [vmem:[%s1336_s1 + $0xf0] sm:$0xff]   ;;  %v1104_v31 = vld [vmem:[%s1336_s1 + $0xf8] sm:$0xff]   ;;  %s225_s25 = scalar_lea.vmem %s1337_s2, %s900_s19  ;;  %s902_s28 = sshll.u32 %s1344_s21, 2 }
  0x11   : > { %978 = vmatprep.subr.bf16.mxu0 %v1086_v13  ;;  %v1101_v28 = vld [vmem:[%s1336_s1 + $0xb0] sm:$0xff]   ;;  %s1283_s4 = scalar_lea.vmem %s1335_s0, %s1046_s20  ;;  %v1108_v34 = vld [vmem:[%s1336_s1 + $0xb8] sm:$0xff]   ;;  %v321_v46 = vld [vmem:[%s225_s25] sm:$0xff]  ;;  %s234_s30 = scalar_lea.vmem %s1338_s3, %s902_s28 }
  0x12   : > { %1005 = vmatpush3.bf16.msra.mxu1 %v1085_v12  ;;  %v1105_v32 = vld [vmem:[%s1283_s4] ss:$20 sps:$4 sm:$0xff]   ;;  %v1107_v33 = vld [vmem:[%s1283_s4 + $0x4] ss:$20 sps:$4 sm:$0xff]   ;;  %v1110_v36 = vld [vmem:[%s1283_s4 + $0x8] ss:$20 sps:$4 sm:$0xff]   ;;  %327 = vperm.xlu0 %1072, %v321_v46  }
  0x13   : > { %1006 = vmatprep.subr.bf16.mxu1 %v1088_v15  ;;  %650 = vmatprep.mubr.bf16.mxu0 %v1107_v33  ;;  %v1112_v37 = vld [vmem:[%s1283_s4 + $0xc] ss:$20 sps:$4 sm:$0xff]   ;;  %v1116_v40 = vld [vmem:[%s1283_s4 + $0x28] ss:$20 sps:$4 sm:$0xff]   ;;  %v1117_v41 = vld [vmem:[%s1336_s1 + $0x110] sm:$0xff]  }
  0x14   : > { %979 = vmatpush3.bf16.msra.mxu0 %v1087_v14  ;;  %699 = vmatprep.mubr.bf16.mxu1 %v1112_v37  ;;  %v1114_v39 = vld [vmem:[%s1283_s4 + $0x2c] ss:$20 sps:$4 sm:$0xff]   ;;  %v1118_v42 = vld [vmem:[%s1283_s4 + $0x34] ss:$20 sps:$4 sm:$0xff]   ;;  %v1120_v43 = vld [vmem:[%s1283_s4 + $0x30] ss:$20 sps:$4 sm:$0xff]  }
  0x15   : > { %980 = vmatprep.subr.bf16.mxu0 %v1090_v17  ;;  %v1121_v44 = vld [vmem:[%s1336_s1 + $0x118] sm:$0xff]   ;;  %v1122_v45 = vld [vmem:[%s1283_s4 + $0x10] ss:$20 sps:$4 sm:$0xff]   ;;  %v322_v48 = vld [vmem:[%s225_s25 + $0x8] sm:$0xff] }
  0x16   : > { %1007 = vmatpush3.bf16.msra.mxu1 %v1089_v16  ;;  %v323_v47 = vld [vmem:[%s225_s25 + $0x10] sm:$0xff]  ;;  %v324_v49 = vld [vmem:[%s225_s25 + $0x18] sm:$0xff]  ;;  %332 = vperm.xlu0 %1072, %v322_v48  }
  0x17   : > { %1008 = vmatprep.subr.bf16.mxu1 %v1092_v19  ;;  %337 = vperm.xlu1 %1073, %v323_v47   ;;  %v1123_v50 = vld [vmem:[%s1283_s4 + $0x38] ss:$20 sps:$4 sm:$0xff]  }
  0x18   : > { %981 = vmatpush3.bf16.msra.mxu0 %v1091_v18 }
  0x19   : > { %982 = vmatprep.subr.bf16.mxu0 %v1094_v21 }
  0x1a   : > { %1009 = vmatpush3.bf16.msra.mxu1 %v1093_v20 }
  0x1b   : > { %1010 = vmatprep.subr.bf16.mxu1 %v1096_v23  ;;  %342 = vperm.xlu1 %1073, %v324_v49  }
  0x1c   : > { %983 = vmatpush3.bf16.msra.mxu0 %v1095_v22 }
  0x1d   : > { %984 = vmatprep.subr.bf16.mxu0 %v1098_v25 }
  0x1e   : > { %1011 = vmatpush3.bf16.msra.mxu1 %v1097_v24 }
  0x1f   : > { %1012 = vmatprep.subr.bf16.mxu1 %v1100_v27 }
  0x20   : > { %985 = vmatpush3.bf16.msra.mxu0 %v1099_v26 }
  0x21   : > { %986 = vmatprep.subr.bf16.mxu0 %v1102_v29 }
  0x22   : > { %1013 = vmatpush3.bf16.msra.mxu1 %v1101_v28 }
  0x23   : > { %1014 = vmatprep.subr.bf16.mxu1 %v1104_v31 }
  0x24   : > { %987 = vmatpush3.bf16.msra.mxu0 %v1103_v30 }
  0x25   : > { %1034 = vmatprep.subr.bf16.mxu0 %v1109_v35 }
  0x26   : > { %1015 = vmatpush3.bf16.msra.mxu1 %v1108_v34 }
  0x27   : > { %651 = vmatmul.mubr.bf16.vlgmr.msra.gmra.mrb[0].mxu0 %v1105_v32 }
  0x28   : > { %1035 = vmatpush3.bf16.msra.mxu0 %v1109_v35  ;;  %658 = vmatprep.mubr.bf16.mxu0 %v1114_v39 }
  0x29   : > { %700 = vmatmul.mubr.bf16.vlgmr.msra.gmra.mrb[0].mxu1 %v1110_v36  ;;  %1036 = vmatprep.subr.bf16.mxu0 %v1113_v38 }
  0x2a   : > { %707 = vmatprep.mubr.bf16.mxu1 %v1118_v42 }
  0x2c   : > { %1037 = vmatpush3.bf16.msra.mxu0 %v1113_v38 }
  0x2d   : > { %1038 = vmatprep.subr.bf16.mxu0 %v1117_v41 }
  0x2f   : > { %659 = vmatmul.mubr.bf16.gmra.mrb[4].mxu0 %v1116_v40 }
  0x30   : > { %1042 = vmatprep.mubr.msk.bf16.mxu0 %vm611_vm0, %v1122_v45  ;;  %1039 = vmatpush3.bf16.msra.mxu0 %v1117_v41 }
  0x31   : > { %708 = vmatmul.mubr.bf16.gmra.mrb[4].mxu1 %v1120_v43  ;;  %1040 = vmatprep.subr.bf16.mxu0 %v1121_v44 }
  0x34   : > { %1041 = vmatpush3.bf16.msra.mxu0 %v1121_v44 }
  0x37   : > { %1043 = vmatmul.mubr.msk.bf16.vlgmr.msra.gmra.mrb[8].mxu0 %vm611_vm0, %v1123_v50 }
  0x91   : > { %v328_v51 = vpop.permute.xlu0 %327 }
  0x95   : > { %v333_v56 = vpop.permute.xlu0 %332 }
  0x96   : > { %v338_v62 = vpop.permute.xlu1 %337 }
  0x9a   : > { %v343_v10 = vpop.permute.xlu1 %342 }
  0xfa   : > { %v988_v52 = vpop.f32.mrb[0].mxu0 }
  0xfb   : > { %v989_v53 = vpop.f32.mrb[1].mxu0 }
  0xfc   : > { %v990_v54 = vadd.f32 %v989_v53, %v988_v52  ;;  %v991_v55 = vpop.f32.mrb[2].mxu0  ;;  %v1016_v57 = vpop.f32.mrb[0].mxu1 }
  0xfd   : > { %v992_v58 = vpop.f32.mrb[3].mxu0  ;;  %v1017_v61 = vpop.f32.mrb[1].mxu1 }
  0xfe   : > { %v653_v59 = vadd.f32 %v990_v54, %v328_v51  ;;  %v993_v60 = vadd.f32 %v992_v58, %v991_v55  ;;  %v1018_v63 = vadd.f32 %v1017_v61, %v1016_v57  ;;  %v1019_v0 = vpop.f32.mrb[2].mxu1 }
  0xff   : > { %v1020_v2 = vpop.f32.mrb[3].mxu1 }
 0x100   : > { %v656_v1 = vadd.f32 %v993_v60, %v333_v56  ;;  %v1021_v3 = vadd.f32 %v1020_v2, %v1019_v0  ;;  %v702_v4 = vadd.f32 %v1018_v63, %v653_v59 }
 0x102   : > { %v994_v5 = vpop.f32.mrb[4].mxu0  ;;  %v705_v7 = vadd.f32 %v1021_v3, %v656_v1 }
 0x103   : > { %v995_v6 = vpop.f32.mrb[5].mxu0 }
 0x104   : > { %v996_v8 = vadd.f32 %v995_v6, %v994_v5  ;;  %v997_v9 = vpop.f32.mrb[6].mxu0  ;;  %v1022_v11 = vpop.f32.mrb[4].mxu1 }
 0x105   : > { %v998_v12 = vpop.f32.mrb[7].mxu0  ;;  %v1023_v15 = vpop.f32.mrb[5].mxu1 }
 0x106   : > { %v661_v13 = vadd.f32 %v996_v8, %v338_v62  ;;  %v999_v14 = vadd.f32 %v998_v12, %v997_v9  ;;  %v1024_v16 = vadd.f32 %v1023_v15, %v1022_v11  ;;  %v1025_v17 = vpop.f32.mrb[6].mxu1 }
 0x107   : > { %v1026_v19 = vpop.f32.mrb[7].mxu1 }
 0x108   : > { %v664_v18 = vadd.f32 %v999_v14, %v343_v10  ;;  %v1027_v20 = vadd.f32 %v1026_v19, %v1025_v17  ;;  %v710_v21 = vadd.f32 %v1024_v16, %v661_v13 }
 0x10a   : > { %v1044_v22 = vpop.f32.mrb[8].mxu0  ;;  %v713_v23 = vadd.f32 %v1027_v20, %v664_v18 }
 0x10b   : > { %v759_v24 = vadd.f32 %v1044_v22, %v710_v21  ;;  %v750_v25 = vpop.f32.mrb[9].mxu0 }
 0x10c   : > { %v751_v26 = vadd.f32 %v750_v25, %v702_v4  ;;  %v1045_v27 = vpop.f32.mrb[10].mxu0 }
 0x10d   : > { %v762_v28 = vadd.f32 %v1045_v27, %v713_v23  ;;  %v753_v29 = vpop.f32.mrb[11].mxu0  ;;  %v767_v31 = vmax.f32 %v759_v24, 0.0 }
 0x10e   : > { %v754_v30 = vadd.f32 %v753_v29, %v705_v7  ;;  %v765_v33 = vmax.f32 %v751_v26, 0.0 }
 0x10f   : > { %v768_v32 = vmax.f32 %v762_v28, 0.0 }
 0x110   : > { %v766_v34 = vmax.f32 %v754_v30, 0.0 }
 0x111   : > { %v969_v35 = vpack.c.bf16 %v768_v32, %v767_v31 }
 0x112   : > { %v964_v36 = vpack.c.bf16 %v766_v34, %v765_v33 }
 0x113   : > { %971 = vst [vmem:[%s234_s30 + $0x8] sm:$0xff] %v969_v35  }
 0x114   : > { %965 = vst [vmem:[%s234_s30] sm:$0xff] %v964_v36  }
 0x115 PF: > { %s13_s14 = sadd.s32 1, %s1146_s14   ;;  %s1339_s12 = smov %s1142_s13 }
 0x116   : > { %p10_p5 = scmp.ge.s32.totalorder %s13_s14, 4   ;;  %s1340_s13 = smov %s1342_s15 }
 0x118   :  { %12 = sbr.rel (!%p10_p5) target bundleno = 2 (0x2), region = 68 }

// kernel: dqn_forward.7
= control target key start
LH: loop header
LB: loop body
LE: loop exit
PB: predicated region body
PF: predicated region fallthrough
CT: control target
= control target key end

     0   :  { %s6542_s15 = smov 0   ;;  %s6544_s16 = smov 0   ;;  %s7891_s0 = inlined_call_operand.vmem [shape: bf16[16,3136], index: 0, kind: input, shape index: {}]   ;;  %s7892_s1 = inlined_call_operand.vmem [shape: bf16[3136,512], index: 1, kind: input, shape index: {}]   ;;  %s7893_s2 = inlined_call_operand.vmem [shape: f32[1,512], index: 2, kind: input, shape index: {}]   ;;  %s7894_s3 = inlined_call_operand.vmem [shape: bf16[512,6], index: 3, kind: input, shape index: {}]   ;;  %s7895_s4 = inlined_call_operand.vmem [shape: f32[2,16,6], index: 4, kind: output, shape index: {}]  }
   0x1   :  { %s6546_s17 = smov 0   ;;  %s6548_s18 = smov 0  }
   0x2   :  { %s6550_s19 = smov 0  }
   0x3 LB: > { %s26_s20 = sadd.s32 1, %s6510_s18  ;;  %p66_p1 = scmp.ne.s32.totalorder %s6502_s16, %s6498_s15  ;;  %s6514_s19 = sphi %s6550_s19, %s14_s19   ;;  %s6510_s18 = sphi %s6548_s18, %s7899_s18   ;;  %s6506_s17 = sphi %s6546_s17, %s7898_s17   ;;  %s6502_s16 = sphi %s6544_s16, %s7897_s16   ;;  %s6498_s15 = sphi %s6542_s15, %s7896_s15  }
   0x4   : > { %p28_p0 = scmp.ge.s32.totalorder %s26_s20, 2  ;;  %p67_p2 = scmp.eq.s32.totalorder %s6514_s19, 0 }
   0x5   : > { %s59_s22 = sadd.s32 1, %s6502_s16  ;;  %p5271_p5 = scmp.ge.s32.totalorder %s6514_s19, 2 }
   0x6   : > { %s7901_s20 = smov (%p28_p0, %s26_s20), 0  ;;  %p68_p3 = por %p67_p2, %p66_p1 }
   0x7   : > { %s56_s21 = ssub.s32 %s6510_s18, %s7901_s20  ;;  %182 = sbr.rel (%p5271_p5) target bundleno = 214 (0xd6), region = 20 }
   0x8   : > { %p57_p4 = scmp.eq.s32.totalorder %s56_s21, 0 }
   0xa   : > { %s6577_s23 = scalar_select %p57_p4, %s6502_s16, %s59_s22  }
   0xe   : > { %185 = sbr.rel (!%p68_p3) target bundleno = 214 (0xd6), region = 24  ;;  %s187_s24 = sand.u32 (%p68_p3), 1, %s6502_s16  }
   0xf   : > { %s5716_s25 = sshll.u32 (%p68_p3), %s6510_s18, 3  ;;  %s5792_s26 = smul.u32 (%p68_p3), 3136, %s187_s24 }
  0x10   : > { %s6585_s29 = scalar_lea.vmem (%p68_p3), %s7892_s1, %s5716_s25 }
  0x11   : > { %v1002_v0 = vld [vmem:[%s6585_s29] sm:$0xff] (%p68_p3)  ;;  %v1004_v1 = vld [vmem:[%s6585_s29 + $0x10] sm:$0xff] (%p68_p3)  ;;  %s6593_s30 = scalar_lea.vmem (%p68_p3), [#allocation2], %s5792_s26 }
  0x12   : > { %v1006_v2 = vld [vmem:[%s6585_s29 + $0x20] sm:$0xff] (%p68_p3)  ;;  %v1008_v3 = vld [vmem:[%s6585_s29 + $0x30] sm:$0xff] (%p68_p3)  ;;  %1003 = vst [vmem:[%s6593_s30] sm:$0xff] (%p68_p3), %v1002_v0  ;;  %1005 = vst [vmem:[%s6593_s30 + $0x8] sm:$0xff] (%p68_p3), %v1004_v1 }
  0x13   : > { %v1010_v4 = vld [vmem:[%s6585_s29 + $0x40] sm:$0xff] (%p68_p3)  ;;  %v1012_v5 = vld [vmem:[%s6585_s29 + $0x50] sm:$0xff] (%p68_p3)  ;;  %1007 = vst [vmem:[%s6593_s30 + $0x10] sm:$0xff] (%p68_p3), %v1006_v2  ;;  %1009 = vst [vmem:[%s6593_s30 + $0x18] sm:$0xff] (%p68_p3), %v1008_v3 }
  0x14   : > { %1011 = vst [vmem:[%s6593_s30 + $0x20] sm:$0xff] (%p68_p3), %v1010_v4  ;;  %1013 = vst [vmem:[%s6593_s30 + $0x28] sm:$0xff] (%p68_p3), %v1012_v5  ;;  %v1014_v6 = vld [vmem:[%s6585_s29 + $0x60] sm:$0xff] (%p68_p3)  ;;  %v1016_v7 = vld [vmem:[%s6585_s29 + $0x70] sm:$0xff] (%p68_p3) }
  0x15   : > { %v1018_v8 = vld [vmem:[%s6585_s29 + $0x80] sm:$0xff]  ;;  %1015 = vst [vmem:[%s6593_s30 + $0x30] sm:$0xff] %v1014_v6  ;;  %1017 = vst [vmem:[%s6593_s30 + $0x38] sm:$0xff] %v1016_v7  ;;  %v1020_v9 = vld [vmem:[%s6585_s29 + $0x90] sm:$0xff] }
  0x16   : > { %1019 = vst [vmem:[%s6593_s30 + $0x40] sm:$0xff] %v1018_v8  ;;  %v1022_v10 = vld [vmem:[%s6585_s29 + $0xa0] sm:$0xff]  ;;  %v1024_v11 = vld [vmem:[%s6585_s29 + $0xb0] sm:$0xff]  ;;  %1021 = vst [vmem:[%s6593_s30 + $0x48] sm:$0xff] %v1020_v9 }
  0x17   : > { %1023 = vst [vmem:[%s6593_s30 + $0x50] sm:$0xff] %v1022_v10  ;;  %1025 = vst [vmem:[%s6593_s30 + $0x58] sm:$0xff] %v1024_v11  ;;  %v1026_v12 = vld [vmem:[%s6585_s29 + $0xc0] sm:$0xff]  ;;  %v1028_v13 = vld [vmem:[%s6585_s29 + $0xd0] sm:$0xff] }
  0x18   : > { %v1030_v14 = vld [vmem:[%s6585_s29 + $0xe0] sm:$0xff]  ;;  %1027 = vst [vmem:[%s6593_s30 + $0x60] sm:$0xff] %v1026_v12  ;;  %1029 = vst [vmem:[%s6593_s30 + $0x68] sm:$0xff] %v1028_v13  ;;  %v1032_v15 = vld [vmem:[%s6585_s29 + $0xf0] sm:$0xff] }
  0x19   : > { %1031 = vst [vmem:[%s6593_s30 + $0x70] sm:$0xff] %v1030_v14  ;;  %v1034_v16 = vld [vmem:[%s6585_s29 + $0x100] sm:$0xff]  ;;  %v1036_v17 = vld [vmem:[%s6585_s29 + $0x110] sm:$0xff]  ;;  %1033 = vst [vmem:[%s6593_s30 + $0x78] sm:$0xff] %v1032_v15 }
  0x1a   : > { %1035 = vst [vmem:[%s6593_s30 + $0x80] sm:$0xff] %v1034_v16  ;;  %1037 = vst [vmem:[%s6593_s30 + $0x88] sm:$0xff] %v1036_v17  ;;  %v1038_v18 = vld [vmem:[%s6585_s29 + $0x120] sm:$0xff]  ;;  %v1040_v19 = vld [vmem:[%s6585_s29 + $0x130] sm:$0xff] }
  0x1b   : > { %v1042_v20 = vld [vmem:[%s6585_s29 + $0x140] sm:$0xff]  ;;  %1039 = vst [vmem:[%s6593_s30 + $0x90] sm:$0xff] %v1038_v18  ;;  %1041 = vst [vmem:[%s6593_s30 + $0x98] sm:$0xff] %v1040_v19  ;;  %v1044_v21 = vld [vmem:[%s6585_s29 + $0x150] sm:$0xff] }
  0x1c   : > { %1043 = vst [vmem:[%s6593_s30 + $0xa0] sm:$0xff] %v1042_v20  ;;  %v1046_v22 = vld [vmem:[%s6585_s29 + $0x160] sm:$0xff]  ;;  %v1048_v23 = vld [vmem:[%s6585_s29 + $0x170] sm:$0xff]  ;;  %1045 = vst [vmem:[%s6593_s30 + $0xa8] sm:$0xff] %v1044_v21 }
  0x1d   : > { %1047 = vst [vmem:[%s6593_s30 + $0xb0] sm:$0xff] %v1046_v22  ;;  %1049 = vst [vmem:[%s6593_s30 + $0xb8] sm:$0xff] %v1048_v23  ;;  %v1050_v24 = vld [vmem:[%s6585_s29 + $0x180] sm:$0xff]  ;;  %v1052_v25 = vld [vmem:[%s6585_s29 + $0x190] sm:$0xff] }
  0x1e   : > { %v1054_v26 = vld [vmem:[%s6585_s29 + $0x1a0] sm:$0xff]  ;;  %1051 = vst [vmem:[%s6593_s30 + $0xc0] sm:$0xff] %v1050_v24  ;;  %1053 = vst [vmem:[%s6593_s30 + $0xc8] sm:$0xff] %v1052_v25  ;;  %v1056_v27 = vld [vmem:[%s6585_s29 + $0x1b0] sm:$0xff] }
  0x1f   : > { %1055 = vst [vmem:[%s6593_s30 + $0xd0] sm:$0xff] %v1054_v26  ;;  %v1058_v28 = vld [vmem:[%s6585_s29 + $0x1c0] sm:$0xff]  ;;  %v1060_v29 = vld [vmem:[%s6585_s29 + $0x1d0] sm:$0xff]  ;;  %1057 = vst [vmem:[%s6593_s30 + $0xd8] sm:$0xff] %v1056_v27 }
  0x20   : > { %1059 = vst [vmem:[%s6593_s30 + $0xe0] sm:$0xff] %v1058_v28  ;;  %1061 = vst [vmem:[%s6593_s30 + $0xe8] sm:$0xff] %v1060_v29  ;;  %v1062_v30 = vld [vmem:[%s6585_s29 + $0x1e0] sm:$0xff]  ;;  %v1064_v31 = vld [vmem:[%s6585_s29 + $0x1f0] sm:$0xff] }
  0x21   : > { %v1066_v32 = vld [vmem:[%s6585_s29 + $0x200] sm:$0xff]  ;;  %1063 = vst [vmem:[%s6593_s30 + $0xf0] sm:$0xff] %v1062_v30  ;;  %1065 = vst [vmem:[%s6593_s30 + $0xf8] sm:$0xff] %v1064_v31  ;;  %v1068_v33 = vld [vmem:[%s6585_s29 + $0x210] sm:$0xff] }
  0x22   : > { %1067 = vst [vmem:[%s6593_s30 + $0x100] sm:$0xff] %v1066_v32  ;;  %v1070_v34 = vld [vmem:[%s6585_s29 + $0x220] sm:$0xff]  ;;  %v1072_v35 = vld [vmem:[%s6585_s29 + $0x230] sm:$0xff]  ;;  %1069 = vst [vmem:[%s6593_s30 + $0x108] sm:$0xff] %v1068_v33 }
  0x23   : > { %1071 = vst [vmem:[%s6593_s30 + $0x110] sm:$0xff] %v1070_v34  ;;  %1073 = vst [vmem:[%s6593_s30 + $0x118] sm:$0xff] %v1072_v35  ;;  %v1074_v36 = vld [vmem:[%s6585_s29 + $0x240] sm:$0xff]  ;;  %v1076_v37 = vld [vmem:[%s6585_s29 + $0x250] sm:$0xff] }
  0x24   : > { %v1078_v38 = vld [vmem:[%s6585_s29 + $0x260] sm:$0xff]  ;;  %1075 = vst [vmem:[%s6593_s30 + $0x120] sm:$0xff] %v1074_v36  ;;  %1077 = vst [vmem:[%s6593_s30 + $0x128] sm:$0xff] %v1076_v37  ;;  %v1080_v39 = vld [vmem:[%s6585_s29 + $0x270] sm:$0xff] }
  0x25   : > { %1079 = vst [vmem:[%s6593_s30 + $0x130] sm:$0xff] %v1078_v38  ;;  %v1082_v40 = vld [vmem:[%s6585_s29 + $0x280] sm:$0xff]  ;;  %v1084_v41 = vld [vmem:[%s6585_s29 + $0x290] sm:$0xff]  ;;  %1081 = vst [vmem:[%s6593_s30 + $0x138] sm:$0xff] %v1080_v39 }
  0x26   : > { %1083 = vst [vmem:[%s6593_s30 + $0x140] sm:$0xff] %v1082_v40  ;;  %1085 = vst [vmem:[%s6593_s30 + $0x148] sm:$0xff] %v1084_v41  ;;  %v1086_v42 = vld [vmem:[%s6585_s29 + $0x2a0] sm:$0xff]  ;;  %v1088_v43 = vld [vmem:[%s6585_s29 + $0x2b0] sm:$0xff] }
  0x27   : > { %v1090_v44 = vld [vmem:[%s6585_s29 + $0x2c0] sm:$0xff]  ;;  %1087 = vst [vmem:[%s6593_s30 + $0x150] sm:$0xff] %v1086_v42  ;;  %1089 = vst [vmem:[%s6593_s30 + $0x158] sm:$0xff] %v1088_v43  ;;  %v1092_v45 = vld [vmem:[%s6585_s29 + $0x2d0] sm:$0xff] }
  0x28   : > { %1091 = vst [vmem:[%s6593_s30 + $0x160] sm:$0xff] %v1090_v44  ;;  %v1094_v46 = vld [vmem:[%s6585_s29 + $0x2e0] sm:$0xff]  ;;  %v1096_v47 = vld [vmem:[%s6585_s29 + $0x2f0] sm:$0xff]  ;;  %1093 = vst [vmem:[%s6593_s30 + $0x168] sm:$0xff] %v1092_v45 }
  0x29   : > { %1095 = vst [vmem:[%s6593_s30 + $0x170] sm:$0xff] %v1094_v46  ;;  %1097 = vst [vmem:[%s6593_s30 + $0x178] sm:$0xff] %v1096_v47  ;;  %v1098_v48 = vld [vmem:[%s6585_s29 + $0x300] sm:$0xff]  ;;  %v1100_v49 = vld [vmem:[%s6585_s29 + $0x310] sm:$0xff] }
  0x2a   : > { %v1102_v50 = vld [vmem:[%s6585_s29 + $0x320] sm:$0xff]  ;;  %1099 = vst [vmem:[%s6593_s30 + $0x180] sm:$0xff] %v1098_v48  ;;  %1101 = vst [vmem:[%s6593_s30 + $0x188] sm:$0xff] %v1100_v49  ;;  %v1104_v51 = vld [vmem:[%s6585_s29 + $0x330] sm:$0xff] }
  0x2b   : > { %1103 = vst [vmem:[%s6593_s30 + $0x190] sm:$0xff] %v1102_v50  ;;  %v1106_v52 = vld [vmem:[%s6585_s29 + $0x340] sm:$0xff]  ;;  %v1108_v53 = vld [vmem:[%s6585_s29 + $0x350] sm:$0xff]  ;;  %1105 = vst [vmem:[%s6593_s30 + $0x198] sm:$0xff] %v1104_v51 }
  0x2c   : > { %1107 = vst [vmem:[%s6593_s30 + $0x1a0] sm:$0xff] %v1106_v52  ;;  %1109 = vst [vmem:[%s6593_s30 + $0x1a8] sm:$0xff] %v1108_v53  ;;  %v1110_v54 = vld [vmem:[%s6585_s29 + $0x360] sm:$0xff]  ;;  %v1112_v55 = vld [vmem:[%s6585_s29 + $0x370] sm:$0xff] }
  0x2d   : > { %v1114_v56 = vld [vmem:[%s6585_s29 + $0x380] sm:$0xff]  ;;  %1111 = vst [vmem:[%s6593_s30 + $0x1b0] sm:$0xff] %v1110_v54  ;;  %1113 = vst [vmem:[%s6593_s30 + $0x1b8] sm:$0xff] %v1112_v55  ;;  %v1116_v57 = vld [vmem:[%s6585_s29 + $0x390] sm:$0xff] }
  0x2e   : > { %1115 = vst [vmem:[%s6593_s30 + $0x1c0] sm:$0xff] %v1114_v56  ;;  %v1118_v58 = vld [vmem:[%s6585_s29 + $0x3a0] sm:$0xff]  ;;  %v1120_v59 = vld [vmem:[%s6585_s29 + $0x3b0] sm:$0xff]  ;;  %1117 = vst [vmem:[%s6593_s30 + $0x1c8] sm:$0xff] %v1116_v57 }
  0x2f   : > { %1119 = vst [vmem:[%s6593_s30 + $0x1d0] sm:$0xff] %v1118_v58  ;;  %1121 = vst [vmem:[%s6593_s30 + $0x1d8] sm:$0xff] %v1120_v59  ;;  %v1122_v60 = vld [vmem:[%s6585_s29 + $0x3c0] sm:$0xff]  ;;  %v1124_v61 = vld [vmem:[%s6585_s29 + $0x3d0] sm:$0xff] }
  0x30   : > { %v1126_v62 = vld [vmem:[%s6585_s29 + $0x3e0] sm:$0xff]  ;;  %1123 = vst [vmem:[%s6593_s30 + $0x1e0] sm:$0xff] %v1122_v60  ;;  %1125 = vst [vmem:[%s6593_s30 + $0x1e8] sm:$0xff] %v1124_v61  ;;  %v1128_v63 = vld [vmem:[%s6585_s29 + $0x3f0] sm:$0xff] }
  0x31   : > { %1127 = vst [vmem:[%s6593_s30 + $0x1f0] sm:$0xff] %v1126_v62  ;;  %v1130_v0 = vld [vmem:[%s6585_s29 + $0x400] sm:$0xff]  ;;  %v1132_v1 = vld [vmem:[%s6585_s29 + $0x410] sm:$0xff]  ;;  %1129 = vst [vmem:[%s6593_s30 + $0x1f8] sm:$0xff] %v1128_v63 }
  0x32   : > { %1131 = vst [vmem:[%s6593_s30 + $0x200] sm:$0xff] %v1130_v0  ;;  %1133 = vst [vmem:[%s6593_s30 + $0x208] sm:$0xff] %v1132_v1  ;;  %v1134_v2 = vld [vmem:[%s6585_s29 + $0x420] sm:$0xff]  ;;  %v1136_v3 = vld [vmem:[%s6585_s29 + $0x430] sm:$0xff] }
  0x33   : > { %v1138_v4 = vld [vmem:[%s6585_s29 + $0x440] sm:$0xff]  ;;  %1135 = vst [vmem:[%s6593_s30 + $0x210] sm:$0xff] %v1134_v2  ;;  %1137 = vst [vmem:[%s6593_s30 + $0x218] sm:$0xff] %v1136_v3  ;;  %v1140_v5 = vld [vmem:[%s6585_s29 + $0x450] sm:$0xff] }
  0x34   : > { %1139 = vst [vmem:[%s6593_s30 + $0x220] sm:$0xff] %v1138_v4  ;;  %v1142_v6 = vld [vmem:[%s6585_s29 + $0x460] sm:$0xff]  ;;  %v1144_v7 = vld [vmem:[%s6585_s29 + $0x470] sm:$0xff]  ;;  %1141 = vst [vmem:[%s6593_s30 + $0x228] sm:$0xff] %v1140_v5 }
  0x35   : > { %1143 = vst [vmem:[%s6593_s30 + $0x230] sm:$0xff] %v1142_v6  ;;  %1145 = vst [vmem:[%s6593_s30 + $0x238] sm:$0xff] %v1144_v7  ;;  %v1146_v8 = vld [vmem:[%s6585_s29 + $0x480] sm:$0xff]  ;;  %v1148_v9 = vld [vmem:[%s6585_s29 + $0x490] sm:$0xff] }
  0x36   : > { %v1150_v10 = vld [vmem:[%s6585_s29 + $0x4a0] sm:$0xff]  ;;  %1147 = vst [vmem:[%s6593_s30 + $0x240] sm:$0xff] %v1146_v8  ;;  %1149 = vst [vmem:[%s6593_s30 + $0x248] sm:$0xff] %v1148_v9  ;;  %v1152_v11 = vld [vmem:[%s6585_s29 + $0x4b0] sm:$0xff] }
  0x37   : > { %1151 = vst [vmem:[%s6593_s30 + $0x250] sm:$0xff] %v1150_v10  ;;  %v1154_v12 = vld [vmem:[%s6585_s29 + $0x4c0] sm:$0xff]  ;;  %v1156_v13 = vld [vmem:[%s6585_s29 + $0x4d0] sm:$0xff]  ;;  %1153 = vst [vmem:[%s6593_s30 + $0x258] sm:$0xff] %v1152_v11 }
  0x38   : > { %1155 = vst [vmem:[%s6593_s30 + $0x260] sm:$0xff] %v1154_v12  ;;  %1157 = vst [vmem:[%s6593_s30 + $0x268] sm:$0xff] %v1156_v13  ;;  %v1158_v14 = vld [vmem:[%s6585_s29 + $0x4e0] sm:$0xff]  ;;  %v1160_v15 = vld [vmem:[%s6585_s29 + $0x4f0] sm:$0xff] }
  0x39   : > { %v1162_v16 = vld [vmem:[%s6585_s29 + $0x500] sm:$0xff]  ;;  %1159 = vst [vmem:[%s6593_s30 + $0x270] sm:$0xff] %v1158_v14  ;;  %1161 = vst [vmem:[%s6593_s30 + $0x278] sm:$0xff] %v1160_v15  ;;  %v1164_v17 = vld [vmem:[%s6585_s29 + $0x510] sm:$0xff] }
  0x3a   : > { %1163 = vst [vmem:[%s6593_s30 + $0x280] sm:$0xff] %v1162_v16  ;;  %v1166_v18 = vld [vmem:[%s6585_s29 + $0x520] sm:$0xff]  ;;  %v1168_v19 = vld [vmem:[%s6585_s29 + $0x530] sm:$0xff]  ;;  %1165 = vst [vmem:[%s6593_s30 + $0x288] sm:$0xff] %v1164_v17 }
  0x3b   : > { %1167 = vst [vmem:[%s6593_s30 + $0x290] sm:$0xff] %v1166_v18  ;;  %1169 = vst [vmem:[%s6593_s30 + $0x298] sm:$0xff] %v1168_v19  ;;  %v1170_v20 = vld [vmem:[%s6585_s29 + $0x540] sm:$0xff]  ;;  %v1172_v21 = vld [vmem:[%s6585_s29 + $0x550] sm:$0xff] }
  0x3c   : > { %v1174_v22 = vld [vmem:[%s6585_s29 + $0x560] sm:$0xff]  ;;  %1171 = vst [vmem:[%s6593_s30 + $0x2a0] sm:$0xff] %v1170_v20  ;;  %1173 = vst [vmem:[%s6593_s30 + $0x2a8] sm:$0xff] %v1172_v21  ;;  %v1176_v23 = vld [vmem:[%s6585_s29 + $0x570] sm:$0xff] }
  0x3d   : > { %1175 = vst [vmem:[%s6593_s30 + $0x2b0] sm:$0xff] %v1174_v22  ;;  %v1178_v24 = vld [vmem:[%s6585_s29 + $0x580] sm:$0xff]  ;;  %v1180_v25 = vld [vmem:[%s6585_s29 + $0x590] sm:$0xff]  ;;  %1177 = vst [vmem:[%s6593_s30 + $0x2b8] sm:$0xff] %v1176_v23 }
  0x3e   : > { %1179 = vst [vmem:[%s6593_s30 + $0x2c0] sm:$0xff] %v1178_v24  ;;  %1181 = vst [vmem:[%s6593_s30 + $0x2c8] sm:$0xff] %v1180_v25  ;;  %v1182_v26 = vld [vmem:[%s6585_s29 + $0x5a0] sm:$0xff]  ;;  %v1184_v27 = vld [vmem:[%s6585_s29 + $0x5b0] sm:$0xff] }
  0x3f   : > { %v1186_v28 = vld [vmem:[%s6585_s29 + $0x5c0] sm:$0xff]  ;;  %1183 = vst [vmem:[%s6593_s30 + $0x2d0] sm:$0xff] %v1182_v26  ;;  %1185 = vst [vmem:[%s6593_s30 + $0x2d8] sm:$0xff] %v1184_v27  ;;  %v1188_v29 = vld [vmem:[%s6585_s29 + $0x5d0] sm:$0xff] }
  0x40   : > { %1187 = vst [vmem:[%s6593_s30 + $0x2e0] sm:$0xff] %v1186_v28  ;;  %v1190_v30 = vld [vmem:[%s6585_s29 + $0x5e0] sm:$0xff]  ;;  %v1192_v31 = vld [vmem:[%s6585_s29 + $0x5f0] sm:$0xff]  ;;  %1189 = vst [vmem:[%s6593_s30 + $0x2e8] sm:$0xff] %v1188_v29 }
  0x41   : > { %1191 = vst [vmem:[%s6593_s30 + $0x2f0] sm:$0xff] %v1190_v30  ;;  %1193 = vst [vmem:[%s6593_s30 + $0x2f8] sm:$0xff] %v1192_v31  ;;  %v1194_v32 = vld [vmem:[%s6585_s29 + $0x600] sm:$0xff]  ;;  %v1196_v33 = vld [vmem:[%s6585_s29 + $0x610] sm:$0xff] }
  0x42   : > { %v1198_v34 = vld [vmem:[%s6585_s29 + $0x620] sm:$0xff]  ;;  %1195 = vst [vmem:[%s6593_s30 + $0x300] sm:$0xff] %v1194_v32  ;;  %1197 = vst [vmem:[%s6593_s30 + $0x308] sm:$0xff] %v1196_v33  ;;  %v1200_v35 = vld [vmem:[%s6585_s29 + $0x630] sm:$0xff] }
  0x43   : > { %1199 = vst [vmem:[%s6593_s30 + $0x310] sm:$0xff] %v1198_v34  ;;  %v1202_v36 = vld [vmem:[%s6585_s29 + $0x640] sm:$0xff]  ;;  %v1204_v37 = vld [vmem:[%s6585_s29 + $0x650] sm:$0xff]  ;;  %1201 = vst [vmem:[%s6593_s30 + $0x318] sm:$0xff] %v1200_v35 }
  0x44   : > { %1203 = vst [vmem:[%s6593_s30 + $0x320] sm:$0xff] %v1202_v36  ;;  %1205 = vst [vmem:[%s6593_s30 + $0x328] sm:$0xff] %v1204_v37  ;;  %v1206_v38 = vld [vmem:[%s6585_s29 + $0x660] sm:$0xff]  ;;  %v1208_v39 = vld [vmem:[%s6585_s29 + $0x670] sm:$0xff] }
  0x45   : > { %v1210_v40 = vld [vmem:[%s6585_s29 + $0x680] sm:$0xff]  ;;  %1207 = vst [vmem:[%s6593_s30 + $0x330] sm:$0xff] %v1206_v38  ;;  %1209 = vst [vmem:[%s6593_s30 + $0x338] sm:$0xff] %v1208_v39  ;;  %v1212_v41 = vld [vmem:[%s6585_s29 + $0x690] sm:$0xff] }
  0x46   : > { %1211 = vst [vmem:[%s6593_s30 + $0x340] sm:$0xff] %v1210_v40  ;;  %v1214_v42 = vld [vmem:[%s6585_s29 + $0x6a0] sm:$0xff]  ;;  %v1216_v43 = vld [vmem:[%s6585_s29 + $0x6b0] sm:$0xff]  ;;  %1213 = vst [vmem:[%s6593_s30 + $0x348] sm:$0xff] %v1212_v41 }
  0x47   : > { %1215 = vst [vmem:[%s6593_s30 + $0x350] sm:$0xff] %v1214_v42  ;;  %1217 = vst [vmem:[%s6593_s30 + $0x358] sm:$0xff] %v1216_v43  ;;  %v1218_v44 = vld [vmem:[%s6585_s29 + $0x6c0] sm:$0xff]  ;;  %v1220_v45 = vld [vmem:[%s6585_s29 + $0x6d0] sm:$0xff] }
  0x48   : > { %v1222_v46 = vld [vmem:[%s6585_s29 + $0x6e0] sm:$0xff]  ;;  %1219 = vst [vmem:[%s6593_s30 + $0x360] sm:$0xff] %v1218_v44  ;;  %1221 = vst [vmem:[%s6593_s30 + $0x368] sm:$0xff] %v1220_v45  ;;  %v1224_v47 = vld [vmem:[%s6585_s29 + $0x6f0] sm:$0xff] }
  0x49   : > { %1223 = vst [vmem:[%s6593_s30 + $0x370] sm:$0xff] %v1222_v46  ;;  %v1226_v48 = vld [vmem:[%s6585_s29 + $0x700] sm:$0xff]  ;;  %v1228_v49 = vld [vmem:[%s6585_s29 + $0x710] sm:$0xff]  ;;  %1225 = vst [vmem:[%s6593_s30 + $0x378] sm:$0xff] %v1224_v47 }
  0x4a   : > { %1227 = vst [vmem:[%s6593_s30 + $0x380] sm:$0xff] %v1226_v48  ;;  %1229 = vst [vmem:[%s6593_s30 + $0x388] sm:$0xff] %v1228_v49  ;;  %v1230_v50 = vld [vmem:[%s6585_s29 + $0x720] sm:$0xff]  ;;  %v1232_v51 = vld [vmem:[%s6585_s29 + $0x730] sm:$0xff] }
  0x4b   : > { %v1234_v52 = vld [vmem:[%s6585_s29 + $0x740] sm:$0xff]  ;;  %1231 = vst [vmem:[%s6593_s30 + $0x390] sm:$0xff] %v1230_v50  ;;  %1233 = vst [vmem:[%s6593_s30 + $0x398] sm:$0xff] %v1232_v51  ;;  %v1236_v53 = vld [vmem:[%s6585_s29 + $0x750] sm:$0xff] }
  0x4c   : > { %1235 = vst [vmem:[%s6593_s30 + $0x3a0] sm:$0xff] %v1234_v52  ;;  %v1238_v54 = vld [vmem:[%s6585_s29 + $0x760] sm:$0xff]  ;;  %v1240_v55 = vld [vmem:[%s6585_s29 + $0x770] sm:$0xff]  ;;  %1237 = vst [vmem:[%s6593_s30 + $0x3a8] sm:$0xff] %v1236_v53 }
  0x4d   : > { %1239 = vst [vmem:[%s6593_s30 + $0x3b0] sm:$0xff] %v1238_v54  ;;  %1241 = vst [vmem:[%s6593_s30 + $0x3b8] sm:$0xff] %v1240_v55  ;;  %v1242_v56 = vld [vmem:[%s6585_s29 + $0x780] sm:$0xff]  ;;  %v1244_v57 = vld [vmem:[%s6585_s29 + $0x790] sm:$0xff] }
  0x4e   : > { %v1246_v58 = vld [vmem:[%s6585_s29 + $0x7a0] sm:$0xff]  ;;  %1243 = vst [vmem:[%s6593_s30 + $0x3c0] sm:$0xff] %v1242_v56  ;;  %1245 = vst [vmem:[%s6593_s30 + $0x3c8] sm:$0xff] %v1244_v57  ;;  %v1248_v59 = vld [vmem:[%s6585_s29 + $0x7b0] sm:$0xff] }
  0x4f   : > { %1247 = vst [vmem:[%s6593_s30 + $0x3d0] sm:$0xff] %v1246_v58  ;;  %v1250_v60 = vld [vmem:[%s6585_s29 + $0x7c0] sm:$0xff]  ;;  %v1252_v61 = vld [vmem:[%s6585_s29 + $0x7d0] sm:$0xff]  ;;  %1249 = vst [vmem:[%s6593_s30 + $0x3d8] sm:$0xff] %v1248_v59 }
  0x50   : > { %1251 = vst [vmem:[%s6593_s30 + $0x3e0] sm:$0xff] %v1250_v60  ;;  %1253 = vst [vmem:[%s6593_s30 + $0x3e8] sm:$0xff] %v1252_v61  ;;  %v1254_v62 = vld [vmem:[%s6585_s29 + $0x7e0] sm:$0xff]  ;;  %v1256_v63 = vld [vmem:[%s6585_s29 + $0x7f0] sm:$0xff] }
  0x51   : > { %v1258_v0 = vld [vmem:[%s6585_s29 + $0x800] sm:$0xff]  ;;  %1255 = vst [vmem:[%s6593_s30 + $0x3f0] sm:$0xff] %v1254_v62  ;;  %1257 = vst [vmem:[%s6593_s30 + $0x3f8] sm:$0xff] %v1256_v63  ;;  %v1260_v1 = vld [vmem:[%s6585_s29 + $0x810] sm:$0xff] }
  0x52   : > { %1259 = vst [vmem:[%s6593_s30 + $0x400] sm:$0xff] %v1258_v0  ;;  %v1262_v2 = vld [vmem:[%s6585_s29 + $0x820] sm:$0xff]  ;;  %v1264_v3 = vld [vmem:[%s6585_s29 + $0x830] sm:$0xff]  ;;  %1261 = vst [vmem:[%s6593_s30 + $0x408] sm:$0xff] %v1260_v1 }
  0x53   : > { %1263 = vst [vmem:[%s6593_s30 + $0x410] sm:$0xff] %v1262_v2  ;;  %1265 = vst [vmem:[%s6593_s30 + $0x418] sm:$0xff] %v1264_v3  ;;  %v1266_v4 = vld [vmem:[%s6585_s29 + $0x840] sm:$0xff]  ;;  %v1268_v5 = vld [vmem:[%s6585_s29 + $0x850] sm:$0xff] }
  0x54   : > { %v1270_v6 = vld [vmem:[%s6585_s29 + $0x860] sm:$0xff]  ;;  %1267 = vst [vmem:[%s6593_s30 + $0x420] sm:$0xff] %v1266_v4  ;;  %1269 = vst [vmem:[%s6593_s30 + $0x428] sm:$0xff] %v1268_v5  ;;  %v1272_v7 = vld [vmem:[%s6585_s29 + $0x870] sm:$0xff] }
  0x55   : > { %1271 = vst [vmem:[%s6593_s30 + $0x430] sm:$0xff] %v1270_v6  ;;  %v1274_v8 = vld [vmem:[%s6585_s29 + $0x880] sm:$0xff]  ;;  %v1276_v9 = vld [vmem:[%s6585_s29 + $0x890] sm:$0xff]  ;;  %1273 = vst [vmem:[%s6593_s30 + $0x438] sm:$0xff] %v1272_v7 }
  0x56   : > { %1275 = vst [vmem:[%s6593_s30 + $0x440] sm:$0xff] %v1274_v8  ;;  %1277 = vst [vmem:[%s6593_s30 + $0x448] sm:$0xff] %v1276_v9  ;;  %v1278_v10 = vld [vmem:[%s6585_s29 + $0x8a0] sm:$0xff]  ;;  %v1280_v11 = vld [vmem:[%s6585_s29 + $0x8b0] sm:$0xff] }
  0x57   : > { %v1282_v12 = vld [vmem:[%s6585_s29 + $0x8c0] sm:$0xff]  ;;  %1279 = vst [vmem:[%s6593_s30 + $0x450] sm:$0xff] %v1278_v10  ;;  %1281 = vst [vmem:[%s6593_s30 + $0x458] sm:$0xff] %v1280_v11  ;;  %v1284_v13 = vld [vmem:[%s6585_s29 + $0x8d0] sm:$0xff] }
  0x58   : > { %1283 = vst [vmem:[%s6593_s30 + $0x460] sm:$0xff] %v1282_v12  ;;  %v1286_v14 = vld [vmem:[%s6585_s29 + $0x8e0] sm:$0xff]  ;;  %v1288_v15 = vld [vmem:[%s6585_s29 + $0x8f0] sm:$0xff]  ;;  %1285 = vst [vmem:[%s6593_s30 + $0x468] sm:$0xff] %v1284_v13 }
  0x59   : > { %1287 = vst [vmem:[%s6593_s30 + $0x470] sm:$0xff] %v1286_v14  ;;  %1289 = vst [vmem:[%s6593_s30 + $0x478] sm:$0xff] %v1288_v15  ;;  %v1290_v16 = vld [vmem:[%s6585_s29 + $0x900] sm:$0xff]  ;;  %v1292_v17 = vld [vmem:[%s6585_s29 + $0x910] sm:$0xff] }
  0x5a   : > { %v1294_v18 = vld [vmem:[%s6585_s29 + $0x920] sm:$0xff]  ;;  %1291 = vst [vmem:[%s6593_s30 + $0x480] sm:$0xff] %v1290_v16  ;;  %1293 = vst [vmem:[%s6593_s30 + $0x488] sm:$0xff] %v1292_v17  ;;  %v1296_v19 = vld [vmem:[%s6585_s29 + $0x930] sm:$0xff] }
  0x5b   : > { %1295 = vst [vmem:[%s6593_s30 + $0x490] sm:$0xff] %v1294_v18  ;;  %v1298_v20 = vld [vmem:[%s6585_s29 + $0x940] sm:$0xff]  ;;  %v1300_v21 = vld [vmem:[%s6585_s29 + $0x950] sm:$0xff]  ;;  %1297 = vst [vmem:[%s6593_s30 + $0x498] sm:$0xff] %v1296_v19 }
  0x5c   : > { %1299 = vst [vmem:[%s6593_s30 + $0x4a0] sm:$0xff] %v1298_v20  ;;  %1301 = vst [vmem:[%s6593_s30 + $0x4a8] sm:$0xff] %v1300_v21  ;;  %v1302_v22 = vld [vmem:[%s6585_s29 + $0x960] sm:$0xff]  ;;  %v1304_v23 = vld [vmem:[%s6585_s29 + $0x970] sm:$0xff] }
  0x5d   : > { %v1306_v24 = vld [vmem:[%s6585_s29 + $0x980] sm:$0xff]  ;;  %1303 = vst [vmem:[%s6593_s30 + $0x4b0] sm:$0xff] %v1302_v22  ;;  %1305 = vst [vmem:[%s6593_s30 + $0x4b8] sm:$0xff] %v1304_v23  ;;  %v1308_v25 = vld [vmem:[%s6585_s29 + $0x990] sm:$0xff] }
  0x5e   : > { %1307 = vst [vmem:[%s6593_s30 + $0x4c0] sm:$0xff] %v1306_v24  ;;  %v1310_v26 = vld [vmem:[%s6585_s29 + $0x9a0] sm:$0xff]  ;;  %v1312_v27 = vld [vmem:[%s6585_s29 + $0x9b0] sm:$0xff]  ;;  %1309 = vst [vmem:[%s6593_s30 + $0x4c8] sm:$0xff] %v1308_v25 }
  0x5f   : > { %1311 = vst [vmem:[%s6593_s30 + $0x4d0] sm:$0xff] %v1310_v26  ;;  %1313 = vst [vmem:[%s6593_s30 + $0x4d8] sm:$0xff] %v1312_v27  ;;  %v1314_v28 = vld [vmem:[%s6585_s29 + $0x9c0] sm:$0xff]  ;;  %v1316_v29 = vld [vmem:[%s6585_s29 + $0x9d0] sm:$0xff] }
  0x60   : > { %v1318_v30 = vld [vmem:[%s6585_s29 + $0x9e0] sm:$0xff]  ;;  %1315 = vst [vmem:[%s6593_s30 + $0x4e0] sm:$0xff] %v1314_v28  ;;  %1317 = vst [vmem:[%s6593_s30 + $0x4e8] sm:$0xff] %v1316_v29  ;;  %v1320_v31 = vld [vmem:[%s6585_s29 + $0x9f0] sm:$0xff] }
  0x61   : > { %1319 = vst [vmem:[%s6593_s30 + $0x4f0] sm:$0xff] %v1318_v30  ;;  %v1322_v32 = vld [vmem:[%s6585_s29 + $0xa00] sm:$0xff]  ;;  %v1324_v33 = vld [vmem:[%s6585_s29 + $0xa10] sm:$0xff]  ;;  %1321 = vst [vmem:[%s6593_s30 + $0x4f8] sm:$0xff] %v1320_v31 }
  0x62   : > { %1323 = vst [vmem:[%s6593_s30 + $0x500] sm:$0xff] %v1322_v32  ;;  %1325 = vst [vmem:[%s6593_s30 + $0x508] sm:$0xff] %v1324_v33  ;;  %v1326_v34 = vld [vmem:[%s6585_s29 + $0xa20] sm:$0xff]  ;;  %v1328_v35 = vld [vmem:[%s6585_s29 + $0xa30] sm:$0xff] }
  0x63   : > { %v1330_v36 = vld [vmem:[%s6585_s29 + $0xa40] sm:$0xff]  ;;  %1327 = vst [vmem:[%s6593_s30 + $0x510] sm:$0xff] %v1326_v34  ;;  %1329 = vst [vmem:[%s6593_s30 + $0x518] sm:$0xff] %v1328_v35  ;;  %v1332_v37 = vld [vmem:[%s6585_s29 + $0xa50] sm:$0xff] }
  0x64   : > { %1331 = vst [vmem:[%s6593_s30 + $0x520] sm:$0xff] %v1330_v36  ;;  %v1334_v38 = vld [vmem:[%s6585_s29 + $0xa60] sm:$0xff]  ;;  %v1336_v39 = vld [vmem:[%s6585_s29 + $0xa70] sm:$0xff]  ;;  %1333 = vst [vmem:[%s6593_s30 + $0x528] sm:$0xff] %v1332_v37 }
  0x65   : > { %1335 = vst [vmem:[%s6593_s30 + $0x530] sm:$0xff] %v1334_v38  ;;  %1337 = vst [vmem:[%s6593_s30 + $0x538] sm:$0xff] %v1336_v39  ;;  %v1338_v40 = vld [vmem:[%s6585_s29 + $0xa80] sm:$0xff]  ;;  %v1340_v41 = vld [vmem:[%s6585_s29 + $0xa90] sm:$0xff] }
  0x66   : > { %v1342_v42 = vld [vmem:[%s6585_s29 + $0xaa0] sm:$0xff]  ;;  %1339 = vst [vmem:[%s6593_s30 + $0x540] sm:$0xff] %v1338_v40  ;;  %1341 = vst [vmem:[%s6593_s30 + $0x548] sm:$0xff] %v1340_v41  ;;  %v1344_v43 = vld [vmem:[%s6585_s29 + $0xab0] sm:$0xff] }
  0x67   : > { %1343 = vst [vmem:[%s6593_s30 + $0x550] sm:$0xff] %v1342_v42  ;;  %v1346_v44 = vld [vmem:[%s6585_s29 + $0xac0] sm:$0xff]  ;;  %v1348_v45 = vld [vmem:[%s6585_s29 + $0xad0] sm:$0xff]  ;;  %1345 = vst [vmem:[%s6593_s30 + $0x558] sm:$0xff] %v1344_v43 }
  0x68   : > { %1347 = vst [vmem:[%s6593_s30 + $0x560] sm:$0xff] %v1346_v44  ;;  %1349 = vst [vmem:[%s6593_s30 + $0x568] sm:$0xff] %v1348_v45  ;;  %v1350_v46 = vld [vmem:[%s6585_s29 + $0xae0] sm:$0xff]  ;;  %v1352_v47 = vld [vmem:[%s6585_s29 + $0xaf0] sm:$0xff] }
  0x69   : > { %v1354_v48 = vld [vmem:[%s6585_s29 + $0xb00] sm:$0xff]  ;;  %1351 = vst [vmem:[%s6593_s30 + $0x570] sm:$0xff] %v1350_v46  ;;  %1353 = vst [vmem:[%s6593_s30 + $0x578] sm:$0xff] %v1352_v47  ;;  %v1356_v49 = vld [vmem:[%s6585_s29 + $0xb10] sm:$0xff] }
  0x6a   : > { %1355 = vst [vmem:[%s6593_s30 + $0x580] sm:$0xff] %v1354_v48  ;;  %v1358_v50 = vld [vmem:[%s6585_s29 + $0xb20] sm:$0xff]  ;;  %v1360_v51 = vld [vmem:[%s6585_s29 + $0xb30] sm:$0xff]  ;;  %1357 = vst [vmem:[%s6593_s30 + $0x588] sm:$0xff] %v1356_v49 }
  0x6b   : > { %1359 = vst [vmem:[%s6593_s30 + $0x590] sm:$0xff] %v1358_v50  ;;  %1361 = vst [vmem:[%s6593_s30 + $0x598] sm:$0xff] %v1360_v51  ;;  %v1362_v52 = vld [vmem:[%s6585_s29 + $0xb40] sm:$0xff]  ;;  %v1364_v53 = vld [vmem:[%s6585_s29 + $0xb50] sm:$0xff] }
  0x6c   : > { %v1366_v54 = vld [vmem:[%s6585_s29 + $0xb60] sm:$0xff]  ;;  %1363 = vst [vmem:[%s6593_s30 + $0x5a0] sm:$0xff] %v1362_v52  ;;  %1365 = vst [vmem:[%s6593_s30 + $0x5a8] sm:$0xff] %v1364_v53  ;;  %v1368_v55 = vld [vmem:[%s6585_s29 + $0xb70] sm:$0xff] }
  0x6d   : > { %1367 = vst [vmem:[%s6593_s30 + $0x5b0] sm:$0xff] %v1366_v54  ;;  %v1370_v56 = vld [vmem:[%s6585_s29 + $0xb80] sm:$0xff]  ;;  %v1372_v57 = vld [vmem:[%s6585_s29 + $0xb90] sm:$0xff]  ;;  %1369 = vst [vmem:[%s6593_s30 + $0x5b8] sm:$0xff] %v1368_v55 }
  0x6e   : > { %1371 = vst [vmem:[%s6593_s30 + $0x5c0] sm:$0xff] %v1370_v56  ;;  %1373 = vst [vmem:[%s6593_s30 + $0x5c8] sm:$0xff] %v1372_v57  ;;  %v1374_v58 = vld [vmem:[%s6585_s29 + $0xba0] sm:$0xff]  ;;  %v1376_v59 = vld [vmem:[%s6585_s29 + $0xbb0] sm:$0xff] }
  0x6f   : > { %v1378_v60 = vld [vmem:[%s6585_s29 + $0xbc0] sm:$0xff]  ;;  %1375 = vst [vmem:[%s6593_s30 + $0x5d0] sm:$0xff] %v1374_v58  ;;  %1377 = vst [vmem:[%s6593_s30 + $0x5d8] sm:$0xff] %v1376_v59  ;;  %v1380_v61 = vld [vmem:[%s6585_s29 + $0xbd0] sm:$0xff] }
  0x70   : > { %1379 = vst [vmem:[%s6593_s30 + $0x5e0] sm:$0xff] %v1378_v60  ;;  %v1382_v62 = vld [vmem:[%s6585_s29 + $0xbe0] sm:$0xff]  ;;  %v1384_v63 = vld [vmem:[%s6585_s29 + $0xbf0] sm:$0xff]  ;;  %1381 = vst [vmem:[%s6593_s30 + $0x5e8] sm:$0xff] %v1380_v61 }
  0x71   : > { %1383 = vst [vmem:[%s6593_s30 + $0x5f0] sm:$0xff] %v1382_v62  ;;  %1385 = vst [vmem:[%s6593_s30 + $0x5f8] sm:$0xff] %v1384_v63  ;;  %v1386_v0 = vld [vmem:[%s6585_s29 + $0xc00] sm:$0xff]  ;;  %v1388_v1 = vld [vmem:[%s6585_s29 + $0xc10] sm:$0xff] }
  0x72   : > { %v1390_v2 = vld [vmem:[%s6585_s29 + $0xc20] sm:$0xff]  ;;  %1387 = vst [vmem:[%s6593_s30 + $0x600] sm:$0xff] %v1386_v0  ;;  %1389 = vst [vmem:[%s6593_s30 + $0x608] sm:$0xff] %v1388_v1  ;;  %v1392_v3 = vld [vmem:[%s6585_s29 + $0xc30] sm:$0xff] }
  0x73   : > { %1391 = vst [vmem:[%s6593_s30 + $0x610] sm:$0xff] %v1390_v2  ;;  %v1394_v4 = vld [vmem:[%s6585_s29 + $0xc40] sm:$0xff]  ;;  %v1396_v5 = vld [vmem:[%s6585_s29 + $0xc50] sm:$0xff]  ;;  %1393 = vst [vmem:[%s6593_s30 + $0x618] sm:$0xff] %v1392_v3 }
  0x74   : > { %1395 = vst [vmem:[%s6593_s30 + $0x620] sm:$0xff] %v1394_v4  ;;  %1397 = vst [vmem:[%s6593_s30 + $0x628] sm:$0xff] %v1396_v5  ;;  %v1398_v6 = vld [vmem:[%s6585_s29 + $0xc60] sm:$0xff]  ;;  %v1400_v7 = vld [vmem:[%s6585_s29 + $0xc70] sm:$0xff] }
  0x75   : > { %v1402_v8 = vld [vmem:[%s6585_s29 + $0xc80] sm:$0xff]  ;;  %1399 = vst [vmem:[%s6593_s30 + $0x630] sm:$0xff] %v1398_v6  ;;  %1401 = vst [vmem:[%s6593_s30 + $0x638] sm:$0xff] %v1400_v7  ;;  %v1404_v9 = vld [vmem:[%s6585_s29 + $0xc90] sm:$0xff] }
  0x76   : > { %1403 = vst [vmem:[%s6593_s30 + $0x640] sm:$0xff] %v1402_v8  ;;  %v1406_v10 = vld [vmem:[%s6585_s29 + $0xca0] sm:$0xff]  ;;  %v1408_v11 = vld [vmem:[%s6585_s29 + $0xcb0] sm:$0xff]  ;;  %1405 = vst [vmem:[%s6593_s30 + $0x648] sm:$0xff] %v1404_v9 }
  0x77   : > { %1407 = vst [vmem:[%s6593_s30 + $0x650] sm:$0xff] %v1406_v10  ;;  %1409 = vst [vmem:[%s6593_s30 + $0x658] sm:$0xff] %v1408_v11  ;;  %v1410_v12 = vld [vmem:[%s6585_s29 + $0xcc0] sm:$0xff]  ;;  %v1412_v13 = vld [vmem:[%s6585_s29 + $0xcd0] sm:$0xff] }
  0x78   : > { %v1414_v14 = vld [vmem:[%s6585_s29 + $0xce0] sm:$0xff]  ;;  %1411 = vst [vmem:[%s6593_s30 + $0x660] sm:$0xff] %v1410_v12  ;;  %1413 = vst [vmem:[%s6593_s30 + $0x668] sm:$0xff] %v1412_v13  ;;  %v1416_v15 = vld [vmem:[%s6585_s29 + $0xcf0] sm:$0xff] }
  0x79   : > { %1415 = vst [vmem:[%s6593_s30 + $0x670] sm:$0xff] %v1414_v14  ;;  %v1418_v16 = vld [vmem:[%s6585_s29 + $0xd00] sm:$0xff]  ;;  %v1420_v17 = vld [vmem:[%s6585_s29 + $0xd10] sm:$0xff]  ;;  %1417 = vst [vmem:[%s6593_s30 + $0x678] sm:$0xff] %v1416_v15 }
  0x7a   : > { %1419 = vst [vmem:[%s6593_s30 + $0x680] sm:$0xff] %v1418_v16  ;;  %1421 = vst [vmem:[%s6593_s30 + $0x688] sm:$0xff] %v1420_v17  ;;  %v1422_v18 = vld [vmem:[%s6585_s29 + $0xd20] sm:$0xff]  ;;  %v1424_v19 = vld [vmem:[%s6585_s29 + $0xd30] sm:$0xff] }
  0x7b   : > { %v1426_v20 = vld [vmem:[%s6585_s29 + $0xd40] sm:$0xff]  ;;  %1423 = vst [vmem:[%s6593_s30 + $0x690] sm:$0xff] %v1422_v18  ;;  %1425 = vst [vmem:[%s6593_s30 + $0x698] sm:$0xff] %v1424_v19  ;;  %v1428_v21 = vld [vmem:[%s6585_s29 + $0xd50] sm:$0xff] }
  0x7c   : > { %1427 = vst [vmem:[%s6593_s30 + $0x6a0] sm:$0xff] %v1426_v20  ;;  %v1430_v22 = vld [vmem:[%s6585_s29 + $0xd60] sm:$0xff]  ;;  %v1432_v23 = vld [vmem:[%s6585_s29 + $0xd70] sm:$0xff]  ;;  %1429 = vst [vmem:[%s6593_s30 + $0x6a8] sm:$0xff] %v1428_v21 }
  0x7d   : > { %1431 = vst [vmem:[%s6593_s30 + $0x6b0] sm:$0xff] %v1430_v22  ;;  %1433 = vst [vmem:[%s6593_s30 + $0x6b8] sm:$0xff] %v1432_v23  ;;  %v1434_v24 = vld [vmem:[%s6585_s29 + $0xd80] sm:$0xff]  ;;  %v1436_v25 = vld [vmem:[%s6585_s29 + $0xd90] sm:$0xff] }
  0x7e   : > { %v1438_v26 = vld [vmem:[%s6585_s29 + $0xda0] sm:$0xff]  ;;  %1435 = vst [vmem:[%s6593_s30 + $0x6c0] sm:$0xff] %v1434_v24  ;;  %1437 = vst [vmem:[%s6593_s30 + $0x6c8] sm:$0xff] %v1436_v25  ;;  %v1440_v27 = vld [vmem:[%s6585_s29 + $0xdb0] sm:$0xff] }
  0x7f   : > { %1439 = vst [vmem:[%s6593_s30 + $0x6d0] sm:$0xff] %v1438_v26  ;;  %v1442_v28 = vld [vmem:[%s6585_s29 + $0xdc0] sm:$0xff]  ;;  %v1444_v29 = vld [vmem:[%s6585_s29 + $0xdd0] sm:$0xff]  ;;  %1441 = vst [vmem:[%s6593_s30 + $0x6d8] sm:$0xff] %v1440_v27 }
  0x80   : > { %1443 = vst [vmem:[%s6593_s30 + $0x6e0] sm:$0xff] %v1442_v28  ;;  %1445 = vst [vmem:[%s6593_s30 + $0x6e8] sm:$0xff] %v1444_v29  ;;  %v1446_v30 = vld [vmem:[%s6585_s29 + $0xde0] sm:$0xff]  ;;  %v1448_v31 = vld [vmem:[%s6585_s29 + $0xdf0] sm:$0xff] }
  0x81   : > { %v1450_v32 = vld [vmem:[%s6585_s29 + $0xe00] sm:$0xff]  ;;  %1447 = vst [vmem:[%s6593_s30 + $0x6f0] sm:$0xff] %v1446_v30  ;;  %1449 = vst [vmem:[%s6593_s30 + $0x6f8] sm:$0xff] %v1448_v31  ;;  %v1452_v33 = vld [vmem:[%s6585_s29 + $0xe10] sm:$0xff] }
  0x82   : > { %1451 = vst [vmem:[%s6593_s30 + $0x700] sm:$0xff] %v1450_v32  ;;  %v1454_v34 = vld [vmem:[%s6585_s29 + $0xe20] sm:$0xff]  ;;  %v1456_v35 = vld [vmem:[%s6585_s29 + $0xe30] sm:$0xff]  ;;  %1453 = vst [vmem:[%s6593_s30 + $0x708] sm:$0xff] %v1452_v33 }
  0x83   : > { %1455 = vst [vmem:[%s6593_s30 + $0x710] sm:$0xff] %v1454_v34  ;;  %1457 = vst [vmem:[%s6593_s30 + $0x718] sm:$0xff] %v1456_v35  ;;  %v1458_v36 = vld [vmem:[%s6585_s29 + $0xe40] sm:$0xff]  ;;  %v1460_v37 = vld [vmem:[%s6585_s29 + $0xe50] sm:$0xff] }
  0x84   : > { %v1462_v38 = vld [vmem:[%s6585_s29 + $0xe60] sm:$0xff]  ;;  %1459 = vst [vmem:[%s6593_s30 + $0x720] sm:$0xff] %v1458_v36  ;;  %1461 = vst [vmem:[%s6593_s30 + $0x728] sm:$0xff] %v1460_v37  ;;  %v1464_v39 = vld [vmem:[%s6585_s29 + $0xe70] sm:$0xff] }
  0x85   : > { %1463 = vst [vmem:[%s6593_s30 + $0x730] sm:$0xff] %v1462_v38  ;;  %v1466_v40 = vld [vmem:[%s6585_s29 + $0xe80] sm:$0xff]  ;;  %v1468_v41 = vld [vmem:[%s6585_s29 + $0xe90] sm:$0xff]  ;;  %1465 = vst [vmem:[%s6593_s30 + $0x738] sm:$0xff] %v1464_v39 }
  0x86   : > { %1467 = vst [vmem:[%s6593_s30 + $0x740] sm:$0xff] %v1466_v40  ;;  %1469 = vst [vmem:[%s6593_s30 + $0x748] sm:$0xff] %v1468_v41  ;;  %v1470_v42 = vld [vmem:[%s6585_s29 + $0xea0] sm:$0xff]  ;;  %v1472_v43 = vld [vmem:[%s6585_s29 + $0xeb0] sm:$0xff] }
  0x87   : > { %v1474_v44 = vld [vmem:[%s6585_s29 + $0xec0] sm:$0xff]  ;;  %1471 = vst [vmem:[%s6593_s30 + $0x750] sm:$0xff] %v1470_v42  ;;  %1473 = vst [vmem:[%s6593_s30 + $0x758] sm:$0xff] %v1472_v43  ;;  %v1476_v45 = vld [vmem:[%s6585_s29 + $0xed0] sm:$0xff] }
  0x88   : > { %1475 = vst [vmem:[%s6593_s30 + $0x760] sm:$0xff] %v1474_v44  ;;  %v1478_v46 = vld [vmem:[%s6585_s29 + $0xee0] sm:$0xff]  ;;  %v1480_v47 = vld [vmem:[%s6585_s29 + $0xef0] sm:$0xff]  ;;  %1477 = vst [vmem:[%s6593_s30 + $0x768] sm:$0xff] %v1476_v45 }
  0x89   : > { %1479 = vst [vmem:[%s6593_s30 + $0x770] sm:$0xff] %v1478_v46  ;;  %1481 = vst [vmem:[%s6593_s30 + $0x778] sm:$0xff] %v1480_v47  ;;  %v1482_v48 = vld [vmem:[%s6585_s29 + $0xf00] sm:$0xff]  ;;  %v1484_v49 = vld [vmem:[%s6585_s29 + $0xf10] sm:$0xff] }
  0x8a   : > { %v1486_v50 = vld [vmem:[%s6585_s29 + $0xf20] sm:$0xff]  ;;  %1483 = vst [vmem:[%s6593_s30 + $0x780] sm:$0xff] %v1482_v48  ;;  %1485 = vst [vmem:[%s6593_s30 + $0x788] sm:$0xff] %v1484_v49  ;;  %v1488_v51 = vld [vmem:[%s6585_s29 + $0xf30] sm:$0xff] }
  0x8b   : > { %1487 = vst [vmem:[%s6593_s30 + $0x790] sm:$0xff] %v1486_v50  ;;  %v1490_v52 = vld [vmem:[%s6585_s29 + $0xf40] sm:$0xff]  ;;  %v1492_v53 = vld [vmem:[%s6585_s29 + $0xf50] sm:$0xff]  ;;  %1489 = vst [vmem:[%s6593_s30 + $0x798] sm:$0xff] %v1488_v51 }
  0x8c   : > { %1491 = vst [vmem:[%s6593_s30 + $0x7a0] sm:$0xff] %v1490_v52  ;;  %1493 = vst [vmem:[%s6593_s30 + $0x7a8] sm:$0xff] %v1492_v53  ;;  %v1494_v54 = vld [vmem:[%s6585_s29 + $0xf60] sm:$0xff]  ;;  %v1496_v55 = vld [vmem:[%s6585_s29 + $0xf70] sm:$0xff] }
  0x8d   : > { %v1498_v56 = vld [vmem:[%s6585_s29 + $0xf80] sm:$0xff]  ;;  %1495 = vst [vmem:[%s6593_s30 + $0x7b0] sm:$0xff] %v1494_v54  ;;  %1497 = vst [vmem:[%s6593_s30 + $0x7b8] sm:$0xff] %v1496_v55  ;;  %v1500_v57 = vld [vmem:[%s6585_s29 + $0xf90] sm:$0xff] }
  0x8e   : > { %1499 = vst [vmem:[%s6593_s30 + $0x7c0] sm:$0xff] %v1498_v56  ;;  %v1502_v58 = vld [vmem:[%s6585_s29 + $0xfa0] sm:$0xff]  ;;  %v1504_v59 = vld [vmem:[%s6585_s29 + $0xfb0] sm:$0xff]  ;;  %1501 = vst [vmem:[%s6593_s30 + $0x7c8] sm:$0xff] %v1500_v57 }
  0x8f   : > { %1503 = vst [vmem:[%s6593_s30 + $0x7d0] sm:$0xff] %v1502_v58  ;;  %1505 = vst [vmem:[%s6593_s30 + $0x7d8] sm:$0xff] %v1504_v59  ;;  %v1506_v60 = vld [vmem:[%s6585_s29 + $0xfc0] sm:$0xff]  ;;  %v1508_v61 = vld [vmem:[%s6585_s29 + $0xfd0] sm:$0xff] }
  0x90   : > { %v1510_v62 = vld [vmem:[%s6585_s29 + $0xfe0] sm:$0xff]  ;;  %1507 = vst [vmem:[%s6593_s30 + $0x7e0] sm:$0xff] %v1506_v60  ;;  %1509 = vst [vmem:[%s6593_s30 + $0x7e8] sm:$0xff] %v1508_v61  ;;  %v1512_v63 = vld [vmem:[%s6585_s29 + $0xff0] sm:$0xff] }
  0x91   : > { %1511 = vst [vmem:[%s6593_s30 + $0x7f0] sm:$0xff] %v1510_v62  ;;  %v1514_v0 = vld [vmem:[%s6585_s29 + $0x1000] sm:$0xff]  ;;  %v1516_v1 = vld [vmem:[%s6585_s29 + $0x1010] sm:$0xff]  ;;  %1513 = vst [vmem:[%s6593_s30 + $0x7f8] sm:$0xff] %v1512_v63 }
  0x92   : > { %1515 = vst [vmem:[%s6593_s30 + $0x800] sm:$0xff] %v1514_v0  ;;  %1517 = vst [vmem:[%s6593_s30 + $0x808] sm:$0xff] %v1516_v1  ;;  %v1518_v2 = vld [vmem:[%s6585_s29 + $0x1020] sm:$0xff]  ;;  %v1520_v3 = vld [vmem:[%s6585_s29 + $0x1030] sm:$0xff] }
  0x93   : > { %v1522_v4 = vld [vmem:[%s6585_s29 + $0x1040] sm:$0xff]  ;;  %1519 = vst [vmem:[%s6593_s30 + $0x810] sm:$0xff] %v1518_v2  ;;  %1521 = vst [vmem:[%s6593_s30 + $0x818] sm:$0xff] %v1520_v3  ;;  %v1524_v5 = vld [vmem:[%s6585_s29 + $0x1050] sm:$0xff] }
  0x94   : > { %1523 = vst [vmem:[%s6593_s30 + $0x820] sm:$0xff] %v1522_v4  ;;  %v1526_v6 = vld [vmem:[%s6585_s29 + $0x1060] sm:$0xff]  ;;  %v1528_v7 = vld [vmem:[%s6585_s29 + $0x1070] sm:$0xff]  ;;  %1525 = vst [vmem:[%s6593_s30 + $0x828] sm:$0xff] %v1524_v5 }
  0x95   : > { %1527 = vst [vmem:[%s6593_s30 + $0x830] sm:$0xff] %v1526_v6  ;;  %1529 = vst [vmem:[%s6593_s30 + $0x838] sm:$0xff] %v1528_v7  ;;  %v1530_v8 = vld [vmem:[%s6585_s29 + $0x1080] sm:$0xff]  ;;  %v1532_v9 = vld [vmem:[%s6585_s29 + $0x1090] sm:$0xff] }
  0x96   : > { %v1534_v10 = vld [vmem:[%s6585_s29 + $0x10a0] sm:$0xff]  ;;  %1531 = vst [vmem:[%s6593_s30 + $0x840] sm:$0xff] %v1530_v8  ;;  %1533 = vst [vmem:[%s6593_s30 + $0x848] sm:$0xff] %v1532_v9  ;;  %v1536_v11 = vld [vmem:[%s6585_s29 + $0x10b0] sm:$0xff] }
  0x97   : > { %1535 = vst [vmem:[%s6593_s30 + $0x850] sm:$0xff] %v1534_v10  ;;  %v1538_v12 = vld [vmem:[%s6585_s29 + $0x10c0] sm:$0xff]  ;;  %v1540_v13 = vld [vmem:[%s6585_s29 + $0x10d0] sm:$0xff]  ;;  %1537 = vst [vmem:[%s6593_s30 + $0x858] sm:$0xff] %v1536_v11 }
  0x98   : > { %1539 = vst [vmem:[%s6593_s30 + $0x860] sm:$0xff] %v1538_v12  ;;  %1541 = vst [vmem:[%s6593_s30 + $0x868] sm:$0xff] %v1540_v13  ;;  %v1542_v14 = vld [vmem:[%s6585_s29 + $0x10e0] sm:$0xff]  ;;  %v1544_v15 = vld [vmem:[%s6585_s29 + $0x10f0] sm:$0xff] }
  0x99   : > { %v1546_v16 = vld [vmem:[%s6585_s29 + $0x1100] sm:$0xff]  ;;  %1543 = vst [vmem:[%s6593_s30 + $0x870] sm:$0xff] %v1542_v14  ;;  %1545 = vst [vmem:[%s6593_s30 + $0x878] sm:$0xff] %v1544_v15  ;;  %v1548_v17 = vld [vmem:[%s6585_s29 + $0x1110] sm:$0xff] }
  0x9a   : > { %1547 = vst [vmem:[%s6593_s30 + $0x880] sm:$0xff] %v1546_v16  ;;  %v1550_v18 = vld [vmem:[%s6585_s29 + $0x1120] sm:$0xff]  ;;  %v1552_v19 = vld [vmem:[%s6585_s29 + $0x1130] sm:$0xff]  ;;  %1549 = vst [vmem:[%s6593_s30 + $0x888] sm:$0xff] %v1548_v17 }
  0x9b   : > { %1551 = vst [vmem:[%s6593_s30 + $0x890] sm:$0xff] %v1550_v18  ;;  %1553 = vst [vmem:[%s6593_s30 + $0x898] sm:$0xff] %v1552_v19  ;;  %v1554_v20 = vld [vmem:[%s6585_s29 + $0x1140] sm:$0xff]  ;;  %v1556_v21 = vld [vmem:[%s6585_s29 + $0x1150] sm:$0xff] }
  0x9c   : > { %v1558_v22 = vld [vmem:[%s6585_s29 + $0x1160] sm:$0xff]  ;;  %1555 = vst [vmem:[%s6593_s30 + $0x8a0] sm:$0xff] %v1554_v20  ;;  %1557 = vst [vmem:[%s6593_s30 + $0x8a8] sm:$0xff] %v1556_v21  ;;  %v1560_v23 = vld [vmem:[%s6585_s29 + $0x1170] sm:$0xff] }
  0x9d   : > { %1559 = vst [vmem:[%s6593_s30 + $0x8b0] sm:$0xff] %v1558_v22  ;;  %v1562_v24 = vld [vmem:[%s6585_s29 + $0x1180] sm:$0xff]  ;;  %v1564_v25 = vld [vmem:[%s6585_s29 + $0x1190] sm:$0xff]  ;;  %1561 = vst [vmem:[%s6593_s30 + $0x8b8] sm:$0xff] %v1560_v23 }
  0x9e   : > { %1563 = vst [vmem:[%s6593_s30 + $0x8c0] sm:$0xff] %v1562_v24  ;;  %1565 = vst [vmem:[%s6593_s30 + $0x8c8] sm:$0xff] %v1564_v25  ;;  %v1566_v26 = vld [vmem:[%s6585_s29 + $0x11a0] sm:$0xff]  ;;  %v1568_v27 = vld [vmem:[%s6585_s29 + $0x11b0] sm:$0xff] }
  0x9f   : > { %v1570_v28 = vld [vmem:[%s6585_s29 + $0x11c0] sm:$0xff]  ;;  %1567 = vst [vmem:[%s6593_s30 + $0x8d0] sm:$0xff] %v1566_v26  ;;  %1569 = vst [vmem:[%s6593_s30 + $0x8d8] sm:$0xff] %v1568_v27  ;;  %v1572_v29 = vld [vmem:[%s6585_s29 + $0x11d0] sm:$0xff] }
  0xa0   : > { %1571 = vst [vmem:[%s6593_s30 + $0x8e0] sm:$0xff] %v1570_v28  ;;  %v1574_v30 = vld [vmem:[%s6585_s29 + $0x11e0] sm:$0xff]  ;;  %v1576_v31 = vld [vmem:[%s6585_s29 + $0x11f0] sm:$0xff]  ;;  %1573 = vst [vmem:[%s6593_s30 + $0x8e8] sm:$0xff] %v1572_v29 }
  0xa1   : > { %1575 = vst [vmem:[%s6593_s30 + $0x8f0] sm:$0xff] %v1574_v30  ;;  %1577 = vst [vmem:[%s6593_s30 + $0x8f8] sm:$0xff] %v1576_v31  ;;  %v1578_v32 = vld [vmem:[%s6585_s29 + $0x1200] sm:$0xff]  ;;  %v1580_v33 = vld [vmem:[%s6585_s29 + $0x1210] sm:$0xff] }
  0xa2   : > { %v1582_v34 = vld [vmem:[%s6585_s29 + $0x1220] sm:$0xff]  ;;  %1579 = vst [vmem:[%s6593_s30 + $0x900] sm:$0xff] %v1578_v32  ;;  %1581 = vst [vmem:[%s6593_s30 + $0x908] sm:$0xff] %v1580_v33  ;;  %v1584_v35 = vld [vmem:[%s6585_s29 + $0x1230] sm:$0xff] }
  0xa3   : > { %1583 = vst [vmem:[%s6593_s30 + $0x910] sm:$0xff] %v1582_v34  ;;  %v1586_v36 = vld [vmem:[%s6585_s29 + $0x1240] sm:$0xff]  ;;  %v1588_v37 = vld [vmem:[%s6585_s29 + $0x1250] sm:$0xff]  ;;  %1585 = vst [vmem:[%s6593_s30 + $0x918] sm:$0xff] %v1584_v35 }
  0xa4   : > { %1587 = vst [vmem:[%s6593_s30 + $0x920] sm:$0xff] %v1586_v36  ;;  %1589 = vst [vmem:[%s6593_s30 + $0x928] sm:$0xff] %v1588_v37  ;;  %v1590_v38 = vld [vmem:[%s6585_s29 + $0x1260] sm:$0xff]  ;;  %v1592_v39 = vld [vmem:[%s6585_s29 + $0x1270] sm:$0xff] }
  0xa5   : > { %v1594_v40 = vld [vmem:[%s6585_s29 + $0x1280] sm:$0xff]  ;;  %1591 = vst [vmem:[%s6593_s30 + $0x930] sm:$0xff] %v1590_v38  ;;  %1593 = vst [vmem:[%s6593_s30 + $0x938] sm:$0xff] %v1592_v39  ;;  %v1596_v41 = vld [vmem:[%s6585_s29 + $0x1290] sm:$0xff] }
  0xa6   : > { %1595 = vst [vmem:[%s6593_s30 + $0x940] sm:$0xff] %v1594_v40  ;;  %v1598_v42 = vld [vmem:[%s6585_s29 + $0x12a0] sm:$0xff]  ;;  %v1600_v43 = vld [vmem:[%s6585_s29 + $0x12b0] sm:$0xff]  ;;  %1597 = vst [vmem:[%s6593_s30 + $0x948] sm:$0xff] %v1596_v41 }
  0xa7   : > { %1599 = vst [vmem:[%s6593_s30 + $0x950] sm:$0xff] %v1598_v42  ;;  %1601 = vst [vmem:[%s6593_s30 + $0x958] sm:$0xff] %v1600_v43  ;;  %v1602_v44 = vld [vmem:[%s6585_s29 + $0x12c0] sm:$0xff]  ;;  %v1604_v45 = vld [vmem:[%s6585_s29 + $0x12d0] sm:$0xff] }
  0xa8   : > { %v1606_v46 = vld [vmem:[%s6585_s29 + $0x12e0] sm:$0xff]  ;;  %1603 = vst [vmem:[%s6593_s30 + $0x960] sm:$0xff] %v1602_v44  ;;  %1605 = vst [vmem:[%s6593_s30 + $0x968] sm:$0xff] %v1604_v45  ;;  %v1608_v47 = vld [vmem:[%s6585_s29 + $0x12f0] sm:$0xff] }
  0xa9   : > { %1607 = vst [vmem:[%s6593_s30 + $0x970] sm:$0xff] %v1606_v46  ;;  %v1610_v48 = vld [vmem:[%s6585_s29 + $0x1300] sm:$0xff]  ;;  %v1612_v49 = vld [vmem:[%s6585_s29 + $0x1310] sm:$0xff]  ;;  %1609 = vst [vmem:[%s6593_s30 + $0x978] sm:$0xff] %v1608_v47 }
  0xaa   : > { %1611 = vst [vmem:[%s6593_s30 + $0x980] sm:$0xff] %v1610_v48  ;;  %1613 = vst [vmem:[%s6593_s30 + $0x988] sm:$0xff] %v1612_v49  ;;  %v1614_v50 = vld [vmem:[%s6585_s29 + $0x1320] sm:$0xff]  ;;  %v1616_v51 = vld [vmem:[%s6585_s29 + $0x1330] sm:$0xff] }
  0xab   : > { %v1618_v52 = vld [vmem:[%s6585_s29 + $0x1340] sm:$0xff]  ;;  %1615 = vst [vmem:[%s6593_s30 + $0x990] sm:$0xff] %v1614_v50  ;;  %1617 = vst [vmem:[%s6593_s30 + $0x998] sm:$0xff] %v1616_v51  ;;  %v1620_v53 = vld [vmem:[%s6585_s29 + $0x1350] sm:$0xff] }
  0xac   : > { %1619 = vst [vmem:[%s6593_s30 + $0x9a0] sm:$0xff] %v1618_v52  ;;  %v1622_v54 = vld [vmem:[%s6585_s29 + $0x1360] sm:$0xff]  ;;  %v1624_v55 = vld [vmem:[%s6585_s29 + $0x1370] sm:$0xff]  ;;  %1621 = vst [vmem:[%s6593_s30 + $0x9a8] sm:$0xff] %v1620_v53 }
  0xad   : > { %1623 = vst [vmem:[%s6593_s30 + $0x9b0] sm:$0xff] %v1622_v54  ;;  %1625 = vst [vmem:[%s6593_s30 + $0x9b8] sm:$0xff] %v1624_v55  ;;  %v1626_v56 = vld [vmem:[%s6585_s29 + $0x1380] sm:$0xff]  ;;  %v1628_v57 = vld [vmem:[%s6585_s29 + $0x1390] sm:$0xff] }
  0xae   : > { %v1630_v58 = vld [vmem:[%s6585_s29 + $0x13a0] sm:$0xff]  ;;  %1627 = vst [vmem:[%s6593_s30 + $0x9c0] sm:$0xff] %v1626_v56  ;;  %1629 = vst [vmem:[%s6593_s30 + $0x9c8] sm:$0xff] %v1628_v57  ;;  %v1632_v59 = vld [vmem:[%s6585_s29 + $0x13b0] sm:$0xff] }
  0xaf   : > { %1631 = vst [vmem:[%s6593_s30 + $0x9d0] sm:$0xff] %v1630_v58  ;;  %v1634_v60 = vld [vmem:[%s6585_s29 + $0x13c0] sm:$0xff]  ;;  %v1636_v61 = vld [vmem:[%s6585_s29 + $0x13d0] sm:$0xff]  ;;  %1633 = vst [vmem:[%s6593_s30 + $0x9d8] sm:$0xff] %v1632_v59 }
  0xb0   : > { %1635 = vst [vmem:[%s6593_s30 + $0x9e0] sm:$0xff] %v1634_v60  ;;  %1637 = vst [vmem:[%s6593_s30 + $0x9e8] sm:$0xff] %v1636_v61  ;;  %v1638_v62 = vld [vmem:[%s6585_s29 + $0x13e0] sm:$0xff]  ;;  %v1640_v63 = vld [vmem:[%s6585_s29 + $0x13f0] sm:$0xff] }
  0xb1   : > { %v1642_v0 = vld [vmem:[%s6585_s29 + $0x1400] sm:$0xff]  ;;  %1639 = vst [vmem:[%s6593_s30 + $0x9f0] sm:$0xff] %v1638_v62  ;;  %1641 = vst [vmem:[%s6593_s30 + $0x9f8] sm:$0xff] %v1640_v63  ;;  %v1644_v1 = vld [vmem:[%s6585_s29 + $0x1410] sm:$0xff] }
  0xb2   : > { %1643 = vst [vmem:[%s6593_s30 + $0xa00] sm:$0xff] %v1642_v0  ;;  %v1646_v2 = vld [vmem:[%s6585_s29 + $0x1420] sm:$0xff]  ;;  %v1648_v3 = vld [vmem:[%s6585_s29 + $0x1430] sm:$0xff]  ;;  %1645 = vst [vmem:[%s6593_s30 + $0xa08] sm:$0xff] %v1644_v1 }
  0xb3   : > { %1647 = vst [vmem:[%s6593_s30 + $0xa10] sm:$0xff] %v1646_v2  ;;  %1649 = vst [vmem:[%s6593_s30 + $0xa18] sm:$0xff] %v1648_v3  ;;  %v1650_v4 = vld [vmem:[%s6585_s29 + $0x1440] sm:$0xff]  ;;  %v1652_v5 = vld [vmem:[%s6585_s29 + $0x1450] sm:$0xff] }
  0xb4   : > { %v1654_v6 = vld [vmem:[%s6585_s29 + $0x1460] sm:$0xff]  ;;  %1651 = vst [vmem:[%s6593_s30 + $0xa20] sm:$0xff] %v1650_v4  ;;  %1653 = vst [vmem:[%s6593_s30 + $0xa28] sm:$0xff] %v1652_v5  ;;  %v1656_v7 = vld [vmem:[%s6585_s29 + $0x1470] sm:$0xff] }
  0xb5   : > { %1655 = vst [vmem:[%s6593_s30 + $0xa30] sm:$0xff] %v1654_v6  ;;  %v1658_v8 = vld [vmem:[%s6585_s29 + $0x1480] sm:$0xff]  ;;  %v1660_v9 = vld [vmem:[%s6585_s29 + $0x1490] sm:$0xff]  ;;  %1657 = vst [vmem:[%s6593_s30 + $0xa38] sm:$0xff] %v1656_v7 }
  0xb6   : > { %1659 = vst [vmem:[%s6593_s30 + $0xa40] sm:$0xff] %v1658_v8  ;;  %1661 = vst [vmem:[%s6593_s30 + $0xa48] sm:$0xff] %v1660_v9  ;;  %v1662_v10 = vld [vmem:[%s6585_s29 + $0x14a0] sm:$0xff]  ;;  %v1664_v11 = vld [vmem:[%s6585_s29 + $0x14b0] sm:$0xff] }
  0xb7   : > { %v1666_v12 = vld [vmem:[%s6585_s29 + $0x14c0] sm:$0xff]  ;;  %1663 = vst [vmem:[%s6593_s30 + $0xa50] sm:$0xff] %v1662_v10  ;;  %1665 = vst [vmem:[%s6593_s30 + $0xa58] sm:$0xff] %v1664_v11  ;;  %v1668_v13 = vld [vmem:[%s6585_s29 + $0x14d0] sm:$0xff] }
  0xb8   : > { %1667 = vst [vmem:[%s6593_s30 + $0xa60] sm:$0xff] %v1666_v12  ;;  %v1670_v14 = vld [vmem:[%s6585_s29 + $0x14e0] sm:$0xff]  ;;  %v1672_v15 = vld [vmem:[%s6585_s29 + $0x14f0] sm:$0xff]  ;;  %1669 = vst [vmem:[%s6593_s30 + $0xa68] sm:$0xff] %v1668_v13 }
  0xb9   : > { %1671 = vst [vmem:[%s6593_s30 + $0xa70] sm:$0xff] %v1670_v14  ;;  %1673 = vst [vmem:[%s6593_s30 + $0xa78] sm:$0xff] %v1672_v15  ;;  %v1674_v16 = vld [vmem:[%s6585_s29 + $0x1500] sm:$0xff]  ;;  %v1676_v17 = vld [vmem:[%s6585_s29 + $0x1510] sm:$0xff] }
  0xba   : > { %v1678_v18 = vld [vmem:[%s6585_s29 + $0x1520] sm:$0xff]  ;;  %1675 = vst [vmem:[%s6593_s30 + $0xa80] sm:$0xff] %v1674_v16  ;;  %1677 = vst [vmem:[%s6593_s30 + $0xa88] sm:$0xff] %v1676_v17  ;;  %v1680_v19 = vld [vmem:[%s6585_s29 + $0x1530] sm:$0xff] }
  0xbb   : > { %1679 = vst [vmem:[%s6593_s30 + $0xa90] sm:$0xff] %v1678_v18  ;;  %v1682_v20 = vld [vmem:[%s6585_s29 + $0x1540] sm:$0xff]  ;;  %v1684_v21 = vld [vmem:[%s6585_s29 + $0x1550] sm:$0xff]  ;;  %1681 = vst [vmem:[%s6593_s30 + $0xa98] sm:$0xff] %v1680_v19 }
  0xbc   : > { %1683 = vst [vmem:[%s6593_s30 + $0xaa0] sm:$0xff] %v1682_v20  ;;  %1685 = vst [vmem:[%s6593_s30 + $0xaa8] sm:$0xff] %v1684_v21  ;;  %v1686_v22 = vld [vmem:[%s6585_s29 + $0x1560] sm:$0xff]  ;;  %v1688_v23 = vld [vmem:[%s6585_s29 + $0x1570] sm:$0xff] }
  0xbd   : > { %v1690_v24 = vld [vmem:[%s6585_s29 + $0x1580] sm:$0xff]  ;;  %1687 = vst [vmem:[%s6593_s30 + $0xab0] sm:$0xff] %v1686_v22  ;;  %1689 = vst [vmem:[%s6593_s30 + $0xab8] sm:$0xff] %v1688_v23  ;;  %v1692_v25 = vld [vmem:[%s6585_s29 + $0x1590] sm:$0xff] }
  0xbe   : > { %1691 = vst [vmem:[%s6593_s30 + $0xac0] sm:$0xff] %v1690_v24  ;;  %v1694_v26 = vld [vmem:[%s6585_s29 + $0x15a0] sm:$0xff]  ;;  %v1696_v27 = vld [vmem:[%s6585_s29 + $0x15b0] sm:$0xff]  ;;  %1693 = vst [vmem:[%s6593_s30 + $0xac8] sm:$0xff] %v1692_v25 }
  0xbf   : > { %1695 = vst [vmem:[%s6593_s30 + $0xad0] sm:$0xff] %v1694_v26  ;;  %1697 = vst [vmem:[%s6593_s30 + $0xad8] sm:$0xff] %v1696_v27  ;;  %v1698_v28 = vld [vmem:[%s6585_s29 + $0x15c0] sm:$0xff]  ;;  %v1700_v29 = vld [vmem:[%s6585_s29 + $0x15d0] sm:$0xff] }
  0xc0   : > { %v1702_v30 = vld [vmem:[%s6585_s29 + $0x15e0] sm:$0xff]  ;;  %1699 = vst [vmem:[%s6593_s30 + $0xae0] sm:$0xff] %v1698_v28  ;;  %1701 = vst [vmem:[%s6593_s30 + $0xae8] sm:$0xff] %v1700_v29  ;;  %v1704_v31 = vld [vmem:[%s6585_s29 + $0x15f0] sm:$0xff] }
  0xc1   : > { %1703 = vst [vmem:[%s6593_s30 + $0xaf0] sm:$0xff] %v1702_v30  ;;  %v1706_v32 = vld [vmem:[%s6585_s29 + $0x1600] sm:$0xff]  ;;  %v1708_v33 = vld [vmem:[%s6585_s29 + $0x1610] sm:$0xff]  ;;  %1705 = vst [vmem:[%s6593_s30 + $0xaf8] sm:$0xff] %v1704_v31 }
  0xc2   : > { %1707 = vst [vmem:[%s6593_s30 + $0xb00] sm:$0xff] %v1706_v32  ;;  %1709 = vst [vmem:[%s6593_s30 + $0xb08] sm:$0xff] %v1708_v33  ;;  %v1710_v34 = vld [vmem:[%s6585_s29 + $0x1620] sm:$0xff]  ;;  %v1712_v35 = vld [vmem:[%s6585_s29 + $0x1630] sm:$0xff] }
  0xc3   : > { %v1714_v36 = vld [vmem:[%s6585_s29 + $0x1640] sm:$0xff]  ;;  %1711 = vst [vmem:[%s6593_s30 + $0xb10] sm:$0xff] %v1710_v34  ;;  %1713 = vst [vmem:[%s6593_s30 + $0xb18] sm:$0xff] %v1712_v35  ;;  %v1716_v37 = vld [vmem:[%s6585_s29 + $0x1650] sm:$0xff] }
  0xc4   : > { %1715 = vst [vmem:[%s6593_s30 + $0xb20] sm:$0xff] %v1714_v36  ;;  %v1718_v38 = vld [vmem:[%s6585_s29 + $0x1660] sm:$0xff]  ;;  %v1720_v39 = vld [vmem:[%s6585_s29 + $0x1670] sm:$0xff]  ;;  %1717 = vst [vmem:[%s6593_s30 + $0xb28] sm:$0xff] %v1716_v37 }
  0xc5   : > { %1719 = vst [vmem:[%s6593_s30 + $0xb30] sm:$0xff] %v1718_v38  ;;  %1721 = vst [vmem:[%s6593_s30 + $0xb38] sm:$0xff] %v1720_v39  ;;  %v1722_v40 = vld [vmem:[%s6585_s29 + $0x1680] sm:$0xff]  ;;  %v1724_v41 = vld [vmem:[%s6585_s29 + $0x1690] sm:$0xff] }
  0xc6   : > { %v1726_v42 = vld [vmem:[%s6585_s29 + $0x16a0] sm:$0xff]  ;;  %1723 = vst [vmem:[%s6593_s30 + $0xb40] sm:$0xff] %v1722_v40  ;;  %1725 = vst [vmem:[%s6593_s30 + $0xb48] sm:$0xff] %v1724_v41  ;;  %v1728_v43 = vld [vmem:[%s6585_s29 + $0x16b0] sm:$0xff] }
  0xc7   : > { %1727 = vst [vmem:[%s6593_s30 + $0xb50] sm:$0xff] %v1726_v42  ;;  %v1730_v44 = vld [vmem:[%s6585_s29 + $0x16c0] sm:$0xff]  ;;  %v1732_v45 = vld [vmem:[%s6585_s29 + $0x16d0] sm:$0xff]  ;;  %1729 = vst [vmem:[%s6593_s30 + $0xb58] sm:$0xff] %v1728_v43 }
  0xc8   : > { %1731 = vst [vmem:[%s6593_s30 + $0xb60] sm:$0xff] %v1730_v44  ;;  %1733 = vst [vmem:[%s6593_s30 + $0xb68] sm:$0xff] %v1732_v45  ;;  %v1734_v46 = vld [vmem:[%s6585_s29 + $0x16e0] sm:$0xff]  ;;  %v1736_v47 = vld [vmem:[%s6585_s29 + $0x16f0] sm:$0xff] }
  0xc9   : > { %v1738_v48 = vld [vmem:[%s6585_s29 + $0x1700] sm:$0xff]  ;;  %1735 = vst [vmem:[%s6593_s30 + $0xb70] sm:$0xff] %v1734_v46  ;;  %1737 = vst [vmem:[%s6593_s30 + $0xb78] sm:$0xff] %v1736_v47  ;;  %v1740_v49 = vld [vmem:[%s6585_s29 + $0x1710] sm:$0xff] }
  0xca   : > { %1739 = vst [vmem:[%s6593_s30 + $0xb80] sm:$0xff] %v1738_v48  ;;  %v1742_v50 = vld [vmem:[%s6585_s29 + $0x1720] sm:$0xff]  ;;  %v1744_v51 = vld [vmem:[%s6585_s29 + $0x1730] sm:$0xff]  ;;  %1741 = vst [vmem:[%s6593_s30 + $0xb88] sm:$0xff] %v1740_v49 }
  0xcb   : > { %1743 = vst [vmem:[%s6593_s30 + $0xb90] sm:$0xff] %v1742_v50  ;;  %1745 = vst [vmem:[%s6593_s30 + $0xb98] sm:$0xff] %v1744_v51  ;;  %v1746_v52 = vld [vmem:[%s6585_s29 + $0x1740] sm:$0xff]  ;;  %v1748_v53 = vld [vmem:[%s6585_s29 + $0x1750] sm:$0xff] }
  0xcc   : > { %v1750_v54 = vld [vmem:[%s6585_s29 + $0x1760] sm:$0xff]  ;;  %1747 = vst [vmem:[%s6593_s30 + $0xba0] sm:$0xff] %v1746_v52  ;;  %1749 = vst [vmem:[%s6593_s30 + $0xba8] sm:$0xff] %v1748_v53  ;;  %v1752_v55 = vld [vmem:[%s6585_s29 + $0x1770] sm:$0xff] }
  0xcd   : > { %1751 = vst [vmem:[%s6593_s30 + $0xbb0] sm:$0xff] %v1750_v54  ;;  %v1754_v56 = vld [vmem:[%s6585_s29 + $0x1780] sm:$0xff]  ;;  %v1756_v57 = vld [vmem:[%s6585_s29 + $0x1790] sm:$0xff]  ;;  %1753 = vst [vmem:[%s6593_s30 + $0xbb8] sm:$0xff] %v1752_v55 }
  0xce   : > { %1755 = vst [vmem:[%s6593_s30 + $0xbc0] sm:$0xff] %v1754_v56  ;;  %1757 = vst [vmem:[%s6593_s30 + $0xbc8] sm:$0xff] %v1756_v57  ;;  %v1758_v58 = vld [vmem:[%s6585_s29 + $0x17a0] sm:$0xff]  ;;  %v1760_v59 = vld [vmem:[%s6585_s29 + $0x17b0] sm:$0xff] }
  0xcf   : > { %v1762_v60 = vld [vmem:[%s6585_s29 + $0x17c0] sm:$0xff]  ;;  %1759 = vst [vmem:[%s6593_s30 + $0xbd0] sm:$0xff] %v1758_v58  ;;  %1761 = vst [vmem:[%s6593_s30 + $0xbd8] sm:$0xff] %v1760_v59  ;;  %v1764_v61 = vld [vmem:[%s6585_s29 + $0x17d0] sm:$0xff] }
  0xd0   : > { %1763 = vst [vmem:[%s6593_s30 + $0xbe0] sm:$0xff] %v1762_v60  ;;  %v1766_v62 = vld [vmem:[%s6585_s29 + $0x17e0] sm:$0xff]  ;;  %v1768_v63 = vld [vmem:[%s6585_s29 + $0x17f0] sm:$0xff]  ;;  %1765 = vst [vmem:[%s6593_s30 + $0xbe8] sm:$0xff] %v1764_v61 }
  0xd1   : > { %1767 = vst [vmem:[%s6593_s30 + $0xbf0] sm:$0xff] %v1766_v62  ;;  %1769 = vst [vmem:[%s6593_s30 + $0xbf8] sm:$0xff] %v1768_v63  ;;  %v1770_v0 = vld [vmem:[%s6585_s29 + $0x1800] sm:$0xff]  ;;  %v1772_v1 = vld [vmem:[%s6585_s29 + $0x1810] sm:$0xff] }
  0xd2   : > { %v1774_v2 = vld [vmem:[%s6585_s29 + $0x1820] sm:$0xff]  ;;  %1771 = vst [vmem:[%s6593_s30 + $0xc00] sm:$0xff] %v1770_v0  ;;  %1773 = vst [vmem:[%s6593_s30 + $0xc08] sm:$0xff] %v1772_v1  ;;  %v1776_v3 = vld [vmem:[%s6585_s29 + $0x1830] sm:$0xff] }
  0xd3   : > { %1775 = vst [vmem:[%s6593_s30 + $0xc10] sm:$0xff] %v1774_v2  ;;  %v1778_v4 = vld [vmem:[%s6585_s29 + $0x1840] sm:$0xff]  ;;  %v1780_v5 = vld [vmem:[%s6585_s29 + $0x1850] sm:$0xff]  ;;  %1777 = vst [vmem:[%s6593_s30 + $0xc18] sm:$0xff] %v1776_v3 }
  0xd4   : > { %1779 = vst [vmem:[%s6593_s30 + $0xc20] sm:$0xff] %v1778_v4  ;;  %1781 = vst [vmem:[%s6593_s30 + $0xc28] sm:$0xff] %v1780_v5  ;;  %v1782_v6 = vld [vmem:[%s6585_s29 + $0x1860] sm:$0xff]  ;;  %v1784_v7 = vld [vmem:[%s6585_s29 + $0x1870] sm:$0xff] }
  0xd5   : > { %1783 = vst [vmem:[%s6593_s30 + $0xc30] sm:$0xff] %v1782_v6  ;;  %1785 = vst [vmem:[%s6593_s30 + $0xc38] sm:$0xff] %v1784_v7 }
  0xd6 PF: > { %p5274_p6 = scmp.ge.s32.totalorder %s6514_s19, 1  ;;  %p1807_p7 = scmp.lt.s32.totalorder %s6514_s19, 3 }
  0xd8   : > { %p1808_p8 = pnand %p5274_p6, %p1807_p7 }
  0xd9   : > { %s1814_s5 = sand.u32 (!%p1808_p8), 1, %s6498_s15   ;;  %v5933_v8 = vld [vmem:[%s7891_s0 + $0x4] ss:$100 sps:$4 sm:$0xff] (!%p1808_p8)   ;;  %v5939_v9 = vld [vmem:[%s7891_s0 + $0x34] ss:$100 sps:$4 sm:$0xff] (!%p1808_p8)   ;;  %vm4403_vm0 = vcmask (!%p1808_p8), 523264  }
  0xda   : > { %1811 = sbr.rel (%p1808_p8) target bundleno = 1064 (0x428), region = 70  ;;  %4439 = vmatprep.mubr.bf16.mxu1 (!%p1808_p8), %v5933_v8  ;;  %4697 = vmatprep.mubr.bf16.mxu0 (!%p1808_p8), %v5939_v9  ;;  %p1878_p11 = scmp.lt.s32.totalorder (!%p1808_p8), %s6506_s17, 1  ;;  %vm5141_vm1 = vcmask (!%p1808_p8), 48128  }
  0xdb   : > { %s5793_s6 = smul.u32 (!%p1808_p8), 3136, %s1814_s5  ;;  %s5276_s5 = sshll.u32 (!%p1808_p8), %s6506_s17, 5 }
  0xdc   : > { %p1872_p9 = scmp.lt.s32.totalorder (!%p1808_p8), %s5276_s5, 63 }
  0xdd   : > { %s7382_s11 = scalar_lea.vmem (!%p1808_p8), [#allocation2], %s5793_s6 }
  0xde   : > { %v5835_v10 = vld [vmem:[%s7382_s11 + $0x4] ss:$8 sps:$4 sm:$0xff] (!%p1808_p8)   ;;  %v5839_v12 = vld [vmem:[%s7382_s11] ss:$8 sps:$4 sm:$0xff] (!%p1808_p8)   ;;  %v5841_v14 = vld [vmem:[%s7382_s11 + $0x14] ss:$8 sps:$4 sm:$0xff] (!%p1808_p8)  }
  0xdf   : > { %v5837_v11 = vld [vmem:[%s7382_s11 + $0x604] ss:$8 sps:$4 sm:$0xff] (!%p1808_p8)   ;;  %4407 = vmatprep.subr.bf16.mxu1 (!%p1808_p8), %v5835_v10  ;;  %v5840_v13 = vld [vmem:[%s7382_s11 + $0x600] ss:$8 sps:$4 sm:$0xff] (!%p1808_p8)   ;;  %v5843_v15 = vld [vmem:[%s7382_s11 + $0x614] ss:$8 sps:$4 sm:$0xff] (!%p1808_p8)  }
  0xe0   : > { %4665 = vmatprep.subr.bf16.mxu0 (!%p1808_p8), %v5837_v11  ;;  %4408 = vmatpush1.bf16.msra.mxu1 (!%p1808_p8), %v5839_v12  ;;  %v5845_v16 = vld [vmem:[%s7382_s11 + $0x10] ss:$8 sps:$4 sm:$0xff] (!%p1808_p8)   ;;  %v5847_v18 = vld [vmem:[%s7382_s11 + $0x24] ss:$8 sps:$4 sm:$0xff] (!%p1808_p8)   ;;  %v5851_v20 = vld [vmem:[%s7382_s11 + $0x20] ss:$8 sps:$4 sm:$0xff] (!%p1808_p8)  }
  0xe1   : > { %4666 = vmatpush1.bf16.msra.mxu0 %v5840_v13  ;;  %4409 = vmatprep.subr.bf16.mxu1 %v5841_v14  ;;  %v5846_v17 = vld [vmem:[%s7382_s11 + $0x610] ss:$8 sps:$4 sm:$0xff]   ;;  %v5849_v19 = vld [vmem:[%s7382_s11 + $0x624] ss:$8 sps:$4 sm:$0xff]   ;;  %v5852_v21 = vld [vmem:[%s7382_s11 + $0x620] ss:$8 sps:$4 sm:$0xff]  }
  0xe2   : > { %4667 = vmatprep.subr.bf16.mxu0 %v5843_v15  ;;  %v5853_v22 = vld [vmem:[%s7382_s11 + $0x34] ss:$8 sps:$4 sm:$0xff]   ;;  %v5857_v24 = vld [vmem:[%s7382_s11 + $0x30] ss:$8 sps:$4 sm:$0xff]   ;;  %v5859_v26 = vld [vmem:[%s7382_s11 + $0x44] ss:$8 sps:$4 sm:$0xff]  }
  0xe3   : > { %v5855_v23 = vld [vmem:[%s7382_s11 + $0x634] ss:$8 sps:$4 sm:$0xff]   ;;  %v5858_v25 = vld [vmem:[%s7382_s11 + $0x630] ss:$8 sps:$4 sm:$0xff]   ;;  %v5861_v27 = vld [vmem:[%s7382_s11 + $0x644] ss:$8 sps:$4 sm:$0xff]  }
  0xe4   : > { %4410 = vmatpush1.bf16.msra.mxu1 %v5845_v16  ;;  %v5863_v28 = vld [vmem:[%s7382_s11 + $0x40] ss:$8 sps:$4 sm:$0xff]   ;;  %v5865_v30 = vld [vmem:[%s7382_s11 + $0x54] ss:$8 sps:$4 sm:$0xff]   ;;  %v5869_v32 = vld [vmem:[%s7382_s11 + $0x50] ss:$8 sps:$4 sm:$0xff]  }
  0xe5   : > { %4668 = vmatpush1.bf16.msra.mxu0 %v5846_v17  ;;  %4411 = vmatprep.subr.bf16.mxu1 %v5847_v18  ;;  %v5864_v29 = vld [vmem:[%s7382_s11 + $0x640] ss:$8 sps:$4 sm:$0xff]   ;;  %v5867_v31 = vld [vmem:[%s7382_s11 + $0x654] ss:$8 sps:$4 sm:$0xff]   ;;  %v5870_v33 = vld [vmem:[%s7382_s11 + $0x650] ss:$8 sps:$4 sm:$0xff]  }
  0xe6   : > { %4669 = vmatprep.subr.bf16.mxu0 %v5849_v19  ;;  %v5871_v34 = vld [vmem:[%s7382_s11 + $0x64] ss:$8 sps:$4 sm:$0xff]   ;;  %v5875_v36 = vld [vmem:[%s7382_s11 + $0x60] ss:$8 sps:$4 sm:$0xff]   ;;  %v5877_v38 = vld [vmem:[%s7382_s11 + $0x74] ss:$8 sps:$4 sm:$0xff]  }
  0xe7   : > { %v5873_v35 = vld [vmem:[%s7382_s11 + $0x664] ss:$8 sps:$4 sm:$0xff]   ;;  %v5876_v37 = vld [vmem:[%s7382_s11 + $0x660] ss:$8 sps:$4 sm:$0xff]   ;;  %v5879_v39 = vld [vmem:[%s7382_s11 + $0x674] ss:$8 sps:$4 sm:$0xff]  }
  0xe8   : > { %4412 = vmatpush1.bf16.msra.mxu1 %v5851_v20  ;;  %v5881_v40 = vld [vmem:[%s7382_s11 + $0x70] ss:$8 sps:$4 sm:$0xff]   ;;  %v5883_v42 = vld [vmem:[%s7382_s11 + $0x84] ss:$8 sps:$4 sm:$0xff]   ;;  %v5887_v44 = vld [vmem:[%s7382_s11 + $0x80] ss:$8 sps:$4 sm:$0xff]  }
  0xe9   : > { %4670 = vmatpush1.bf16.msra.mxu0 %v5852_v21  ;;  %4413 = vmatprep.subr.bf16.mxu1 %v5853_v22  ;;  %v5882_v41 = vld [vmem:[%s7382_s11 + $0x670] ss:$8 sps:$4 sm:$0xff]   ;;  %v5885_v43 = vld [vmem:[%s7382_s11 + $0x684] ss:$8 sps:$4 sm:$0xff]   ;;  %v5888_v45 = vld [vmem:[%s7382_s11 + $0x680] ss:$8 sps:$4 sm:$0xff]  }
  0xea   : > { %4671 = vmatprep.subr.bf16.mxu0 %v5855_v23  ;;  %v5889_v46 = vld [vmem:[%s7382_s11 + $0x94] ss:$8 sps:$4 sm:$0xff]   ;;  %v5893_v48 = vld [vmem:[%s7382_s11 + $0x90] ss:$8 sps:$4 sm:$0xff]   ;;  %v5895_v50 = vld [vmem:[%s7382_s11 + $0xa4] ss:$8 sps:$4 sm:$0xff]  }
  0xeb   : > { %v5891_v47 = vld [vmem:[%s7382_s11 + $0x694] ss:$8 sps:$4 sm:$0xff]   ;;  %v5894_v49 = vld [vmem:[%s7382_s11 + $0x690] ss:$8 sps:$4 sm:$0xff]   ;;  %v5897_v51 = vld [vmem:[%s7382_s11 + $0x6a4] ss:$8 sps:$4 sm:$0xff]  }
  0xec   : > { %4414 = vmatpush1.bf16.msra.mxu1 %v5857_v24  ;;  %v5899_v52 = vld [vmem:[%s7382_s11 + $0xa0] ss:$8 sps:$4 sm:$0xff]   ;;  %v5901_v54 = vld [vmem:[%s7382_s11 + $0xb4] ss:$8 sps:$4 sm:$0xff]   ;;  %v5905_v56 = vld [vmem:[%s7382_s11 + $0xb0] ss:$8 sps:$4 sm:$0xff]  }
  0xed   : > { %4672 = vmatpush1.bf16.msra.mxu0 %v5858_v25  ;;  %4415 = vmatprep.subr.bf16.mxu1 %v5859_v26  ;;  %v5900_v53 = vld [vmem:[%s7382_s11 + $0x6a0] ss:$8 sps:$4 sm:$0xff]   ;;  %v5903_v55 = vld [vmem:[%s7382_s11 + $0x6b4] ss:$8 sps:$4 sm:$0xff]   ;;  %v5906_v57 = vld [vmem:[%s7382_s11 + $0x6b0] ss:$8 sps:$4 sm:$0xff]  }
  0xee   : > { %4673 = vmatprep.subr.bf16.mxu0 %v5861_v27  ;;  %v5907_v58 = vld [vmem:[%s7382_s11 + $0xc4] ss:$8 sps:$4 sm:$0xff]   ;;  %v5911_v60 = vld [vmem:[%s7382_s11 + $0xc0] ss:$8 sps:$4 sm:$0xff]   ;;  %v5913_v62 = vld [vmem:[%s7382_s11 + $0xd4] ss:$8 sps:$4 sm:$0xff]  }
  0xef   : > { %v5909_v59 = vld [vmem:[%s7382_s11 + $0x6c4] ss:$8 sps:$4 sm:$0xff]   ;;  %v5912_v61 = vld [vmem:[%s7382_s11 + $0x6c0] ss:$8 sps:$4 sm:$0xff]   ;;  %v5915_v63 = vld [vmem:[%s7382_s11 + $0x6d4] ss:$8 sps:$4 sm:$0xff]  }
  0xf0   : > { %4416 = vmatpush1.bf16.msra.mxu1 %v5863_v28  ;;  %v5917_v0 = vld [vmem:[%s7382_s11 + $0xd0] ss:$8 sps:$4 sm:$0xff]   ;;  %v5919_v2 = vld [vmem:[%s7382_s11 + $0xe4] ss:$8 sps:$4 sm:$0xff]   ;;  %v5923_v4 = vld [vmem:[%s7382_s11 + $0xe0] ss:$8 sps:$4 sm:$0xff]  }
  0xf1   : > { %4674 = vmatpush1.bf16.msra.mxu0 %v5864_v29  ;;  %4417 = vmatprep.subr.bf16.mxu1 %v5865_v30  ;;  %v5918_v1 = vld [vmem:[%s7382_s11 + $0x6d0] ss:$8 sps:$4 sm:$0xff]   ;;  %v5921_v3 = vld [vmem:[%s7382_s11 + $0x6e4] ss:$8 sps:$4 sm:$0xff]   ;;  %v5924_v5 = vld [vmem:[%s7382_s11 + $0x6e0] ss:$8 sps:$4 sm:$0xff]  }
  0xf2   : > { %4675 = vmatprep.subr.bf16.mxu0 %v5867_v31  ;;  %v5925_v6 = vld [vmem:[%s7382_s11 + $0xf4] ss:$8 sps:$4 sm:$0xff]   ;;  %v5929_v8 = vld [vmem:[%s7382_s11 + $0xf0] ss:$8 sps:$4 sm:$0xff]   ;;  %v5936_v10 = vld [vmem:[%s7382_s11 + $0x104] ss:$8 sps:$4 sm:$0xff]  }
  0xf3   : > { %v5927_v7 = vld [vmem:[%s7382_s11 + $0x6f4] ss:$8 sps:$4 sm:$0xff]   ;;  %v5930_v9 = vld [vmem:[%s7382_s11 + $0x6f0] ss:$8 sps:$4 sm:$0xff]   ;;  %v5942_v11 = vld [vmem:[%s7382_s11 + $0x704] ss:$8 sps:$4 sm:$0xff]  }
  0xf4   : > { %4418 = vmatpush1.bf16.msra.mxu1 %v5869_v32  ;;  %v5931_v12 = vld [vmem:[%s7891_s0] ss:$100 sps:$4 sm:$0xff]   ;;  %v5937_v13 = vld [vmem:[%s7891_s0 + $0x30] ss:$100 sps:$4 sm:$0xff]   ;;  %s7903_s5 = smov (!%p1872_p9, %s5276_s5), 63 }
  0xf5   : > { %4676 = vmatpush1.bf16.msra.mxu0 %v5870_v33  ;;  %4419 = vmatprep.subr.bf16.mxu1 %v5871_v34  ;;  %v5934_v14 = vld [vmem:[%s7382_s11 + $0x100] ss:$8 sps:$4 sm:$0xff]   ;;  %v5945_v16 = vld [vmem:[%s7382_s11 + $0x114] ss:$8 sps:$4 sm:$0xff]   ;;  %v5943_v18 = vld [vmem:[%s7382_s11 + $0x110] ss:$8 sps:$4 sm:$0xff]  }
  0xf6   : > { %4677 = vmatprep.subr.bf16.mxu0 %v5873_v35  ;;  %v5940_v15 = vld [vmem:[%s7382_s11 + $0x700] ss:$8 sps:$4 sm:$0xff]   ;;  %v5948_v17 = vld [vmem:[%s7382_s11 + $0x714] ss:$8 sps:$4 sm:$0xff]   ;;  %v5946_v19 = vld [vmem:[%s7382_s11 + $0x710] ss:$8 sps:$4 sm:$0xff]  }
  0xf7   : > { %v5951_v20 = vld [vmem:[%s7382_s11 + $0x124] ss:$8 sps:$4 sm:$0xff]   ;;  %v5949_v22 = vld [vmem:[%s7382_s11 + $0x120] ss:$8 sps:$4 sm:$0xff]   ;;  %v5957_v24 = vld [vmem:[%s7382_s11 + $0x134] ss:$8 sps:$4 sm:$0xff]  }
  0xf8   : > { %4420 = vmatpush1.bf16.msra.mxu1 %v5875_v36  ;;  %v5954_v21 = vld [vmem:[%s7382_s11 + $0x724] ss:$8 sps:$4 sm:$0xff]   ;;  %v5952_v23 = vld [vmem:[%s7382_s11 + $0x720] ss:$8 sps:$4 sm:$0xff]   ;;  %v5960_v25 = vld [vmem:[%s7382_s11 + $0x734] ss:$8 sps:$4 sm:$0xff]  }
  0xf9   : > { %4678 = vmatpush1.bf16.msra.mxu0 %v5876_v37  ;;  %4421 = vmatprep.subr.bf16.mxu1 %v5877_v38  ;;  %v5955_v26 = vld [vmem:[%s7382_s11 + $0x130] ss:$8 sps:$4 sm:$0xff]   ;;  %v5963_v28 = vld [vmem:[%s7382_s11 + $0x144] ss:$8 sps:$4 sm:$0xff]   ;;  %v5961_v30 = vld [vmem:[%s7382_s11 + $0x140] ss:$8 sps:$4 sm:$0xff]  }
  0xfa   : > { %4679 = vmatprep.subr.bf16.mxu0 %v5879_v39  ;;  %v5958_v27 = vld [vmem:[%s7382_s11 + $0x730] ss:$8 sps:$4 sm:$0xff]   ;;  %v5966_v29 = vld [vmem:[%s7382_s11 + $0x744] ss:$8 sps:$4 sm:$0xff]   ;;  %v5964_v31 = vld [vmem:[%s7382_s11 + $0x740] ss:$8 sps:$4 sm:$0xff]  }
  0xfb   : > { %v5969_v32 = vld [vmem:[%s7382_s11 + $0x154] ss:$8 sps:$4 sm:$0xff]   ;;  %v5967_v34 = vld [vmem:[%s7382_s11 + $0x150] ss:$8 sps:$4 sm:$0xff]   ;;  %v5975_v36 = vld [vmem:[%s7382_s11 + $0x164] ss:$8 sps:$4 sm:$0xff]  }
  0xfc   : > { %4422 = vmatpush1.bf16.msra.mxu1 %v5881_v40  ;;  %v5972_v33 = vld [vmem:[%s7382_s11 + $0x754] ss:$8 sps:$4 sm:$0xff]   ;;  %v5970_v35 = vld [vmem:[%s7382_s11 + $0x750] ss:$8 sps:$4 sm:$0xff]   ;;  %v5978_v37 = vld [vmem:[%s7382_s11 + $0x764] ss:$8 sps:$4 sm:$0xff]  }
  0xfd   : > { %4680 = vmatpush1.bf16.msra.mxu0 %v5882_v41  ;;  %4423 = vmatprep.subr.bf16.mxu1 %v5883_v42  ;;  %v6035_v38 = vld [vmem:[%s7891_s0 + $0xc] ss:$100 sps:$4 sm:$0xff]   ;;  %v5973_v39 = vld [vmem:[%s7382_s11 + $0x160] ss:$8 sps:$4 sm:$0xff]   ;;  %v5981_v42 = vld [vmem:[%s7382_s11 + $0x174] ss:$8 sps:$4 sm:$0xff]  }
  0xfe   : > { %4681 = vmatprep.subr.bf16.mxu0 %v5885_v43  ;;  %v5976_v40 = vld [vmem:[%s7382_s11 + $0x760] ss:$8 sps:$4 sm:$0xff]   ;;  %v5984_v43 = vld [vmem:[%s7382_s11 + $0x774] ss:$8 sps:$4 sm:$0xff]   ;;  %s5277_s6 = sshll.u32 %s7903_s5, 2 }
  0xff   : > { %v6041_v41 = vld [vmem:[%s7891_s0 + $0x3c] ss:$100 sps:$4 sm:$0xff]   ;;  %s7722_s9 = scalar_lea.vmem %s7894_s3, %s5277_s6 }
 0x100   : > { %4424 = vmatpush1.bf16.msra.mxu1 %v5887_v44  ;;  %v5979_v44 = vld [vmem:[%s7382_s11 + $0x170] ss:$8 sps:$4 sm:$0xff]  }
 0x101   : > { %4682 = vmatpush1.bf16.msra.mxu0 %v5888_v45  ;;  %4425 = vmatprep.subr.bf16.mxu1 %v5889_v46  ;;  %v5982_v45 = vld [vmem:[%s7382_s11 + $0x770] ss:$8 sps:$4 sm:$0xff]   ;;  %v5987_v46 = vld [vmem:[%s7382_s11 + $0x184] ss:$8 sps:$4 sm:$0xff]  }
 0x102   : > { %4683 = vmatprep.subr.bf16.mxu0 %v5891_v47  ;;  %v5990_v47 = vld [vmem:[%s7382_s11 + $0x784] ss:$8 sps:$4 sm:$0xff]  }
 0x104   : > { %4426 = vmatpush1.bf16.msra.mxu1 %v5893_v48  ;;  %v5985_v48 = vld [vmem:[%s7382_s11 + $0x180] ss:$8 sps:$4 sm:$0xff]  }
 0x105   : > { %4684 = vmatpush1.bf16.msra.mxu0 %v5894_v49  ;;  %4427 = vmatprep.subr.bf16.mxu1 %v5895_v50  ;;  %v5988_v49 = vld [vmem:[%s7382_s11 + $0x780] ss:$8 sps:$4 sm:$0xff]   ;;  %v5993_v50 = vld [vmem:[%s7382_s11 + $0x194] ss:$8 sps:$4 sm:$0xff]  }
 0x106   : > { %4685 = vmatprep.subr.bf16.mxu0 %v5897_v51  ;;  %v5996_v51 = vld [vmem:[%s7382_s11 + $0x794] ss:$8 sps:$4 sm:$0xff]  }
 0x108   : > { %4428 = vmatpush1.bf16.msra.mxu1 %v5899_v52  ;;  %v5991_v52 = vld [vmem:[%s7382_s11 + $0x190] ss:$8 sps:$4 sm:$0xff]  }
 0x109   : > { %4686 = vmatpush1.bf16.msra.mxu0 %v5900_v53  ;;  %4429 = vmatprep.subr.bf16.mxu1 %v5901_v54  ;;  %v5994_v53 = vld [vmem:[%s7382_s11 + $0x790] ss:$8 sps:$4 sm:$0xff]   ;;  %v5999_v54 = vld [vmem:[%s7382_s11 + $0x1a4] ss:$8 sps:$4 sm:$0xff]  }
 0x10a   : > { %4687 = vmatprep.subr.bf16.mxu0 %v5903_v55  ;;  %v6002_v55 = vld [vmem:[%s7382_s11 + $0x7a4] ss:$8 sps:$4 sm:$0xff]  }
 0x10c   : > { %4430 = vmatpush1.bf16.msra.mxu1 %v5905_v56  ;;  %v5997_v56 = vld [vmem:[%s7382_s11 + $0x1a0] ss:$8 sps:$4 sm:$0xff]  }
 0x10d   : > { %4688 = vmatpush1.bf16.msra.mxu0 %v5906_v57  ;;  %4431 = vmatprep.subr.bf16.mxu1 %v5907_v58  ;;  %v6000_v57 = vld [vmem:[%s7382_s11 + $0x7a0] ss:$8 sps:$4 sm:$0xff]   ;;  %v6005_v58 = vld [vmem:[%s7382_s11 + $0x1b4] ss:$8 sps:$4 sm:$0xff]  }
 0x10e   : > { %4689 = vmatprep.subr.bf16.mxu0 %v5909_v59  ;;  %v6008_v59 = vld [vmem:[%s7382_s11 + $0x7b4] ss:$8 sps:$4 sm:$0xff]  }
 0x110   : > { %4432 = vmatpush1.bf16.msra.mxu1 %v5911_v60  ;;  %v6003_v60 = vld [vmem:[%s7382_s11 + $0x1b0] ss:$8 sps:$4 sm:$0xff]  }
 0x111   : > { %4690 = vmatpush1.bf16.msra.mxu0 %v5912_v61  ;;  %4433 = vmatprep.subr.bf16.mxu1 %v5913_v62  ;;  %v6006_v61 = vld [vmem:[%s7382_s11 + $0x7b0] ss:$8 sps:$4 sm:$0xff]   ;;  %v6011_v62 = vld [vmem:[%s7382_s11 + $0x1c4] ss:$8 sps:$4 sm:$0xff]  }
 0x112   : > { %4691 = vmatprep.subr.bf16.mxu0 %v5915_v63  ;;  %v6014_v63 = vld [vmem:[%s7382_s11 + $0x7c4] ss:$8 sps:$4 sm:$0xff]  }
 0x114   : > { %4434 = vmatpush1.bf16.msra.mxu1 %v5917_v0  ;;  %v6009_v0 = vld [vmem:[%s7382_s11 + $0x1c0] ss:$8 sps:$4 sm:$0xff]  }
 0x115   : > { %4692 = vmatpush1.bf16.msra.mxu0 %v5918_v1  ;;  %4435 = vmatprep.subr.bf16.mxu1 %v5919_v2  ;;  %v6012_v1 = vld [vmem:[%s7382_s11 + $0x7c0] ss:$8 sps:$4 sm:$0xff]   ;;  %v6017_v2 = vld [vmem:[%s7382_s11 + $0x1d4] ss:$8 sps:$4 sm:$0xff]  }
 0x116   : > { %4693 = vmatprep.subr.bf16.mxu0 %v5921_v3  ;;  %v6020_v3 = vld [vmem:[%s7382_s11 + $0x7d4] ss:$8 sps:$4 sm:$0xff]  }
 0x118   : > { %4436 = vmatpush1.bf16.msra.mxu1 %v5923_v4  ;;  %v6015_v4 = vld [vmem:[%s7382_s11 + $0x1d0] ss:$8 sps:$4 sm:$0xff]  }
 0x119   : > { %4694 = vmatpush1.bf16.msra.mxu0 %v5924_v5  ;;  %4437 = vmatprep.subr.bf16.mxu1 %v5925_v6  ;;  %v6018_v5 = vld [vmem:[%s7382_s11 + $0x7d0] ss:$8 sps:$4 sm:$0xff]   ;;  %v6023_v6 = vld [vmem:[%s7382_s11 + $0x1e4] ss:$8 sps:$4 sm:$0xff]  }
 0x11a   : > { %4695 = vmatprep.subr.bf16.mxu0 %v5927_v7  ;;  %v6026_v7 = vld [vmem:[%s7382_s11 + $0x7e4] ss:$8 sps:$4 sm:$0xff]  }
 0x11c   : > { %4438 = vmatpush1.bf16.msra.mxu1 %v5929_v8  ;;  %v6021_v8 = vld [vmem:[%s7382_s11 + $0x1e0] ss:$8 sps:$4 sm:$0xff]  }
 0x11d   : > { %4696 = vmatpush1.bf16.msra.mxu0 %v5930_v9  ;;  %4450 = vmatprep.subr.bf16.mxu1 %v5936_v10  ;;  %v6024_v9 = vld [vmem:[%s7382_s11 + $0x7e0] ss:$8 sps:$4 sm:$0xff]   ;;  %v6029_v10 = vld [vmem:[%s7382_s11 + $0x1f4] ss:$8 sps:$4 sm:$0xff]  }
 0x11e   : > { %4708 = vmatprep.subr.bf16.mxu0 %v5942_v11  ;;  %v6032_v11 = vld [vmem:[%s7382_s11 + $0x7f4] ss:$8 sps:$4 sm:$0xff]  }
 0x11f   : > { %4440 = vmatmul.mubr.bf16.vlgmr.msra.gmra.mrb[0].mxu1 %v5931_v12  ;;  %v6027_v12 = vld [vmem:[%s7382_s11 + $0x1f0] ss:$8 sps:$4 sm:$0xff]  }
 0x120   : > { %4698 = vmatmul.mubr.bf16.vlgmr.msra.gmra.mrb[0].mxu0 %v5937_v13  ;;  %4451 = vmatpush1.bf16.msra.mxu1 %v5934_v14  ;;  %v6030_v13 = vld [vmem:[%s7382_s11 + $0x7f0] ss:$8 sps:$4 sm:$0xff]   ;;  %v6038_v14 = vld [vmem:[%s7382_s11 + $0x204] ss:$8 sps:$4 sm:$0xff]  }
 0x121   : > { %4709 = vmatpush1.bf16.msra.mxu0 %v5940_v15  ;;  %4452 = vmatprep.subr.bf16.mxu1 %v5945_v16  ;;  %v6044_v15 = vld [vmem:[%s7382_s11 + $0x804] ss:$8 sps:$4 sm:$0xff]  }
 0x122   : > { %4710 = vmatprep.subr.bf16.mxu0 %v5948_v17  ;;  %4482 = vmatprep.mubr.bf16.mxu1 %v6035_v38  ;;  %v6033_v16 = vld [vmem:[%s7891_s0 + $0x8] ss:$100 sps:$4 sm:$0xff]   ;;  %v6071_v38 = vld [vmem:[%s7382_s11 + $0x254] ss:$8 sps:$4 sm:$0xff]  }
 0x123   : > { %4740 = vmatprep.mubr.bf16.mxu0 %v6041_v41  ;;  %v6036_v17 = vld [vmem:[%s7382_s11 + $0x200] ss:$8 sps:$4 sm:$0xff]   ;;  %v6072_v41 = vld [vmem:[%s7382_s11 + $0x850] ss:$8 sps:$4 sm:$0xff]  }
 0x124   : > { %4453 = vmatpush1.bf16.msra.mxu1 %v5943_v18  ;;  %v6039_v18 = vld [vmem:[%s7891_s0 + $0x38] ss:$100 sps:$4 sm:$0xff]  }
 0x125   : > { %4711 = vmatpush1.bf16.msra.mxu0 %v5946_v19  ;;  %4454 = vmatprep.subr.bf16.mxu1 %v5951_v20  ;;  %v6042_v19 = vld [vmem:[%s7382_s11 + $0x800] ss:$8 sps:$4 sm:$0xff]   ;;  %v6047_v20 = vld [vmem:[%s7382_s11 + $0x214] ss:$8 sps:$4 sm:$0xff]  }
 0x126   : > { %4712 = vmatprep.subr.bf16.mxu0 %v5954_v21  ;;  %v6050_v21 = vld [vmem:[%s7382_s11 + $0x814] ss:$8 sps:$4 sm:$0xff]  }
 0x128   : > { %4455 = vmatpush1.bf16.msra.mxu1 %v5949_v22  ;;  %v6045_v22 = vld [vmem:[%s7382_s11 + $0x210] ss:$8 sps:$4 sm:$0xff]  }
 0x129   : > { %4713 = vmatpush1.bf16.msra.mxu0 %v5952_v23  ;;  %4456 = vmatprep.subr.bf16.mxu1 %v5957_v24  ;;  %v6137_v23 = vld [vmem:[%s7891_s0 + $0x14] ss:$100 sps:$4 sm:$0xff]  }
 0x12a   : > { %4714 = vmatprep.subr.bf16.mxu0 %v5960_v25  ;;  %v6048_v24 = vld [vmem:[%s7382_s11 + $0x810] ss:$8 sps:$4 sm:$0xff]   ;;  %v6053_v25 = vld [vmem:[%s7382_s11 + $0x224] ss:$8 sps:$4 sm:$0xff]  }
 0x12c   : > { %4457 = vmatpush1.bf16.msra.mxu1 %v5955_v26  ;;  %v6056_v26 = vld [vmem:[%s7382_s11 + $0x824] ss:$8 sps:$4 sm:$0xff]  }
 0x12d   : > { %4715 = vmatpush1.bf16.msra.mxu0 %v5958_v27  ;;  %4458 = vmatprep.subr.bf16.mxu1 %v5963_v28  ;;  %v6143_v27 = vld [vmem:[%s7891_s0 + $0x44] ss:$100 sps:$4 sm:$0xff]  }
 0x12e   : > { %4716 = vmatprep.subr.bf16.mxu0 %v5966_v29  ;;  %v6051_v28 = vld [vmem:[%s7382_s11 + $0x220] ss:$8 sps:$4 sm:$0xff]  }
 0x12f   : > { %v6054_v29 = vld [vmem:[%s7382_s11 + $0x820] ss:$8 sps:$4 sm:$0xff]  }
 0x130   : > { %4459 = vmatpush1.bf16.msra.mxu1 %v5961_v30  ;;  %v6059_v30 = vld [vmem:[%s7382_s11 + $0x234] ss:$8 sps:$4 sm:$0xff]  }
 0x131   : > { %4717 = vmatpush1.bf16.msra.mxu0 %v5964_v31  ;;  %4460 = vmatprep.subr.bf16.mxu1 %v5969_v32  ;;  %v6062_v31 = vld [vmem:[%s7382_s11 + $0x834] ss:$8 sps:$4 sm:$0xff]   ;;  %v6057_v32 = vld [vmem:[%s7382_s11 + $0x230] ss:$8 sps:$4 sm:$0xff]  }
 0x132   : > { %4718 = vmatprep.subr.bf16.mxu0 %v5972_v33  ;;  %v6060_v33 = vld [vmem:[%s7382_s11 + $0x830] ss:$8 sps:$4 sm:$0xff]  }
 0x134   : > { %4461 = vmatpush1.bf16.msra.mxu1 %v5967_v34  ;;  %v6065_v34 = vld [vmem:[%s7382_s11 + $0x244] ss:$8 sps:$4 sm:$0xff]  }
 0x135   : > { %4719 = vmatpush1.bf16.msra.mxu0 %v5970_v35  ;;  %4462 = vmatprep.subr.bf16.mxu1 %v5975_v36  ;;  %v6068_v35 = vld [vmem:[%s7382_s11 + $0x844] ss:$8 sps:$4 sm:$0xff]   ;;  %v6063_v36 = vld [vmem:[%s7382_s11 + $0x240] ss:$8 sps:$4 sm:$0xff]  }
 0x136   : > { %4720 = vmatprep.subr.bf16.mxu0 %v5978_v37  ;;  %v6066_v37 = vld [vmem:[%s7382_s11 + $0x840] ss:$8 sps:$4 sm:$0xff]  }
 0x138   : > { %4463 = vmatpush1.bf16.msra.mxu1 %v5973_v39  ;;  %v6074_v39 = vld [vmem:[%s7382_s11 + $0x854] ss:$8 sps:$4 sm:$0xff]  }
 0x139   : > { %4721 = vmatpush1.bf16.msra.mxu0 %v5976_v40  ;;  %4464 = vmatprep.subr.bf16.mxu1 %v5981_v42  ;;  %v6069_v40 = vld [vmem:[%s7382_s11 + $0x250] ss:$8 sps:$4 sm:$0xff]   ;;  %v6077_v42 = vld [vmem:[%s7382_s11 + $0x264] ss:$8 sps:$4 sm:$0xff]  }
 0x13a   : > { %4722 = vmatprep.subr.bf16.mxu0 %v5984_v43  ;;  %v6080_v43 = vld [vmem:[%s7382_s11 + $0x864] ss:$8 sps:$4 sm:$0xff]  }
 0x13c   : > { %4465 = vmatpush1.bf16.msra.mxu1 %v5979_v44  ;;  %v6075_v44 = vld [vmem:[%s7382_s11 + $0x260] ss:$8 sps:$4 sm:$0xff]  }
 0x13d   : > { %4723 = vmatpush1.bf16.msra.mxu0 %v5982_v45  ;;  %4466 = vmatprep.subr.bf16.mxu1 %v5987_v46  ;;  %v6078_v45 = vld [vmem:[%s7382_s11 + $0x860] ss:$8 sps:$4 sm:$0xff]   ;;  %v6083_v46 = vld [vmem:[%s7382_s11 + $0x274] ss:$8 sps:$4 sm:$0xff]  }
 0x13e   : > { %4724 = vmatprep.subr.bf16.mxu0 %v5990_v47  ;;  %v6086_v47 = vld [vmem:[%s7382_s11 + $0x874] ss:$8 sps:$4 sm:$0xff]  }
 0x140   : > { %4467 = vmatpush1.bf16.msra.mxu1 %v5985_v48  ;;  %v6081_v48 = vld [vmem:[%s7382_s11 + $0x270] ss:$8 sps:$4 sm:$0xff]  }
 0x141   : > { %4725 = vmatpush1.bf16.msra.mxu0 %v5988_v49  ;;  %4468 = vmatprep.subr.bf16.mxu1 %v5993_v50  ;;  %v6084_v49 = vld [vmem:[%s7382_s11 + $0x870] ss:$8 sps:$4 sm:$0xff]   ;;  %v6089_v50 = vld [vmem:[%s7382_s11 + $0x284] ss:$8 sps:$4 sm:$0xff]  }
 0x142   : > { %4726 = vmatprep.subr.bf16.mxu0 %v5996_v51  ;;  %v6092_v51 = vld [vmem:[%s7382_s11 + $0x884] ss:$8 sps:$4 sm:$0xff]  }
 0x144   : > { %4469 = vmatpush1.bf16.msra.mxu1 %v5991_v52  ;;  %v6087_v52 = vld [vmem:[%s7382_s11 + $0x280] ss:$8 sps:$4 sm:$0xff]  }
 0x145   : > { %4727 = vmatpush1.bf16.msra.mxu0 %v5994_v53  ;;  %4470 = vmatprep.subr.bf16.mxu1 %v5999_v54  ;;  %v6090_v53 = vld [vmem:[%s7382_s11 + $0x880] ss:$8 sps:$4 sm:$0xff]   ;;  %v6095_v54 = vld [vmem:[%s7382_s11 + $0x294] ss:$8 sps:$4 sm:$0xff]  }
 0x146   : > { %4728 = vmatprep.subr.bf16.mxu0 %v6002_v55  ;;  %v6098_v55 = vld [vmem:[%s7382_s11 + $0x894] ss:$8 sps:$4 sm:$0xff]  }
 0x148   : > { %4471 = vmatpush1.bf16.msra.mxu1 %v5997_v56  ;;  %v6093_v56 = vld [vmem:[%s7382_s11 + $0x290] ss:$8 sps:$4 sm:$0xff]  }
 0x149   : > { %4729 = vmatpush1.bf16.msra.mxu0 %v6000_v57  ;;  %4472 = vmatprep.subr.bf16.mxu1 %v6005_v58  ;;  %v6096_v57 = vld [vmem:[%s7382_s11 + $0x890] ss:$8 sps:$4 sm:$0xff]   ;;  %v6101_v58 = vld [vmem:[%s7382_s11 + $0x2a4] ss:$8 sps:$4 sm:$0xff]  }
 0x14a   : > { %4730 = vmatprep.subr.bf16.mxu0 %v6008_v59  ;;  %v6104_v59 = vld [vmem:[%s7382_s11 + $0x8a4] ss:$8 sps:$4 sm:$0xff]  }
 0x14c   : > { %4473 = vmatpush1.bf16.msra.mxu1 %v6003_v60  ;;  %v6099_v60 = vld [vmem:[%s7382_s11 + $0x2a0] ss:$8 sps:$4 sm:$0xff]  }
 0x14d   : > { %4731 = vmatpush1.bf16.msra.mxu0 %v6006_v61  ;;  %4474 = vmatprep.subr.bf16.mxu1 %v6011_v62  ;;  %v6102_v61 = vld [vmem:[%s7382_s11 + $0x8a0] ss:$8 sps:$4 sm:$0xff]   ;;  %v6107_v62 = vld [vmem:[%s7382_s11 + $0x2b4] ss:$8 sps:$4 sm:$0xff]  }
 0x14e   : > { %4732 = vmatprep.subr.bf16.mxu0 %v6014_v63  ;;  %v6110_v63 = vld [vmem:[%s7382_s11 + $0x8b4] ss:$8 sps:$4 sm:$0xff]  }
 0x150   : > { %4475 = vmatpush1.bf16.msra.mxu1 %v6009_v0  ;;  %v6105_v0 = vld [vmem:[%s7382_s11 + $0x2b0] ss:$8 sps:$4 sm:$0xff]  }
 0x151   : > { %4733 = vmatpush1.bf16.msra.mxu0 %v6012_v1  ;;  %4476 = vmatprep.subr.bf16.mxu1 %v6017_v2  ;;  %v6108_v1 = vld [vmem:[%s7382_s11 + $0x8b0] ss:$8 sps:$4 sm:$0xff]   ;;  %v6113_v2 = vld [vmem:[%s7382_s11 + $0x2c4] ss:$8 sps:$4 sm:$0xff]  }
 0x152   : > { %4734 = vmatprep.subr.bf16.mxu0 %v6020_v3  ;;  %v6116_v3 = vld [vmem:[%s7382_s11 + $0x8c4] ss:$8 sps:$4 sm:$0xff]  }
 0x154   : > { %4477 = vmatpush1.bf16.msra.mxu1 %v6015_v4  ;;  %v6111_v4 = vld [vmem:[%s7382_s11 + $0x2c0] ss:$8 sps:$4 sm:$0xff]  }
 0x155   : > { %4735 = vmatpush1.bf16.msra.mxu0 %v6018_v5  ;;  %4478 = vmatprep.subr.bf16.mxu1 %v6023_v6  ;;  %v6114_v5 = vld [vmem:[%s7382_s11 + $0x8c0] ss:$8 sps:$4 sm:$0xff]   ;;  %v6119_v6 = vld [vmem:[%s7382_s11 + $0x2d4] ss:$8 sps:$4 sm:$0xff]  }
 0x156   : > { %4736 = vmatprep.subr.bf16.mxu0 %v6026_v7  ;;  %v6122_v7 = vld [vmem:[%s7382_s11 + $0x8d4] ss:$8 sps:$4 sm:$0xff]  }
 0x158   : > { %4479 = vmatpush1.bf16.msra.mxu1 %v6021_v8  ;;  %v6117_v8 = vld [vmem:[%s7382_s11 + $0x2d0] ss:$8 sps:$4 sm:$0xff]  }
 0x159   : > { %4737 = vmatpush1.bf16.msra.mxu0 %v6024_v9  ;;  %4480 = vmatprep.subr.bf16.mxu1 %v6029_v10  ;;  %v6120_v9 = vld [vmem:[%s7382_s11 + $0x8d0] ss:$8 sps:$4 sm:$0xff]   ;;  %v6125_v10 = vld [vmem:[%s7382_s11 + $0x2e4] ss:$8 sps:$4 sm:$0xff]  }
 0x15a   : > { %4738 = vmatprep.subr.bf16.mxu0 %v6032_v11  ;;  %v6128_v11 = vld [vmem:[%s7382_s11 + $0x8e4] ss:$8 sps:$4 sm:$0xff]  }
 0x15c   : > { %4481 = vmatpush1.bf16.msra.mxu1 %v6027_v12  ;;  %v6123_v12 = vld [vmem:[%s7382_s11 + $0x2e0] ss:$8 sps:$4 sm:$0xff]  }
 0x15d   : > { %4739 = vmatpush1.bf16.msra.mxu0 %v6030_v13  ;;  %4493 = vmatprep.subr.bf16.mxu1 %v6038_v14  ;;  %v6126_v13 = vld [vmem:[%s7382_s11 + $0x8e0] ss:$8 sps:$4 sm:$0xff]   ;;  %v6131_v14 = vld [vmem:[%s7382_s11 + $0x2f4] ss:$8 sps:$4 sm:$0xff]  }
 0x15e   : > { %4751 = vmatprep.subr.bf16.mxu0 %v6044_v15  ;;  %v6134_v15 = vld [vmem:[%s7382_s11 + $0x8f4] ss:$8 sps:$4 sm:$0xff]  }
 0x15f   : > { %4483 = vmatmul.mubr.bf16.vlgmr.msra.gmra.mrb[0].mxu1 %v6033_v16  ;;  %v6129_v16 = vld [vmem:[%s7382_s11 + $0x2f0] ss:$8 sps:$4 sm:$0xff]  }
 0x160   : > { %4741 = vmatmul.mubr.bf16.vlgmr.msra.gmra.mrb[0].mxu0 %v6039_v18  ;;  %4494 = vmatpush1.bf16.msra.mxu1 %v6036_v17  ;;  %v6132_v17 = vld [vmem:[%s7382_s11 + $0x8f0] ss:$8 sps:$4 sm:$0xff]   ;;  %v6140_v18 = vld [vmem:[%s7382_s11 + $0x304] ss:$8 sps:$4 sm:$0xff]  }
 0x161   : > { %4752 = vmatpush1.bf16.msra.mxu0 %v6042_v19  ;;  %4495 = vmatprep.subr.bf16.mxu1 %v6047_v20  ;;  %v6146_v19 = vld [vmem:[%s7382_s11 + $0x904] ss:$8 sps:$4 sm:$0xff]   ;;  %v6135_v20 = vld [vmem:[%s7891_s0 + $0x10] ss:$100 sps:$4 sm:$0xff]  }
 0x162   : > { %4753 = vmatprep.subr.bf16.mxu0 %v6050_v21  ;;  %4525 = vmatprep.mubr.bf16.mxu1 %v6137_v23  ;;  %v6138_v21 = vld [vmem:[%s7382_s11 + $0x300] ss:$8 sps:$4 sm:$0xff]  }
 0x163   : > { %4783 = vmatprep.mubr.bf16.mxu0 %v6143_v27  ;;  %v6144_v23 = vld [vmem:[%s7382_s11 + $0x900] ss:$8 sps:$4 sm:$0xff]   ;;  %v6245_v27 = vld [vmem:[%s7891_s0 + $0x4c] ss:$100 sps:$4 sm:$0xff]  }
 0x164   : > { %4496 = vmatpush1.bf16.msra.mxu1 %v6045_v22  ;;  %v6141_v22 = vld [vmem:[%s7891_s0 + $0x40] ss:$100 sps:$4 sm:$0xff]  }
 0x165   : > { %4754 = vmatpush1.bf16.msra.mxu0 %v6048_v24  ;;  %4497 = vmatprep.subr.bf16.mxu1 %v6053_v25  ;;  %v6149_v24 = vld [vmem:[%s7382_s11 + $0x314] ss:$8 sps:$4 sm:$0xff]  }
 0x166   : > { %4755 = vmatprep.subr.bf16.mxu0 %v6056_v26  ;;  %v6152_v25 = vld [vmem:[%s7382_s11 + $0x914] ss:$8 sps:$4 sm:$0xff]  }
 0x167   : > { %v6239_v26 = vld [vmem:[%s7891_s0 + $0x1c] ss:$100 sps:$4 sm:$0xff]  }
 0x168   : > { %4498 = vmatpush1.bf16.msra.mxu1 %v6051_v28  ;;  %v6147_v28 = vld [vmem:[%s7382_s11 + $0x310] ss:$8 sps:$4 sm:$0xff]  }
 0x169   : > { %4756 = vmatpush1.bf16.msra.mxu0 %v6054_v29  ;;  %4499 = vmatprep.subr.bf16.mxu1 %v6059_v30  ;;  %v6150_v29 = vld [vmem:[%s7382_s11 + $0x910] ss:$8 sps:$4 sm:$0xff]   ;;  %v6155_v30 = vld [vmem:[%s7382_s11 + $0x324] ss:$8 sps:$4 sm:$0xff]  }
 0x16a   : > { %4757 = vmatprep.subr.bf16.mxu0 %v6062_v31  ;;  %v6158_v31 = vld [vmem:[%s7382_s11 + $0x924] ss:$8 sps:$4 sm:$0xff]  }
 0x16c   : > { %4500 = vmatpush1.bf16.msra.mxu1 %v6057_v32  ;;  %v6153_v32 = vld [vmem:[%s7382_s11 + $0x320] ss:$8 sps:$4 sm:$0xff]  }
 0x16d   : > { %4758 = vmatpush1.bf16.msra.mxu0 %v6060_v33  ;;  %4501 = vmatprep.subr.bf16.mxu1 %v6065_v34  ;;  %v6156_v33 = vld [vmem:[%s7382_s11 + $0x920] ss:$8 sps:$4 sm:$0xff]   ;;  %v6161_v34 = vld [vmem:[%s7382_s11 + $0x334] ss:$8 sps:$4 sm:$0xff]  }
 0x16e   : > { %4759 = vmatprep.subr.bf16.mxu0 %v6068_v35  ;;  %v6164_v35 = vld [vmem:[%s7382_s11 + $0x934] ss:$8 sps:$4 sm:$0xff]  }
 0x170   : > { %4502 = vmatpush1.bf16.msra.mxu1 %v6063_v36  ;;  %v6159_v36 = vld [vmem:[%s7382_s11 + $0x330] ss:$8 sps:$4 sm:$0xff]  }
 0x171   : > { %4760 = vmatpush1.bf16.msra.mxu0 %v6066_v37  ;;  %4503 = vmatprep.subr.bf16.mxu1 %v6071_v38  ;;  %v6162_v37 = vld [vmem:[%s7382_s11 + $0x930] ss:$8 sps:$4 sm:$0xff]   ;;  %v6167_v38 = vld [vmem:[%s7382_s11 + $0x344] ss:$8 sps:$4 sm:$0xff]  }
 0x172   : > { %4761 = vmatprep.subr.bf16.mxu0 %v6074_v39  ;;  %v6170_v39 = vld [vmem:[%s7382_s11 + $0x944] ss:$8 sps:$4 sm:$0xff]  }
 0x174   : > { %4504 = vmatpush1.bf16.msra.mxu1 %v6069_v40  ;;  %v6165_v40 = vld [vmem:[%s7382_s11 + $0x340] ss:$8 sps:$4 sm:$0xff]  }
 0x175   : > { %4762 = vmatpush1.bf16.msra.mxu0 %v6072_v41  ;;  %4505 = vmatprep.subr.bf16.mxu1 %v6077_v42  ;;  %v6168_v41 = vld [vmem:[%s7382_s11 + $0x940] ss:$8 sps:$4 sm:$0xff]   ;;  %v6173_v42 = vld [vmem:[%s7382_s11 + $0x354] ss:$8 sps:$4 sm:$0xff]  }
 0x176   : > { %4763 = vmatprep.subr.bf16.mxu0 %v6080_v43  ;;  %v6176_v43 = vld [vmem:[%s7382_s11 + $0x954] ss:$8 sps:$4 sm:$0xff]  }
 0x178   : > { %4506 = vmatpush1.bf16.msra.mxu1 %v6075_v44  ;;  %v6171_v44 = vld [vmem:[%s7382_s11 + $0x350] ss:$8 sps:$4 sm:$0xff]  }
 0x179   : > { %4764 = vmatpush1.bf16.msra.mxu0 %v6078_v45  ;;  %4507 = vmatprep.subr.bf16.mxu1 %v6083_v46  ;;  %v6174_v45 = vld [vmem:[%s7382_s11 + $0x950] ss:$8 sps:$4 sm:$0xff]   ;;  %v6179_v46 = vld [vmem:[%s7382_s11 + $0x364] ss:$8 sps:$4 sm:$0xff]  }
 0x17a   : > { %4765 = vmatprep.subr.bf16.mxu0 %v6086_v47  ;;  %v6182_v47 = vld [vmem:[%s7382_s11 + $0x964] ss:$8 sps:$4 sm:$0xff]  }
 0x17c   : > { %4508 = vmatpush1.bf16.msra.mxu1 %v6081_v48  ;;  %v6177_v48 = vld [vmem:[%s7382_s11 + $0x360] ss:$8 sps:$4 sm:$0xff]  }
 0x17d   : > { %4766 = vmatpush1.bf16.msra.mxu0 %v6084_v49  ;;  %4509 = vmatprep.subr.bf16.mxu1 %v6089_v50  ;;  %v6180_v49 = vld [vmem:[%s7382_s11 + $0x960] ss:$8 sps:$4 sm:$0xff]   ;;  %v6185_v50 = vld [vmem:[%s7382_s11 + $0x374] ss:$8 sps:$4 sm:$0xff]  }
 0x17e   : > { %4767 = vmatprep.subr.bf16.mxu0 %v6092_v51  ;;  %v6188_v51 = vld [vmem:[%s7382_s11 + $0x974] ss:$8 sps:$4 sm:$0xff]  }
 0x180   : > { %4510 = vmatpush1.bf16.msra.mxu1 %v6087_v52  ;;  %v6183_v52 = vld [vmem:[%s7382_s11 + $0x370] ss:$8 sps:$4 sm:$0xff]  }
 0x181   : > { %4768 = vmatpush1.bf16.msra.mxu0 %v6090_v53  ;;  %4511 = vmatprep.subr.bf16.mxu1 %v6095_v54  ;;  %v6186_v53 = vld [vmem:[%s7382_s11 + $0x970] ss:$8 sps:$4 sm:$0xff]   ;;  %v6191_v54 = vld [vmem:[%s7382_s11 + $0x384] ss:$8 sps:$4 sm:$0xff]  }
 0x182   : > { %4769 = vmatprep.subr.bf16.mxu0 %v6098_v55  ;;  %v6194_v55 = vld [vmem:[%s7382_s11 + $0x984] ss:$8 sps:$4 sm:$0xff]  }
 0x184   : > { %4512 = vmatpush1.bf16.msra.mxu1 %v6093_v56  ;;  %v6189_v56 = vld [vmem:[%s7382_s11 + $0x380] ss:$8 sps:$4 sm:$0xff]  }
 0x185   : > { %4770 = vmatpush1.bf16.msra.mxu0 %v6096_v57  ;;  %4513 = vmatprep.subr.bf16.mxu1 %v6101_v58  ;;  %v6192_v57 = vld [vmem:[%s7382_s11 + $0x980] ss:$8 sps:$4 sm:$0xff]   ;;  %v6197_v58 = vld [vmem:[%s7382_s11 + $0x394] ss:$8 sps:$4 sm:$0xff]  }
 0x186   : > { %4771 = vmatprep.subr.bf16.mxu0 %v6104_v59  ;;  %v6200_v59 = vld [vmem:[%s7382_s11 + $0x994] ss:$8 sps:$4 sm:$0xff]  }
 0x188   : > { %4514 = vmatpush1.bf16.msra.mxu1 %v6099_v60  ;;  %v6195_v60 = vld [vmem:[%s7382_s11 + $0x390] ss:$8 sps:$4 sm:$0xff]  }
 0x189   : > { %4772 = vmatpush1.bf16.msra.mxu0 %v6102_v61  ;;  %4515 = vmatprep.subr.bf16.mxu1 %v6107_v62  ;;  %v6198_v61 = vld [vmem:[%s7382_s11 + $0x990] ss:$8 sps:$4 sm:$0xff]   ;;  %v6203_v62 = vld [vmem:[%s7382_s11 + $0x3a4] ss:$8 sps:$4 sm:$0xff]  }
 0x18a   : > { %4773 = vmatprep.subr.bf16.mxu0 %v6110_v63  ;;  %v6206_v63 = vld [vmem:[%s7382_s11 + $0x9a4] ss:$8 sps:$4 sm:$0xff]  }
 0x18c   : > { %4516 = vmatpush1.bf16.msra.mxu1 %v6105_v0  ;;  %v6201_v0 = vld [vmem:[%s7382_s11 + $0x3a0] ss:$8 sps:$4 sm:$0xff]  }
 0x18d   : > { %4774 = vmatpush1.bf16.msra.mxu0 %v6108_v1  ;;  %4517 = vmatprep.subr.bf16.mxu1 %v6113_v2  ;;  %v6204_v1 = vld [vmem:[%s7382_s11 + $0x9a0] ss:$8 sps:$4 sm:$0xff]   ;;  %v6209_v2 = vld [vmem:[%s7382_s11 + $0x3b4] ss:$8 sps:$4 sm:$0xff]  }
 0x18e   : > { %4775 = vmatprep.subr.bf16.mxu0 %v6116_v3  ;;  %v6212_v3 = vld [vmem:[%s7382_s11 + $0x9b4] ss:$8 sps:$4 sm:$0xff]  }
 0x190   : > { %4518 = vmatpush1.bf16.msra.mxu1 %v6111_v4  ;;  %v6207_v4 = vld [vmem:[%s7382_s11 + $0x3b0] ss:$8 sps:$4 sm:$0xff]  }
 0x191   : > { %4776 = vmatpush1.bf16.msra.mxu0 %v6114_v5  ;;  %4519 = vmatprep.subr.bf16.mxu1 %v6119_v6  ;;  %v6210_v5 = vld [vmem:[%s7382_s11 + $0x9b0] ss:$8 sps:$4 sm:$0xff]   ;;  %v6215_v6 = vld [vmem:[%s7382_s11 + $0x3c4] ss:$8 sps:$4 sm:$0xff]  }
 0x192   : > { %4777 = vmatprep.subr.bf16.mxu0 %v6122_v7  ;;  %v6218_v7 = vld [vmem:[%s7382_s11 + $0x9c4] ss:$8 sps:$4 sm:$0xff]  }
 0x194   : > { %4520 = vmatpush1.bf16.msra.mxu1 %v6117_v8  ;;  %v6213_v8 = vld [vmem:[%s7382_s11 + $0x3c0] ss:$8 sps:$4 sm:$0xff]  }
 0x195   : > { %4778 = vmatpush1.bf16.msra.mxu0 %v6120_v9  ;;  %4521 = vmatprep.subr.bf16.mxu1 %v6125_v10  ;;  %v6216_v9 = vld [vmem:[%s7382_s11 + $0x9c0] ss:$8 sps:$4 sm:$0xff]   ;;  %v6221_v10 = vld [vmem:[%s7382_s11 + $0x3d4] ss:$8 sps:$4 sm:$0xff]  }
 0x196   : > { %4779 = vmatprep.subr.bf16.mxu0 %v6128_v11  ;;  %v6224_v11 = vld [vmem:[%s7382_s11 + $0x9d4] ss:$8 sps:$4 sm:$0xff]  }
 0x198   : > { %4522 = vmatpush1.bf16.msra.mxu1 %v6123_v12  ;;  %v6219_v12 = vld [vmem:[%s7382_s11 + $0x3d0] ss:$8 sps:$4 sm:$0xff]  }
 0x199   : > { %4780 = vmatpush1.bf16.msra.mxu0 %v6126_v13  ;;  %4523 = vmatprep.subr.bf16.mxu1 %v6131_v14  ;;  %v6222_v13 = vld [vmem:[%s7382_s11 + $0x9d0] ss:$8 sps:$4 sm:$0xff]   ;;  %v6227_v14 = vld [vmem:[%s7382_s11 + $0x3e4] ss:$8 sps:$4 sm:$0xff]  }
 0x19a   : > { %4781 = vmatprep.subr.bf16.mxu0 %v6134_v15  ;;  %v6230_v15 = vld [vmem:[%s7382_s11 + $0x9e4] ss:$8 sps:$4 sm:$0xff]  }
 0x19c   : > { %4524 = vmatpush1.bf16.msra.mxu1 %v6129_v16  ;;  %v6225_v16 = vld [vmem:[%s7382_s11 + $0x3e0] ss:$8 sps:$4 sm:$0xff]  }
 0x19d   : > { %4782 = vmatpush1.bf16.msra.mxu0 %v6132_v17  ;;  %4536 = vmatprep.subr.bf16.mxu1 %v6140_v18  ;;  %v6228_v17 = vld [vmem:[%s7382_s11 + $0x9e0] ss:$8 sps:$4 sm:$0xff]   ;;  %v6233_v18 = vld [vmem:[%s7382_s11 + $0x3f4] ss:$8 sps:$4 sm:$0xff]  }
 0x19e   : > { %4794 = vmatprep.subr.bf16.mxu0 %v6146_v19  ;;  %v6236_v19 = vld [vmem:[%s7382_s11 + $0x9f4] ss:$8 sps:$4 sm:$0xff]  }
 0x19f   : > { %4526 = vmatmul.mubr.bf16.vlgmr.msra.gmra.mrb[0].mxu1 %v6135_v20  ;;  %v6231_v20 = vld [vmem:[%s7382_s11 + $0x3f0] ss:$8 sps:$4 sm:$0xff]  }
 0x1a0   : > { %4784 = vmatmul.mubr.bf16.vlgmr.msra.gmra.mrb[0].mxu0 %v6141_v22  ;;  %4537 = vmatpush1.bf16.msra.mxu1 %v6138_v21  ;;  %v6234_v21 = vld [vmem:[%s7382_s11 + $0x9f0] ss:$8 sps:$4 sm:$0xff]   ;;  %v6242_v22 = vld [vmem:[%s7382_s11 + $0x404] ss:$8 sps:$4 sm:$0xff]  }
 0x1a1   : > { %4795 = vmatpush1.bf16.msra.mxu0 %v6144_v23  ;;  %4538 = vmatprep.subr.bf16.mxu1 %v6149_v24  ;;  %v6248_v23 = vld [vmem:[%s7382_s11 + $0xa04] ss:$8 sps:$4 sm:$0xff]   ;;  %v6237_v24 = vld [vmem:[%s7891_s0 + $0x18] ss:$100 sps:$4 sm:$0xff]  }
 0x1a2   : > { %4796 = vmatprep.subr.bf16.mxu0 %v6152_v25  ;;  %4568 = vmatprep.mubr.bf16.mxu1 %v6239_v26  ;;  %v6240_v25 = vld [vmem:[%s7382_s11 + $0x400] ss:$8 sps:$4 sm:$0xff]  }
 0x1a3   : > { %4826 = vmatprep.mubr.bf16.mxu0 %v6245_v27  ;;  %v6243_v26 = vld [vmem:[%s7891_s0 + $0x48] ss:$100 sps:$4 sm:$0xff]  }
 0x1a4   : > { %4539 = vmatpush1.bf16.msra.mxu1 %v6147_v28  ;;  %v6246_v27 = vld [vmem:[%s7382_s11 + $0xa00] ss:$8 sps:$4 sm:$0xff]   ;;  %v6251_v28 = vld [vmem:[%s7382_s11 + $0x414] ss:$8 sps:$4 sm:$0xff]  }
 0x1a5   : > { %4797 = vmatpush1.bf16.msra.mxu0 %v6150_v29  ;;  %4540 = vmatprep.subr.bf16.mxu1 %v6155_v30  ;;  %v6254_v29 = vld [vmem:[%s7382_s11 + $0xa14] ss:$8 sps:$4 sm:$0xff]   ;;  %v6341_v30 = vld [vmem:[%s7891_s0 + $0x24] ss:$100 sps:$4 sm:$0xff]  }
 0x1a6   : > { %4798 = vmatprep.subr.bf16.mxu0 %v6158_v31  ;;  %v6347_v31 = vld [vmem:[%s7891_s0 + $0x54] ss:$100 sps:$4 sm:$0xff]  }
 0x1a8   : > { %4541 = vmatpush1.bf16.msra.mxu1 %v6153_v32  ;;  %v6249_v32 = vld [vmem:[%s7382_s11 + $0x410] ss:$8 sps:$4 sm:$0xff]  }
 0x1a9   : > { %4799 = vmatpush1.bf16.msra.mxu0 %v6156_v33  ;;  %4542 = vmatprep.subr.bf16.mxu1 %v6161_v34  ;;  %v6252_v33 = vld [vmem:[%s7382_s11 + $0xa10] ss:$8 sps:$4 sm:$0xff]   ;;  %v6257_v34 = vld [vmem:[%s7382_s11 + $0x424] ss:$8 sps:$4 sm:$0xff]  }
 0x1aa   : > { %4800 = vmatprep.subr.bf16.mxu0 %v6164_v35  ;;  %v6260_v35 = vld [vmem:[%s7382_s11 + $0xa24] ss:$8 sps:$4 sm:$0xff]  }
 0x1ac   : > { %4543 = vmatpush1.bf16.msra.mxu1 %v6159_v36  ;;  %v6255_v36 = vld [vmem:[%s7382_s11 + $0x420] ss:$8 sps:$4 sm:$0xff]  }
 0x1ad   : > { %4801 = vmatpush1.bf16.msra.mxu0 %v6162_v37  ;;  %4544 = vmatprep.subr.bf16.mxu1 %v6167_v38  ;;  %v6258_v37 = vld [vmem:[%s7382_s11 + $0xa20] ss:$8 sps:$4 sm:$0xff]   ;;  %v6263_v38 = vld [vmem:[%s7382_s11 + $0x434] ss:$8 sps:$4 sm:$0xff]  }
 0x1ae   : > { %4802 = vmatprep.subr.bf16.mxu0 %v6170_v39  ;;  %v6266_v39 = vld [vmem:[%s7382_s11 + $0xa34] ss:$8 sps:$4 sm:$0xff]  }
 0x1b0   : > { %4545 = vmatpush1.bf16.msra.mxu1 %v6165_v40  ;;  %v6261_v40 = vld [vmem:[%s7382_s11 + $0x430] ss:$8 sps:$4 sm:$0xff]  }
 0x1b1   : > { %4803 = vmatpush1.bf16.msra.mxu0 %v6168_v41  ;;  %4546 = vmatprep.subr.bf16.mxu1 %v6173_v42  ;;  %v6264_v41 = vld [vmem:[%s7382_s11 + $0xa30] ss:$8 sps:$4 sm:$0xff]   ;;  %v6269_v42 = vld [vmem:[%s7382_s11 + $0x444] ss:$8 sps:$4 sm:$0xff]  }
 0x1b2   : > { %4804 = vmatprep.subr.bf16.mxu0 %v6176_v43  ;;  %v6272_v43 = vld [vmem:[%s7382_s11 + $0xa44] ss:$8 sps:$4 sm:$0xff]  }
 0x1b4   : > { %4547 = vmatpush1.bf16.msra.mxu1 %v6171_v44  ;;  %v6267_v44 = vld [vmem:[%s7382_s11 + $0x440] ss:$8 sps:$4 sm:$0xff]  }
 0x1b5   : > { %4805 = vmatpush1.bf16.msra.mxu0 %v6174_v45  ;;  %4548 = vmatprep.subr.bf16.mxu1 %v6179_v46  ;;  %v6270_v45 = vld [vmem:[%s7382_s11 + $0xa40] ss:$8 sps:$4 sm:$0xff]   ;;  %v6275_v46 = vld [vmem:[%s7382_s11 + $0x454] ss:$8 sps:$4 sm:$0xff]  }
 0x1b6   : > { %4806 = vmatprep.subr.bf16.mxu0 %v6182_v47  ;;  %v6278_v47 = vld [vmem:[%s7382_s11 + $0xa54] ss:$8 sps:$4 sm:$0xff]  }
 0x1b8   : > { %4549 = vmatpush1.bf16.msra.mxu1 %v6177_v48  ;;  %v6273_v48 = vld [vmem:[%s7382_s11 + $0x450] ss:$8 sps:$4 sm:$0xff]  }
 0x1b9   : > { %4807 = vmatpush1.bf16.msra.mxu0 %v6180_v49  ;;  %4550 = vmatprep.subr.bf16.mxu1 %v6185_v50  ;;  %v6276_v49 = vld [vmem:[%s7382_s11 + $0xa50] ss:$8 sps:$4 sm:$0xff]   ;;  %v6281_v50 = vld [vmem:[%s7382_s11 + $0x464] ss:$8 sps:$4 sm:$0xff]  }
 0x1ba   : > { %4808 = vmatprep.subr.bf16.mxu0 %v6188_v51  ;;  %v6284_v51 = vld [vmem:[%s7382_s11 + $0xa64] ss:$8 sps:$4 sm:$0xff]  }
 0x1bc   : > { %4551 = vmatpush1.bf16.msra.mxu1 %v6183_v52  ;;  %v6279_v52 = vld [vmem:[%s7382_s11 + $0x460] ss:$8 sps:$4 sm:$0xff]  }
 0x1bd   : > { %4809 = vmatpush1.bf16.msra.mxu0 %v6186_v53  ;;  %4552 = vmatprep.subr.bf16.mxu1 %v6191_v54  ;;  %v6282_v53 = vld [vmem:[%s7382_s11 + $0xa60] ss:$8 sps:$4 sm:$0xff]   ;;  %v6287_v54 = vld [vmem:[%s7382_s11 + $0x474] ss:$8 sps:$4 sm:$0xff]  }
 0x1be   : > { %4810 = vmatprep.subr.bf16.mxu0 %v6194_v55  ;;  %v6290_v55 = vld [vmem:[%s7382_s11 + $0xa74] ss:$8 sps:$4 sm:$0xff]  }
 0x1c0   : > { %4553 = vmatpush1.bf16.msra.mxu1 %v6189_v56  ;;  %v6285_v56 = vld [vmem:[%s7382_s11 + $0x470] ss:$8 sps:$4 sm:$0xff]  }
 0x1c1   : > { %4811 = vmatpush1.bf16.msra.mxu0 %v6192_v57  ;;  %4554 = vmatprep.subr.bf16.mxu1 %v6197_v58  ;;  %v6288_v57 = vld [vmem:[%s7382_s11 + $0xa70] ss:$8 sps:$4 sm:$0xff]   ;;  %v6293_v58 = vld [vmem:[%s7382_s11 + $0x484] ss:$8 sps:$4 sm:$0xff]  }
 0x1c2   : > { %4812 = vmatprep.subr.bf16.mxu0 %v6200_v59  ;;  %v6296_v59 = vld [vmem:[%s7382_s11 + $0xa84] ss:$8 sps:$4 sm:$0xff]  }
 0x1c4   : > { %4555 = vmatpush1.bf16.msra.mxu1 %v6195_v60  ;;  %v6291_v60 = vld [vmem:[%s7382_s11 + $0x480] ss:$8 sps:$4 sm:$0xff]  }
 0x1c5   : > { %4813 = vmatpush1.bf16.msra.mxu0 %v6198_v61  ;;  %4556 = vmatprep.subr.bf16.mxu1 %v6203_v62  ;;  %v6294_v61 = vld [vmem:[%s7382_s11 + $0xa80] ss:$8 sps:$4 sm:$0xff]   ;;  %v6299_v62 = vld [vmem:[%s7382_s11 + $0x494] ss:$8 sps:$4 sm:$0xff]  }
 0x1c6   : > { %4814 = vmatprep.subr.bf16.mxu0 %v6206_v63  ;;  %v6302_v63 = vld [vmem:[%s7382_s11 + $0xa94] ss:$8 sps:$4 sm:$0xff]  }
 0x1c8   : > { %4557 = vmatpush1.bf16.msra.mxu1 %v6201_v0  ;;  %v6297_v0 = vld [vmem:[%s7382_s11 + $0x490] ss:$8 sps:$4 sm:$0xff]  }
 0x1c9   : > { %4815 = vmatpush1.bf16.msra.mxu0 %v6204_v1  ;;  %4558 = vmatprep.subr.bf16.mxu1 %v6209_v2  ;;  %v6300_v1 = vld [vmem:[%s7382_s11 + $0xa90] ss:$8 sps:$4 sm:$0xff]   ;;  %v6305_v2 = vld [vmem:[%s7382_s11 + $0x4a4] ss:$8 sps:$4 sm:$0xff]  }
 0x1ca   : > { %4816 = vmatprep.subr.bf16.mxu0 %v6212_v3  ;;  %v6308_v3 = vld [vmem:[%s7382_s11 + $0xaa4] ss:$8 sps:$4 sm:$0xff]  }
 0x1cc   : > { %4559 = vmatpush1.bf16.msra.mxu1 %v6207_v4  ;;  %v6303_v4 = vld [vmem:[%s7382_s11 + $0x4a0] ss:$8 sps:$4 sm:$0xff]  }
 0x1cd   : > { %4817 = vmatpush1.bf16.msra.mxu0 %v6210_v5  ;;  %4560 = vmatprep.subr.bf16.mxu1 %v6215_v6  ;;  %v6306_v5 = vld [vmem:[%s7382_s11 + $0xaa0] ss:$8 sps:$4 sm:$0xff]   ;;  %v6311_v6 = vld [vmem:[%s7382_s11 + $0x4b4] ss:$8 sps:$4 sm:$0xff]  }
 0x1ce   : > { %4818 = vmatprep.subr.bf16.mxu0 %v6218_v7  ;;  %v6314_v7 = vld [vmem:[%s7382_s11 + $0xab4] ss:$8 sps:$4 sm:$0xff]  }
 0x1d0   : > { %4561 = vmatpush1.bf16.msra.mxu1 %v6213_v8  ;;  %v6309_v8 = vld [vmem:[%s7382_s11 + $0x4b0] ss:$8 sps:$4 sm:$0xff]  }
 0x1d1   : > { %4819 = vmatpush1.bf16.msra.mxu0 %v6216_v9  ;;  %4562 = vmatprep.subr.bf16.mxu1 %v6221_v10  ;;  %v6312_v9 = vld [vmem:[%s7382_s11 + $0xab0] ss:$8 sps:$4 sm:$0xff]   ;;  %v6317_v10 = vld [vmem:[%s7382_s11 + $0x4c4] ss:$8 sps:$4 sm:$0xff]  }
 0x1d2   : > { %4820 = vmatprep.subr.bf16.mxu0 %v6224_v11  ;;  %v6320_v11 = vld [vmem:[%s7382_s11 + $0xac4] ss:$8 sps:$4 sm:$0xff]  }
 0x1d4   : > { %4563 = vmatpush1.bf16.msra.mxu1 %v6219_v12  ;;  %v6315_v12 = vld [vmem:[%s7382_s11 + $0x4c0] ss:$8 sps:$4 sm:$0xff]  }
 0x1d5   : > { %4821 = vmatpush1.bf16.msra.mxu0 %v6222_v13  ;;  %4564 = vmatprep.subr.bf16.mxu1 %v6227_v14  ;;  %v6318_v13 = vld [vmem:[%s7382_s11 + $0xac0] ss:$8 sps:$4 sm:$0xff]   ;;  %v6323_v14 = vld [vmem:[%s7382_s11 + $0x4d4] ss:$8 sps:$4 sm:$0xff]  }
 0x1d6   : > { %4822 = vmatprep.subr.bf16.mxu0 %v6230_v15  ;;  %v6326_v15 = vld [vmem:[%s7382_s11 + $0xad4] ss:$8 sps:$4 sm:$0xff]  }
 0x1d8   : > { %4565 = vmatpush1.bf16.msra.mxu1 %v6225_v16  ;;  %v6321_v16 = vld [vmem:[%s7382_s11 + $0x4d0] ss:$8 sps:$4 sm:$0xff]  }
 0x1d9   : > { %4823 = vmatpush1.bf16.msra.mxu0 %v6228_v17  ;;  %4566 = vmatprep.subr.bf16.mxu1 %v6233_v18  ;;  %v6324_v17 = vld [vmem:[%s7382_s11 + $0xad0] ss:$8 sps:$4 sm:$0xff]   ;;  %v6329_v18 = vld [vmem:[%s7382_s11 + $0x4e4] ss:$8 sps:$4 sm:$0xff]  }
 0x1da   : > { %4824 = vmatprep.subr.bf16.mxu0 %v6236_v19  ;;  %v6332_v19 = vld [vmem:[%s7382_s11 + $0xae4] ss:$8 sps:$4 sm:$0xff]  }
 0x1dc   : > { %4567 = vmatpush1.bf16.msra.mxu1 %v6231_v20  ;;  %v6327_v20 = vld [vmem:[%s7382_s11 + $0x4e0] ss:$8 sps:$4 sm:$0xff]  }
 0x1dd   : > { %4825 = vmatpush1.bf16.msra.mxu0 %v6234_v21  ;;  %4579 = vmatprep.subr.bf16.mxu1 %v6242_v22  ;;  %v6330_v21 = vld [vmem:[%s7382_s11 + $0xae0] ss:$8 sps:$4 sm:$0xff]   ;;  %v6335_v22 = vld [vmem:[%s7382_s11 + $0x4f4] ss:$8 sps:$4 sm:$0xff]  }
 0x1de   : > { %4837 = vmatprep.subr.bf16.mxu0 %v6248_v23  ;;  %v6338_v23 = vld [vmem:[%s7382_s11 + $0xaf4] ss:$8 sps:$4 sm:$0xff]  }
 0x1df   : > { %4569 = vmatmul.mubr.bf16.vlgmr.msra.gmra.mrb[0].mxu1 %v6237_v24  ;;  %v6333_v24 = vld [vmem:[%s7382_s11 + $0x4f0] ss:$8 sps:$4 sm:$0xff]  }
 0x1e0   : > { %4827 = vmatmul.mubr.bf16.vlgmr.msra.gmra.mrb[0].mxu0 %v6243_v26  ;;  %4580 = vmatpush1.bf16.msra.mxu1 %v6240_v25  ;;  %v6336_v25 = vld [vmem:[%s7382_s11 + $0xaf0] ss:$8 sps:$4 sm:$0xff]   ;;  %v6344_v26 = vld [vmem:[%s7382_s11 + $0x504] ss:$8 sps:$4 sm:$0xff]  }
 0x1e1   : > { %4838 = vmatpush1.bf16.msra.mxu0 %v6246_v27  ;;  %4581 = vmatprep.subr.bf16.mxu1 %v6251_v28  ;;  %v6350_v27 = vld [vmem:[%s7382_s11 + $0xb04] ss:$8 sps:$4 sm:$0xff]  }
 0x1e2   : > { %4839 = vmatprep.subr.bf16.mxu0 %v6254_v29  ;;  %4611 = vmatprep.mubr.bf16.mxu1 %v6341_v30  ;;  %v6339_v28 = vld [vmem:[%s7891_s0 + $0x20] ss:$100 sps:$4 sm:$0xff]   ;;  %v6345_v29 = vld [vmem:[%s7891_s0 + $0x50] ss:$100 sps:$4 sm:$0xff]  }
 0x1e3   : > { %4869 = vmatprep.mubr.bf16.mxu0 %v6347_v31  ;;  %v6342_v30 = vld [vmem:[%s7382_s11 + $0x500] ss:$8 sps:$4 sm:$0xff]  }
 0x1e4   : > { %4582 = vmatpush1.bf16.msra.mxu1 %v6249_v32  ;;  %v6348_v31 = vld [vmem:[%s7382_s11 + $0xb00] ss:$8 sps:$4 sm:$0xff]   ;;  %v6353_v32 = vld [vmem:[%s7382_s11 + $0x514] ss:$8 sps:$4 sm:$0xff]  }
 0x1e5   : > { %4840 = vmatpush1.bf16.msra.mxu0 %v6252_v33  ;;  %4583 = vmatprep.subr.bf16.mxu1 %v6257_v34  ;;  %v6356_v33 = vld [vmem:[%s7382_s11 + $0xb14] ss:$8 sps:$4 sm:$0xff]   ;;  %v6443_v34 = vld [vmem:[%s7891_s0 + $0x2c] ss:$100 sps:$4 sm:$0xff]  }
 0x1e6   : > { %4841 = vmatprep.subr.bf16.mxu0 %v6260_v35  ;;  %v6446_v35 = vld [vmem:[%s7891_s0 + $0x5c] ss:$100 sps:$4 sm:$0xff]  }
 0x1e8   : > { %4584 = vmatpush1.bf16.msra.mxu1 %v6255_v36  ;;  %v6351_v36 = vld [vmem:[%s7382_s11 + $0x510] ss:$8 sps:$4 sm:$0xff]  }
 0x1e9   : > { %4842 = vmatpush1.bf16.msra.mxu0 %v6258_v37  ;;  %4585 = vmatprep.subr.bf16.mxu1 %v6263_v38  ;;  %v6354_v37 = vld [vmem:[%s7382_s11 + $0xb10] ss:$8 sps:$4 sm:$0xff]   ;;  %v6359_v38 = vld [vmem:[%s7382_s11 + $0x524] ss:$8 sps:$4 sm:$0xff]  }
 0x1ea   : > { %4843 = vmatprep.subr.bf16.mxu0 %v6266_v39  ;;  %v6362_v39 = vld [vmem:[%s7382_s11 + $0xb24] ss:$8 sps:$4 sm:$0xff]  }
 0x1ec   : > { %4586 = vmatpush1.bf16.msra.mxu1 %v6261_v40  ;;  %v6357_v40 = vld [vmem:[%s7382_s11 + $0x520] ss:$8 sps:$4 sm:$0xff]  }
 0x1ed   : > { %4844 = vmatpush1.bf16.msra.mxu0 %v6264_v41  ;;  %4587 = vmatprep.subr.bf16.mxu1 %v6269_v42  ;;  %v6360_v41 = vld [vmem:[%s7382_s11 + $0xb20] ss:$8 sps:$4 sm:$0xff]   ;;  %v6365_v42 = vld [vmem:[%s7382_s11 + $0x534] ss:$8 sps:$4 sm:$0xff]  }
 0x1ee   : > { %4845 = vmatprep.subr.bf16.mxu0 %v6272_v43  ;;  %v6368_v43 = vld [vmem:[%s7382_s11 + $0xb34] ss:$8 sps:$4 sm:$0xff]  }
 0x1f0   : > { %4588 = vmatpush1.bf16.msra.mxu1 %v6267_v44  ;;  %v6363_v44 = vld [vmem:[%s7382_s11 + $0x530] ss:$8 sps:$4 sm:$0xff]  }
 0x1f1   : > { %4846 = vmatpush1.bf16.msra.mxu0 %v6270_v45  ;;  %4589 = vmatprep.subr.bf16.mxu1 %v6275_v46  ;;  %v6366_v45 = vld [vmem:[%s7382_s11 + $0xb30] ss:$8 sps:$4 sm:$0xff]   ;;  %v6371_v46 = vld [vmem:[%s7382_s11 + $0x544] ss:$8 sps:$4 sm:$0xff]  }
 0x1f2   : > { %4847 = vmatprep.subr.bf16.mxu0 %v6278_v47  ;;  %v6374_v47 = vld [vmem:[%s7382_s11 + $0xb44] ss:$8 sps:$4 sm:$0xff]  }
 0x1f4   : > { %4590 = vmatpush1.bf16.msra.mxu1 %v6273_v48  ;;  %v6369_v48 = vld [vmem:[%s7382_s11 + $0x540] ss:$8 sps:$4 sm:$0xff]  }
 0x1f5   : > { %4848 = vmatpush1.bf16.msra.mxu0 %v6276_v49  ;;  %4591 = vmatprep.subr.bf16.mxu1 %v6281_v50  ;;  %v6372_v49 = vld [vmem:[%s7382_s11 + $0xb40] ss:$8 sps:$4 sm:$0xff]   ;;  %v6377_v50 = vld [vmem:[%s7382_s11 + $0x554] ss:$8 sps:$4 sm:$0xff]  }
 0x1f6   : > { %4849 = vmatprep.subr.bf16.mxu0 %v6284_v51  ;;  %v6380_v51 = vld [vmem:[%s7382_s11 + $0xb54] ss:$8 sps:$4 sm:$0xff]  }
 0x1f8   : > { %4592 = vmatpush1.bf16.msra.mxu1 %v6279_v52  ;;  %v6375_v52 = vld [vmem:[%s7382_s11 + $0x550] ss:$8 sps:$4 sm:$0xff]  }
 0x1f9   : > { %4850 = vmatpush1.bf16.msra.mxu0 %v6282_v53  ;;  %4593 = vmatprep.subr.bf16.mxu1 %v6287_v54  ;;  %v6378_v53 = vld [vmem:[%s7382_s11 + $0xb50] ss:$8 sps:$4 sm:$0xff]   ;;  %v6383_v54 = vld [vmem:[%s7382_s11 + $0x564] ss:$8 sps:$4 sm:$0xff]  }
 0x1fa   : > { %4851 = vmatprep.subr.bf16.mxu0 %v6290_v55  ;;  %v6386_v55 = vld [vmem:[%s7382_s11 + $0xb64] ss:$8 sps:$4 sm:$0xff]  }
 0x1fc   : > { %4594 = vmatpush1.bf16.msra.mxu1 %v6285_v56  ;;  %v6381_v56 = vld [vmem:[%s7382_s11 + $0x560] ss:$8 sps:$4 sm:$0xff]  }
 0x1fd   : > { %4852 = vmatpush1.bf16.msra.mxu0 %v6288_v57  ;;  %4595 = vmatprep.subr.bf16.mxu1 %v6293_v58  ;;  %v6384_v57 = vld [vmem:[%s7382_s11 + $0xb60] ss:$8 sps:$4 sm:$0xff]   ;;  %v6389_v58 = vld [vmem:[%s7382_s11 + $0x574] ss:$8 sps:$4 sm:$0xff]  }
 0x1fe   : > { %4853 = vmatprep.subr.bf16.mxu0 %v6296_v59  ;;  %v6392_v59 = vld [vmem:[%s7382_s11 + $0xb74] ss:$8 sps:$4 sm:$0xff]  }
 0x200   : > { %4596 = vmatpush1.bf16.msra.mxu1 %v6291_v60  ;;  %v6387_v60 = vld [vmem:[%s7382_s11 + $0x570] ss:$8 sps:$4 sm:$0xff]  }
 0x201   : > { %4854 = vmatpush1.bf16.msra.mxu0 %v6294_v61  ;;  %4597 = vmatprep.subr.bf16.mxu1 %v6299_v62  ;;  %v6390_v61 = vld [vmem:[%s7382_s11 + $0xb70] ss:$8 sps:$4 sm:$0xff]   ;;  %v6395_v62 = vld [vmem:[%s7382_s11 + $0x584] ss:$8 sps:$4 sm:$0xff]  }
 0x202   : > { %4855 = vmatprep.subr.bf16.mxu0 %v6302_v63  ;;  %v6398_v63 = vld [vmem:[%s7382_s11 + $0xb84] ss:$8 sps:$4 sm:$0xff]  }
 0x204   : > { %4598 = vmatpush1.bf16.msra.mxu1 %v6297_v0  ;;  %v6393_v0 = vld [vmem:[%s7382_s11 + $0x580] ss:$8 sps:$4 sm:$0xff]  }
 0x205   : > { %4856 = vmatpush1.bf16.msra.mxu0 %v6300_v1  ;;  %4599 = vmatprep.subr.bf16.mxu1 %v6305_v2  ;;  %v6396_v1 = vld [vmem:[%s7382_s11 + $0xb80] ss:$8 sps:$4 sm:$0xff]   ;;  %v6401_v2 = vld [vmem:[%s7382_s11 + $0x594] ss:$8 sps:$4 sm:$0xff]  }
 0x206   : > { %4857 = vmatprep.subr.bf16.mxu0 %v6308_v3  ;;  %v6404_v3 = vld [vmem:[%s7382_s11 + $0xb94] ss:$8 sps:$4 sm:$0xff]  }
 0x208   : > { %4600 = vmatpush1.bf16.msra.mxu1 %v6303_v4  ;;  %v6399_v4 = vld [vmem:[%s7382_s11 + $0x590] ss:$8 sps:$4 sm:$0xff]  }
 0x209   : > { %4858 = vmatpush1.bf16.msra.mxu0 %v6306_v5  ;;  %4601 = vmatprep.subr.bf16.mxu1 %v6311_v6  ;;  %v6402_v5 = vld [vmem:[%s7382_s11 + $0xb90] ss:$8 sps:$4 sm:$0xff]   ;;  %v6407_v6 = vld [vmem:[%s7382_s11 + $0x5a4] ss:$8 sps:$4 sm:$0xff]  }
 0x20a   : > { %4859 = vmatprep.subr.bf16.mxu0 %v6314_v7  ;;  %v6410_v7 = vld [vmem:[%s7382_s11 + $0xba4] ss:$8 sps:$4 sm:$0xff]  }
 0x20c   : > { %4602 = vmatpush1.bf16.msra.mxu1 %v6309_v8  ;;  %v6405_v8 = vld [vmem:[%s7382_s11 + $0x5a0] ss:$8 sps:$4 sm:$0xff]  }
 0x20d   : > { %4860 = vmatpush1.bf16.msra.mxu0 %v6312_v9  ;;  %4603 = vmatprep.subr.bf16.mxu1 %v6317_v10  ;;  %v6408_v9 = vld [vmem:[%s7382_s11 + $0xba0] ss:$8 sps:$4 sm:$0xff]   ;;  %v6413_v10 = vld [vmem:[%s7382_s11 + $0x5b4] ss:$8 sps:$4 sm:$0xff]  }
 0x20e   : > { %4861 = vmatprep.subr.bf16.mxu0 %v6320_v11  ;;  %v6416_v11 = vld [vmem:[%s7382_s11 + $0xbb4] ss:$8 sps:$4 sm:$0xff]  }
 0x210   : > { %4604 = vmatpush1.bf16.msra.mxu1 %v6315_v12  ;;  %v6411_v12 = vld [vmem:[%s7382_s11 + $0x5b0] ss:$8 sps:$4 sm:$0xff]  }
 0x211   : > { %4862 = vmatpush1.bf16.msra.mxu0 %v6318_v13  ;;  %4605 = vmatprep.subr.bf16.mxu1 %v6323_v14  ;;  %v6414_v13 = vld [vmem:[%s7382_s11 + $0xbb0] ss:$8 sps:$4 sm:$0xff]   ;;  %v6419_v14 = vld [vmem:[%s7382_s11 + $0x5c4] ss:$8 sps:$4 sm:$0xff]  }
 0x212   : > { %4863 = vmatprep.subr.bf16.mxu0 %v6326_v15  ;;  %v6422_v15 = vld [vmem:[%s7382_s11 + $0xbc4] ss:$8 sps:$4 sm:$0xff]  }
 0x214   : > { %4606 = vmatpush1.bf16.msra.mxu1 %v6321_v16  ;;  %v6417_v16 = vld [vmem:[%s7382_s11 + $0x5c0] ss:$8 sps:$4 sm:$0xff]  }
 0x215   : > { %4864 = vmatpush1.bf16.msra.mxu0 %v6324_v17  ;;  %4607 = vmatprep.subr.bf16.mxu1 %v6329_v18  ;;  %v6420_v17 = vld [vmem:[%s7382_s11 + $0xbc0] ss:$8 sps:$4 sm:$0xff]   ;;  %v6425_v18 = vld [vmem:[%s7382_s11 + $0x5d4] ss:$8 sps:$4 sm:$0xff]  }
 0x216   : > { %4865 = vmatprep.subr.bf16.mxu0 %v6332_v19  ;;  %v6428_v19 = vld [vmem:[%s7382_s11 + $0xbd4] ss:$8 sps:$4 sm:$0xff]  }
 0x218   : > { %4608 = vmatpush1.bf16.msra.mxu1 %v6327_v20  ;;  %v6423_v20 = vld [vmem:[%s7382_s11 + $0x5d0] ss:$8 sps:$4 sm:$0xff]  }
 0x219   : > { %4866 = vmatpush1.bf16.msra.mxu0 %v6330_v21  ;;  %4609 = vmatprep.subr.bf16.mxu1 %v6335_v22  ;;  %v6426_v21 = vld [vmem:[%s7382_s11 + $0xbd0] ss:$8 sps:$4 sm:$0xff]   ;;  %v6431_v22 = vld [vmem:[%s7382_s11 + $0x5e4] ss:$8 sps:$4 sm:$0xff]  }
 0x21a   : > { %4867 = vmatprep.subr.bf16.mxu0 %v6338_v23  ;;  %v6434_v23 = vld [vmem:[%s7382_s11 + $0xbe4] ss:$8 sps:$4 sm:$0xff]  }
 0x21c   : > { %4610 = vmatpush1.bf16.msra.mxu1 %v6333_v24  ;;  %v6429_v24 = vld [vmem:[%s7382_s11 + $0x5e0] ss:$8 sps:$4 sm:$0xff]  }
 0x21d   : > { %4868 = vmatpush1.bf16.msra.mxu0 %v6336_v25  ;;  %4622 = vmatprep.subr.bf16.mxu1 %v6344_v26  ;;  %v6432_v25 = vld [vmem:[%s7382_s11 + $0xbe0] ss:$8 sps:$4 sm:$0xff]   ;;  %v6437_v26 = vld [vmem:[%s7382_s11 + $0x5f4] ss:$8 sps:$4 sm:$0xff]  }
 0x21e   : > { %4880 = vmatprep.subr.bf16.mxu0 %v6350_v27  ;;  %v6440_v27 = vld [vmem:[%s7382_s11 + $0xbf4] ss:$8 sps:$4 sm:$0xff]  }
 0x21f   : > { %4612 = vmatmul.mubr.bf16.vlgmr.msra.gmra.mrb[0].mxu1 %v6339_v28  ;;  %v6435_v28 = vld [vmem:[%s7382_s11 + $0x5f0] ss:$8 sps:$4 sm:$0xff]  }
 0x220   : > { %4870 = vmatmul.mubr.bf16.vlgmr.msra.gmra.mrb[0].mxu0 %v6345_v29  ;;  %4623 = vmatpush1.bf16.msra.mxu1 %v6342_v30  ;;  %v6438_v29 = vld [vmem:[%s7382_s11 + $0xbf0] ss:$8 sps:$4 sm:$0xff]   ;;  %v6449_v30 = vld [vmem:[%s7382_s11 + $0xc04] ss:$8 sps:$4 sm:$0xff]  }
 0x221   : > { %4881 = vmatpush1.bf16.msra.mxu0 %v6348_v31  ;;  %4624 = vmatprep.subr.bf16.mxu1 %v6353_v32  ;;  %v6460_v31 = vld [vmem:[%s7722_s9 + $0x40] sm:$0xff]   ;;  %v6441_v32 = vld [vmem:[%s7891_s0 + $0x28] ss:$100 sps:$4 sm:$0xff]  }
 0x222   : > { %4882 = vmatprep.subr.bf16.mxu0 %v6356_v33  ;;  %4654 = vmatprep.mubr.bf16.mxu1 %v6443_v34  ;;  %v6444_v33 = vld [vmem:[%s7891_s0 + $0x58] ss:$100 sps:$4 sm:$0xff]   ;;  %v6447_v34 = vld [vmem:[%s7382_s11 + $0xc00] ss:$8 sps:$4 sm:$0xff]  }
 0x223   : > { %4912 = vmatprep.mubr.bf16.mxu0 %v6446_v35  ;;  %v6452_v35 = vld [vmem:[%s7382_s11 + $0xc14] ss:$8 sps:$4 sm:$0xff]  }
 0x224   : > { %4625 = vmatpush1.bf16.msra.mxu1 %v6351_v36  ;;  %v6461_v36 = vld [vmem:[%s7722_s9] sm:$0xff]  }
 0x225   : > { %4883 = vmatpush1.bf16.msra.mxu0 %v6354_v37  ;;  %4626 = vmatprep.subr.bf16.mxu1 %v6359_v38  ;;  %v6462_v37 = vld [vmem:[%s7722_s9 + $0x48] sm:$0xff]   ;;  %v6450_v38 = vld [vmem:[%s7382_s11 + $0xc10] ss:$8 sps:$4 sm:$0xff]  }
 0x226   : > { %4884 = vmatprep.subr.bf16.mxu0 %v6362_v39  ;;  %v6516_v39 = vmov 0  }
 0x228   : > { %4627 = vmatpush1.bf16.msra.mxu1 %v6357_v40  ;;  %v6455_v40 = vld [vmem:[%s7382_s11 + $0xc24] ss:$8 sps:$4 sm:$0xff]  }
 0x229   : > { %4885 = vmatpush1.bf16.msra.mxu0 %v6360_v41  ;;  %4628 = vmatprep.subr.bf16.mxu1 %v6365_v42  ;;  %v6453_v41 = vld [vmem:[%s7382_s11 + $0xc20] ss:$8 sps:$4 sm:$0xff]   ;;  %v6458_v42 = vld [vmem:[%s7382_s11 + $0xc34] ss:$8 sps:$4 sm:$0xff]  }
 0x22a   : > { %4886 = vmatprep.subr.bf16.mxu0 %v6368_v43  ;;  %v6456_v43 = vld [vmem:[%s7382_s11 + $0xc30] ss:$8 sps:$4 sm:$0xff]   ;;  %s5275_s11 = sshll.u32 %s6506_s17, 1  ;;  %s7907_s17 = smov (!%p1878_p11, %s6506_s17), 1 }
 0x22b   : > { %p1867_p10 = scmp.lt.s32.totalorder %s5275_s11, 3  ;;  %s5717_s8 = sshll.u32 %s7907_s17, 4 }
 0x22c   : > { %4629 = vmatpush1.bf16.msra.mxu1 %v6363_v44  ;;  %v6459_v44 = vld [vmem:[%s7891_s0 + $0x60] ss:$100 sps:$4 sm:$0xff]   ;;  %s1885_s12 = scalar_lea.vmem %s7895_s4, %s5717_s8 }
 0x22d   : > { %4887 = vmatpush1.bf16.msra.mxu0 %v6366_v45  ;;  %4630 = vmatprep.subr.bf16.mxu1 %v6371_v46  ;;  %v6463_v45 = vld [vmem:[%s7722_s9 + $0x8] sm:$0xff]   ;;  %v6464_v46 = vld [vmem:[%s7722_s9 + $0x50] sm:$0xff]   ;;  %s7905_s11 = smov (!%p1867_p10, %s5275_s11), 3 }
 0x22e   : > { %4888 = vmatprep.subr.bf16.mxu0 %v6374_v47  ;;  %v6465_v47 = vld [vmem:[%s7722_s9 + $0x10] sm:$0xff]   ;;  %s1869_s7 = scalar_lea.vmem %s7893_s2, %s7905_s11 }
 0x230   : > { %4631 = vmatpush1.bf16.msra.mxu1 %v6369_v48  ;;  %v6466_v48 = vld [vmem:[%s7722_s9 + $0x58] sm:$0xff]  }
 0x231   : > { %4889 = vmatpush1.bf16.msra.mxu0 %v6372_v49  ;;  %4632 = vmatprep.subr.bf16.mxu1 %v6377_v50  ;;  %v6467_v49 = vld [vmem:[%s7722_s9 + $0x18] sm:$0xff]   ;;  %v6468_v50 = vld [vmem:[%s7722_s9 + $0x60] sm:$0xff]  }
 0x232   : > { %4890 = vmatprep.subr.bf16.mxu0 %v6380_v51  ;;  %v6469_v51 = vld [vmem:[%s7722_s9 + $0x20] sm:$0xff]  }
 0x234   : > { %4633 = vmatpush1.bf16.msra.mxu1 %v6375_v52  ;;  %v6470_v52 = vld [vmem:[%s7722_s9 + $0x68] sm:$0xff]  }
 0x235   : > { %4891 = vmatpush1.bf16.msra.mxu0 %v6378_v53  ;;  %4634 = vmatprep.subr.bf16.mxu1 %v6383_v54  ;;  %v6471_v53 = vld [vmem:[%s7722_s9 + $0x28] sm:$0xff]   ;;  %v6472_v54 = vld [vmem:[%s7722_s9 + $0x70] sm:$0xff]  }
 0x236   : > { %4892 = vmatprep.subr.bf16.mxu0 %v6386_v55  ;;  %v6473_v55 = vld [vmem:[%s7722_s9 + $0x30] sm:$0xff]  }
 0x238   : > { %4635 = vmatpush1.bf16.msra.mxu1 %v6381_v56  ;;  %v6474_v56 = vld [vmem:[%s7722_s9 + $0x78] sm:$0xff]  }
 0x239   : > { %4893 = vmatpush1.bf16.msra.mxu0 %v6384_v57  ;;  %4636 = vmatprep.subr.bf16.mxu1 %v6389_v58  ;;  %v6475_v57 = vld [vmem:[%s7722_s9 + $0x38] sm:$0xff]   ;;  %v2308_v58 = vlaneseq }
 0x23a   : > { %4894 = vmatprep.subr.bf16.mxu0 %v6392_v59 }
 0x23c   : > { %4637 = vmatpush1.bf16.msra.mxu1 %v6387_v60 }
 0x23d   : > { %4895 = vmatpush1.bf16.msra.mxu0 %v6390_v61  ;;  %4638 = vmatprep.subr.bf16.mxu1 %v6395_v62  ;;  %v2309_v62 = vshrl.u32 %v2308_v58, 7 }
 0x23e   : > { %4896 = vmatprep.subr.bf16.mxu0 %v6398_v63 }
 0x240   : > { %4639 = vmatpush1.bf16.msra.mxu1 %v6393_v0  ;;  %v2310_v0 = vsub.s32 0, %v2309_v62 }
 0x241   : > { %4897 = vmatpush1.bf16.msra.mxu0 %v6396_v1  ;;  %4640 = vmatprep.subr.bf16.mxu1 %v6401_v2  ;;  %v2306_v1 = vld [vmem:[%s1869_s7] sm:$0x3]  ;;  %v2314_v2 = vsub.s32 1, %v2309_v62 }
 0x242   : > { %4898 = vmatprep.subr.bf16.mxu0 %v6404_v3  ;;  %v2311_v3 = vrot.slane %v2306_v1, %v2310_v0 }
 0x244   : > { %4641 = vmatpush1.bf16.msra.mxu1 %v6399_v4  ;;  %v2315_v4 = vrot.slane %v2306_v1, %v2314_v2 }
 0x245   : > { %4899 = vmatpush1.bf16.msra.mxu0 %v6402_v5  ;;  %4642 = vmatprep.subr.bf16.mxu1 %v6407_v6 }
 0x246   : > { %4900 = vmatprep.subr.bf16.mxu0 %v6410_v7 }
 0x248   : > { %4643 = vmatpush1.bf16.msra.mxu1 %v6405_v8 }
 0x249   : > { %4901 = vmatpush1.bf16.msra.mxu0 %v6408_v9  ;;  %4644 = vmatprep.subr.bf16.mxu1 %v6413_v10 }
 0x24a   : > { %4902 = vmatprep.subr.bf16.mxu0 %v6416_v11 }
 0x24c   : > { %4645 = vmatpush1.bf16.msra.mxu1 %v6411_v12 }
 0x24d   : > { %4903 = vmatpush1.bf16.msra.mxu0 %v6414_v13  ;;  %4646 = vmatprep.subr.bf16.mxu1 %v6419_v14 }
 0x24e   : > { %4904 = vmatprep.subr.bf16.mxu0 %v6422_v15 }
 0x250   : > { %4647 = vmatpush1.bf16.msra.mxu1 %v6417_v16 }
 0x251   : > { %4905 = vmatpush1.bf16.msra.mxu0 %v6420_v17  ;;  %4648 = vmatprep.subr.bf16.mxu1 %v6425_v18 }
 0x252   : > { %4906 = vmatprep.subr.bf16.mxu0 %v6428_v19 }
 0x254   : > { %4649 = vmatpush1.bf16.msra.mxu1 %v6423_v20 }
 0x255   : > { %4907 = vmatpush1.bf16.msra.mxu0 %v6426_v21  ;;  %4650 = vmatprep.subr.bf16.mxu1 %v6431_v22 }
 0x256   : > { %4908 = vmatprep.subr.bf16.mxu0 %v6434_v23 }
 0x258   : > { %4651 = vmatpush1.bf16.msra.mxu1 %v6429_v24 }
 0x259   : > { %4909 = vmatpush1.bf16.msra.mxu0 %v6432_v25  ;;  %4652 = vmatprep.subr.bf16.mxu1 %v6437_v26 }
 0x25a   : > { %4910 = vmatprep.subr.bf16.mxu0 %v6440_v27 }
 0x25c   : > { %4653 = vmatpush1.bf16.msra.mxu1 %v6435_v28 }
 0x25d   : > { %4911 = vmatpush1.bf16.msra.mxu0 %v6438_v29  ;;  %5718 = vmatprep.subr.bf16.mxu1 %v6460_v31 }
 0x25e   : > { %4923 = vmatprep.subr.bf16.mxu0 %v6449_v30 }
 0x25f   : > { %4655 = vmatmul.mubr.bf16.vlgmr.msra.gmra.mrb[0].mxu1 %v6441_v32 }
 0x260   : > { %4913 = vmatmul.mubr.bf16.vlgmr.msra.gmra.mrb[0].mxu0 %v6444_v33  ;;  %5719 = vmatpush3.bf16.msra.mxu1 %v6461_v36 }
 0x261   : > { %4924 = vmatpush1.bf16.msra.mxu0 %v6447_v34  ;;  %4955 = vmatprep.mubr.bf16.mxu0 %v6516_v39 }
 0x262   : > { %4925 = vmatprep.subr.bf16.mxu0 %v6452_v35  ;;  %5720 = vmatprep.subr.bf16.mxu1 %v6462_v37 }
 0x264   : > { %5721 = vmatpush3.bf16.msra.mxu1 %v6463_v45 }
 0x265   : > { %4926 = vmatpush1.bf16.msra.mxu0 %v6450_v38  ;;  %5722 = vmatprep.subr.bf16.mxu1 %v6464_v46 }
 0x266   : > { %4927 = vmatprep.subr.bf16.mxu0 %v6455_v40 }
 0x268   : > { %5723 = vmatpush3.bf16.msra.mxu1 %v6465_v47 }
 0x269   : > { %4928 = vmatpush1.bf16.msra.mxu0 %v6453_v41  ;;  %5724 = vmatprep.subr.bf16.mxu1 %v6466_v48 }
 0x26a   : > { %4929 = vmatprep.subr.bf16.mxu0 %v6458_v42 }
 0x26c   : > { %5725 = vmatpush3.bf16.msra.mxu1 %v6467_v49 }
 0x26d   : > { %4930 = vmatpush1.bf16.msra.mxu0 %v6456_v43  ;;  %5726 = vmatprep.subr.bf16.mxu1 %v6468_v50 }
 0x270   : > { %5697 = vmatmul.mubr.msk.bf16.vlgmr.msra.gmra.mrb[0].mxu0 %vm4403_vm0, %v6459_v44  ;;  %5727 = vmatpush3.bf16.msra.mxu1 %v6469_v51 }
 0x271   : > { %5728 = vmatprep.subr.bf16.mxu1 %v6470_v52 }
 0x274   : > { %5729 = vmatpush3.bf16.msra.mxu1 %v6471_v53 }
 0x275   : > { %5730 = vmatprep.subr.bf16.mxu1 %v6472_v54 }
 0x278   : > { %5731 = vmatpush3.bf16.msra.mxu1 %v6473_v55 }
 0x279   : > { %5732 = vmatprep.subr.bf16.mxu1 %v6474_v56 }
 0x27c   : > { %5733 = vmatpush3.bf16.msra.mxu1 %v6475_v57 }
 0x332   : > { %v4656_v59 = vpop.f32.mrb[0].mxu1 }
 0x333   : > { %v4658_v60 = vpop.f32.mrb[1].mxu1  ;;  %v5740_v5 = vadd.f32 %v4656_v59, %v2311_v3 }
 0x334   : > { %v4660_v61 = vpop.f32.mrb[2].mxu1  ;;  %v5742_v6 = vadd.f32 %v4658_v60, %v2315_v4 }
 0x335   : > { %v4662_v63 = vpop.f32.mrb[3].mxu1  ;;  %v5744_v8 = vadd.f32 %v4660_v61, %v2311_v3 }
 0x336   : > { %v5746_v11 = vadd.f32 %v4662_v63, %v2315_v4 }
 0x343   : > { %v4957_v7 = vpop.f32.mrb[0].mxu0 }
 0x344   : > { %v5741_v9 = vadd.f32 %v5740_v5, %v4957_v7  ;;  %v4959_v10 = vpop.f32.mrb[1].mxu0 }
 0x345   : > { %v5743_v12 = vadd.f32 %v5742_v6, %v4959_v10  ;;  %v4961_v13 = vpop.f32.mrb[2].mxu0 }
 0x346   : > { %v5745_v14 = vadd.f32 %v5744_v8, %v4961_v13  ;;  %v4963_v15 = vpop.f32.mrb[3].mxu0  ;;  %v4966_v17 = vmax.f32 %v5741_v9, 0.0 }
 0x347   : > { %v5747_v16 = vadd.f32 %v5746_v11, %v4963_v15  ;;  %v4967_v19 = vmax.f32 %v5743_v12, 0.0 }
 0x348   : > { %v4968_v18 = vmax.f32 %v5745_v14, 0.0 }
 0x349   : > { %v4969_v20 = vmax.f32 %v5747_v16, 0.0 }
 0x34a   : > { %v4970_v21 = vpack.c.bf16 %v4968_v18, %v4966_v17 }
 0x34b   : > { %v4971_v22 = vpack.c.bf16 %v4969_v20, %v4967_v19 }
 0x34d   : > { %5132 = vmatprep.mubr.bf16.mxu1 %v4971_v22 }
 0x34e   : > { %5133 = vmatmul.mubr.bf16.vlgmr.msra.gmra.mrb[4].mxu1 %v4970_v21 }
 0x421   : > { %v5734_v23 = vpop.f32.mrb[4].mxu1 }
 0x422   : > { %v5735_v24 = vpop.f32.mrb[5].mxu1 }
 0x423   : > { %v5736_v25 = vadd.f32 %v5735_v24, %v5734_v23  ;;  %v5737_v26 = vpop.f32.mrb[6].mxu1 }
 0x424   : > { %v5738_v27 = vpop.f32.mrb[7].mxu1 }
 0x425   : > { %5142 = vst.msk [vmem:[%s1885_s12] sm:$0xff] %vm5141_vm1, %v5736_v25  ;;  %v5739_v28 = vadd.f32 %v5738_v27, %v5737_v26 }
 0x427   : > { %5143 = vst.msk [vmem:[%s1885_s12 + $0x8] sm:$0xff] %vm5141_vm1, %v5739_v28 }
 0x428 PF: > { %s14_s19 = sadd.s32 1, %s6514_s19   ;;  %s7896_s15 = smov %s6502_s16 }
 0x429   : > { %p11_p12 = scmp.ge.s32.totalorder %s14_s19, 4   ;;  %s7897_s16 = smov %s6577_s23 }
 0x42a   : > { %s7898_s17 = smov %s6510_s18  ;;  %s7899_s18 = smov %s7901_s20 }
 0x42b   :  { %13 = sbr.rel (!%p11_p12) target bundleno = 3 (0x3), region = 118 }

</bundles_post_ra>
